<compile_context>
chip_gen: v6e
topology: v6e:2x2x1
jax: 0.10.0
libtpu: 0.0.40
codegen_flags: <defaults>
</compile_context>

<pallas_src>
import jax
import jax.numpy as jnp
from jax.experimental import pallas as pl
from jax.experimental.pallas import tpu as pltpu

KW = 5            # Conv1d kernel width
CONV_STRIDE = 2
POOL_K = 3
POOL_STRIDE = 2
N_STAGES = 4
CONV_C = 5        # channel count of every conv stage output
CHUNK = 128       # conv/pool output rows produced per inner step (vreg budget)


def _conv_len(L):
    return (L - KW) // CONV_STRIDE + 1


def _pool_len(L):
    return (L - POOL_K) // POOL_STRIDE + 1


# ----------------------------------------------------------------------------
# Fused kernel: 4x (conv+BN+ReLU+pool) + team MLP + predictor + softmax,
# for N = 2*BT samples per grid step (BT match pairs).
# ----------------------------------------------------------------------------
def make_fused_kernel(BT, Lf, H1, n_team_hidden, n_pred_hidden):
    N = 2 * BT

    def kernel(xy_ref,
               cw0, cw1, cw2, cw3, cshift_ref,
               tw1_ref, tb1_ref, twh_ref, tbh_ref, twl_ref, tbl_ref,
               pw0x_ref, pw0y_ref, pb0_ref, pwh_ref, pbh_ref, pwl_ref, pbl_ref,
               o_ref, *scratch):
        h_refs = scratch[:N_STAGES]                 # conv outputs (per stage)
        p_refs = scratch[N_STAGES:2 * N_STAGES]     # pooled outputs (per stage)
        h1p_ref, feats_ref, tf_ref = scratch[2 * N_STAGES:]

        conv_ws = (cw0, cw1, cw2, cw3)

        # ---- conv stages: lane-packed (L on sublanes, N*C on lanes) ----
        src = xy_ref
        for s in range(N_STAGES):
            h_ref = h_refs[s]
            p_ref = p_refs[s]
            L_conv, Cp = h_ref.shape
            L_pool = p_ref.shape[0]
            w_ref = conv_ws[s]                      # (KW, N*C_in, N*C_out) block-diag
            shift = cshift_ref[s]                   # (1, N*C_out) bias+BN folded

            # conv (stride 2, valid) + shift + ReLU, chunked over output rows
            for c0 in range(0, L_conv, CHUNK):
                rows = min(CHUNK, L_conv - c0)
                acc = jnp.zeros((rows, Cp), jnp.float32)
                for k in range(KW):                 # static unrolled taps
                    xs = src[pl.ds(2 * c0 + k, rows, stride=CONV_STRIDE), :]
                    acc = acc + jnp.dot(xs, w_ref[k],
                                        preferred_element_type=jnp.float32)
                h_ref[pl.ds(c0, rows), :] = jnp.maximum(acc + shift, 0.0)

            # MaxPool1d(kernel=3, stride=2), chunked
            for c0 in range(0, L_pool, CHUNK):
                rows = min(CHUNK, L_pool - c0)
                p = h_ref[pl.ds(2 * c0, rows, stride=POOL_STRIDE), :]
                for j in range(1, POOL_K):
                    p = jnp.maximum(
                        p, h_ref[pl.ds(2 * c0 + j, rows, stride=POOL_STRIDE), :])
                p_ref[pl.ds(c0, rows), :] = p
            src = p_ref

        # ---- team MLP layer 0 (PyTorch flatten order absorbed into per-l
        #      block-diagonal weight; output lane-packed (1, N*H1)) ----
        h1p = tb1_ref[...]
        for l in range(Lf):
            h1p = h1p + jnp.dot(src[pl.ds(l, 1), :], tw1_ref[l],
                                preferred_element_type=jnp.float32)
        h1p_ref[...] = jnp.maximum(h1p, 0.0)

        # lane-packed -> sublane-batched: feats[n, :] = h1p[0, n*H1:(n+1)*H1]
        for n in range(N):
            feats_ref[pl.ds(n, 1), :] = h1p_ref[pl.ds(0, 1), pl.ds(n * H1, H1)]

        # ---- team MLP hidden + last (batched over N samples) ----
        h = feats_ref[...]
        for i in range(n_team_hidden):
            h = jnp.maximum(
                jnp.dot(h, twh_ref[i], preferred_element_type=jnp.float32)
                + tbh_ref[i], 0.0)
        tf_ref[...] = (jnp.dot(h, twl_ref[...], preferred_element_type=jnp.float32)
                       + tbl_ref[...])

        xf = tf_ref[pl.ds(0, BT), :]      # features of the BT "x" teams
        yf = tf_ref[pl.ds(BT, BT), :]     # features of the BT "y" teams

        # ---- predictor (concat replaced by split first weight), batched ----
        h = (jnp.dot(xf, pw0x_ref[...], preferred_element_type=jnp.float32)
             + jnp.dot(yf, pw0y_ref[...], preferred_element_type=jnp.float32)
             + pb0_ref[...])
        h = jnp.maximum(h, 0.0)
        for i in range(n_pred_hidden):
            h = jnp.maximum(
                jnp.dot(h, pwh_ref[i], preferred_element_type=jnp.float32)
                + pbh_ref[i], 0.0)
        h = (jnp.dot(h, pwl_ref[...], preferred_element_type=jnp.float32)
             + pbl_ref[...])

        # softmax over the last axis (reciprocal on the EUP)
        m = jnp.max(h, axis=-1, keepdims=True)
        e = jnp.exp(h - m)
        out = e * pl.reciprocal(jnp.sum(e, axis=-1, keepdims=True), approx=True)
        o_ref[...] = out.astype(o_ref.dtype)

    return kernel


def _const_spec(arr):
    nd = arr.ndim
    return pl.BlockSpec(arr.shape, lambda b, _nd=nd: (0,) * _nd)


def _block_diag3(w, N):
    """(k, a, b) -> (k, N*a, N*b) with w[k] repeated on the block diagonal."""
    k, a, b = w.shape
    eye = jnp.eye(N, dtype=w.dtype)
    return jnp.einsum('nm,kab->knamb', eye, w).reshape(k, N * a, N * b)


def base_model_forward_impl(x, y, params, block_pairs=4):
    conv_w = params["conv_w"]          # list of (KW, C_in, 5), BN scale folded
    conv_shift = params["conv_shift"]  # list of (1, 5), bias + BN shift folded
    team_w = params["team_w"]          # [(flat,H1), (H1,H1)x6, (H1,F)]
    team_b = params["team_b"]
    pred_w = params["pred_w"]          # [(2F,H2), (H2,H2)x6, (H2,out)]
    pred_b = params["pred_b"]

    B, C0, L_in = x.shape
    BT = int(block_pairs)
    NB = -(-B // BT)                   # ceil
    B_pad = NB * BT
    N = 2 * BT

    H1 = team_w[0].shape[1]
    F = pred_w[0].shape[0] // 2
    out_size = pred_w[-1].shape[1]
    n_team_hidden = len(team_w) - 2
    n_pred_hidden = len(pred_w) - 2

    # Static stage geometry
    stage_lens = []
    L = L_in
    for _ in range(N_STAGES):
        Lc = _conv_len(L)
        Lp = _pool_len(Lc)
        stage_lens.append((Lc, Lp))
        L = Lp
    Lf = L
    assert team_w[0].shape[0] == CONV_C * Lf, (team_w[0].shape, Lf)
    assert len(conv_w) == N_STAGES

    # Pad batch to a multiple of BT (padded pairs are sliced off at the end).
    if B_pad != B:
        pad = B_pad - B
        x = jnp.concatenate([x, jnp.zeros((pad, C0, L_in), x.dtype)], axis=0)
        y = jnp.concatenate([y, jnp.zeros((pad, C0, L_in), y.dtype)], axis=0)

    # Lane-pack: (NB, L, N*C0) with sample n on lanes [n*C0, (n+1)*C0);
    # n < BT are the x teams of the block, n >= BT the y teams.
    xr = jnp.transpose(x, (0, 2, 1)).reshape(NB, BT, L_in, C0)
    yr = jnp.transpose(y, (0, 2, 1)).reshape(NB, BT, L_in, C0)
    xy = jnp.concatenate([xr, yr], axis=1)                       # (NB, N, L, C0)
    xy = jnp.transpose(xy, (0, 2, 1, 3)).reshape(NB, L_in, N * C0)

    # Block-diagonal conv weights (shared across samples) + tiled shifts.
    cw_bd = [_block_diag3(w, N) for w in conv_w]                 # (KW, N*Cin, N*5)
    cshift_p = jnp.stack([jnp.tile(s, (1, N)) for s in conv_shift])  # (4,1,N*5)

    # Team first layer: absorb PyTorch (C, L)-order flatten, then block-diag.
    w1r = jnp.transpose(team_w[0].reshape(CONV_C, Lf, H1), (1, 0, 2))  # (Lf,5,H1)
    tw1_bd = _block_diag3(w1r, N)                                # (Lf, N*5, N*H1)
    tb1_p = jnp.tile(team_b[0], (1, N))                          # (1, N*H1)

    twh = jnp.stack(team_w[1:-1])                                # (6, H1, H1)
    tbh = jnp.stack(team_b[1:-1])                                # (6, 1, H1)
    twl, tbl = team_w[-1], team_b[-1]                            # (H1,F), (1,F)

    # Predictor: split first weight so the kernel avoids a lane concat.
    pw0x, pw0y, pb0 = pred_w[0][:F], pred_w[0][F:], pred_b[0]
    pwh = jnp.stack(pred_w[1:-1])                                # (6, H2, H2)
    pbh = jnp.stack(pred_b[1:-1])                                # (6, 1, H2)
    pwl, pbl = pred_w[-1], pred_b[-1]                            # (H2,out), (1,out)

    weight_args = [cw_bd[0], cw_bd[1], cw_bd[2], cw_bd[3], cshift_p,
                   tw1_bd, tb1_p, twh, tbh, twl, tbl,
                   pw0x, pw0y, pb0, pwh, pbh, pwl, pbl]

    in_specs = ([pl.BlockSpec((None, L_in, N * C0), lambda i: (i, 0, 0))]
                + [_const_spec(w) for w in weight_args])

    Cp = N * CONV_C
    scratch_shapes = (
        [pltpu.VMEM((Lc, Cp), jnp.float32) for (Lc, _) in stage_lens]
        + [pltpu.VMEM((Lp, Cp), jnp.float32) for (_, Lp) in stage_lens]
        + [pltpu.VMEM((1, N * H1), jnp.float32),     # lane-packed layer-0 out
           pltpu.VMEM((N, H1), jnp.float32),         # sublane-batched features
           pltpu.VMEM((N, F), jnp.float32)])         # team outputs

    kernel = make_fused_kernel(BT, Lf, H1, n_team_hidden, n_pred_hidden)

    out = pl.pallas_call(
        kernel,
        out_shape=jax.ShapeDtypeStruct((NB, BT, out_size), jnp.float32),
        grid_spec=pltpu.PrefetchScalarGridSpec(
            num_scalar_prefetch=0,
            grid=(NB,),
            in_specs=in_specs,
            out_specs=pl.BlockSpec((None, BT, out_size), lambda i: (i, 0, 0)),
            scratch_shapes=scratch_shapes,
        ),
        compiler_params=pltpu.CompilerParams(
            dimension_semantics=("parallel",)),
    )(xy, *weight_args)

    return out.reshape(B_pad, out_size)[:B]


base_model_forward = jax.jit(base_model_forward_impl,
                             static_argnames=("block_pairs",))


# ----------------------------------------------------------------------------
# Pure-JAX reference (same folded params), for correctness checking.
# ----------------------------------------------------------------------------
def reference_forward(x, y, params):
    HI = jax.lax.Precision.HIGHEST

    def team(z):                                   # z: (B, C, L)
        h = z
        for w, sh in zip(params["conv_w"], params["conv_shift"]):
            rhs = jnp.transpose(w, (2, 1, 0))      # (C_out, C_in, KW)
            h = jax.lax.conv_general_dilated(
                h, rhs, window_strides=(CONV_STRIDE,), padding="VALID",
                dimension_numbers=("NCH", "OIH", "NCH"), precision=HI)
            h = jnp.maximum(h + sh.reshape(1, -1, 1), 0.0)
            h = jax.lax.reduce_window(h, -jnp.inf, jax.lax.max,
                                      (1, 1, POOL_K), (1, 1, POOL_STRIDE),
                                      "VALID")
        f = h.reshape(h.shape[0], -1)              # PyTorch (C, L)-order flatten
        for i, (w, b) in enumerate(zip(params["team_w"], params["team_b"])):
            f = jnp.dot(f, w, precision=HI) + b
            if i < len(params["team_w"]) - 1:
                f = jnp.maximum(f, 0.0)
        return f

    h = jnp.concatenate([team(x), team(y)], axis=1)
    for i, (w, b) in enumerate(zip(params["pred_w"], params["pred_b"])):
        h = jnp.dot(h, w, precision=HI) + b
        if i < len(params["pred_w"]) - 1:
            h = jnp.maximum(h, 0.0)
    return jax.nn.softmax(h, axis=-1)


# ----------------------------------------------------------------------------
# Parameter initialization (deterministic, PyTorch-like uniform fan-in scaling)
# ----------------------------------------------------------------------------
def dense_init(key, fan_in, fan_out):
    kw, kb = jax.random.split(key)
    bound = 1.0 / float(fan_in) ** 0.5
    w = jax.random.uniform(kw, (fan_in, fan_out), jnp.float32, -bound, bound)
    b = jax.random.uniform(kb, (1, fan_out), jnp.float32, -bound, bound)
    return w, b


def conv_init(key, c_in, c_out, kw_size):
    kw, kb = jax.random.split(key)
    bound = 1.0 / float(c_in * kw_size) ** 0.5
    # stored as (KW, C_in, C_out) (= PyTorch (C_out, C_in, KW) transposed)
    w = jax.random.uniform(kw, (kw_size, c_in, c_out), jnp.float32, -bound, bound)
    b = jax.random.uniform(kb, (1, c_out), jnp.float32, -bound, bound)
    return w, b


def bn_init(key, c):
    k1, k2, k3, k4 = jax.random.split(key, 4)
    gamma = jax.random.uniform(k1, (1, c), jnp.float32, 0.5, 1.5)
    beta = jax.random.uniform(k2, (1, c), jnp.float32, -0.1, 0.1)
    rmean = jax.random.uniform(k3, (1, c), jnp.float32, -0.1, 0.1)
    rvar = jax.random.uniform(k4, (1, c), jnp.float32, 0.5, 1.5)
    eps = 1e-5
    scale = gamma / jnp.sqrt(rvar + eps)
    shift = beta - rmean * scale
    return scale, shift


def init_params(key, K, input_size, hidden1, feature, hidden2, out_size):
    keys = list(jax.random.split(key, 40))
    ki = iter(keys)

    conv_w, conv_shift = [], []
    c_in, L = K, input_size
    for _ in range(N_STAGES):
        w, b = conv_init(next(ki), c_in, CONV_C, KW)
        scale, shift = bn_init(next(ki), CONV_C)        # eval-mode BN fold
        conv_w.append(w * scale.reshape(1, 1, -1))
        conv_shift.append(b * scale + shift)
        L = _pool_len(_conv_len(L))
        c_in = CONV_C
    flat = CONV_C * L

    # TeamModel MLP: LazyLinear(flat->h1), 6x Linear(h1,h1), Linear(h1,feature)
    team_dims = [flat] + [hidden1] * 7 + [feature]
    team_w, team_b = [], []
    for din, dout in zip(team_dims[:-1], team_dims[1:]):
        w, b = dense_init(next(ki), din, dout)
        team_w.append(w)
        team_b.append(b)

    # Predictor: Linear(2F->h2), 6x Linear(h2,h2), Linear(h2,out), Softmax
    pred_dims = [2 * feature] + [hidden2] * 7 + [out_size]
    pred_w, pred_b = [], []
    for din, dout in zip(pred_dims[:-1], pred_dims[1:]):
        w, b = dense_init(next(ki), din, dout)
        pred_w.append(w)
        pred_b.append(b)

    return {"conv_w": conv_w, "conv_shift": conv_shift,
            "team_w": team_w, "team_b": team_b,
            "pred_w": pred_w, "pred_b": pred_b}


if __name__ == "__main__":
    # Small but valid shapes: the 4 conv+pool stages need input_size >= 681.
    K, input_size = 4, 700
    hidden_size1, feature_size, hidden_size2, output_size = 32, 16, 32, 3
    B = 8            # 8 match pairs; block_pairs=4 -> grid of 2 (fills both v7x TCs)

    key = jax.random.PRNGKey(0)
    kx, ky, kp = jax.random.split(key, 3)
    x = jax.random.normal(kx, (B, K, input_size), jnp.float32)
    y = jax.random.normal(ky, (B, K, input_size), jnp.float32)

    params = init_params(kp, K, input_size, hidden_size1, feature_size,
                         hidden_size2, output_size)

    out = base_model_forward(x, y, params)
    out = jax.block_until_ready(out)

    assert out.shape == (B, output_size), out.shape
    assert bool(jnp.all(jnp.isfinite(out)))
    assert bool(jnp.allclose(jnp.sum(out, axis=-1), 1.0, atol=2e-2))

    ref = reference_forward(x, y, params)
    assert bool(jnp.allclose(out, ref, atol=2e-2)), \
        float(jnp.max(jnp.abs(out - ref)))
    print("KERNEL_OK")
</pallas_src>

<mosaic_0001>
module attributes {stable_mosaic.version = 11 : i64} {
  func.func @kernel(%arg0: i32, %arg1: memref<1x700x32xf32, #tpu.memory_space<vmem>>, %arg2: memref<5x32x40xf32, #tpu.memory_space<vmem>>, %arg3: memref<5x40x40xf32, #tpu.memory_space<vmem>>, %arg4: memref<5x40x40xf32, #tpu.memory_space<vmem>>, %arg5: memref<5x40x40xf32, #tpu.memory_space<vmem>>, %arg6: memref<4x1x40xf32, #tpu.memory_space<vmem>>, %arg7: memref<1x40x256xf32, #tpu.memory_space<vmem>>, %arg8: memref<1x256xf32, #tpu.memory_space<vmem>>, %arg9: memref<6x32x32xf32, #tpu.memory_space<vmem>>, %arg10: memref<6x1x32xf32, #tpu.memory_space<vmem>>, %arg11: memref<32x16xf32, #tpu.memory_space<vmem>>, %arg12: memref<1x16xf32, #tpu.memory_space<vmem>>, %arg13: memref<16x32xf32, #tpu.memory_space<vmem>>, %arg14: memref<16x32xf32, #tpu.memory_space<vmem>>, %arg15: memref<1x32xf32, #tpu.memory_space<vmem>>, %arg16: memref<6x32x32xf32, #tpu.memory_space<vmem>>, %arg17: memref<6x1x32xf32, #tpu.memory_space<vmem>>, %arg18: memref<32x3xf32, #tpu.memory_space<vmem>>, %arg19: memref<1x3xf32, #tpu.memory_space<vmem>>, %arg20: memref<1x4x3xf32, #tpu.memory_space<vmem>>, %arg21: memref<348x40xf32, #tpu.memory_space<vmem>>, %arg22: memref<85x40xf32, #tpu.memory_space<vmem>>, %arg23: memref<19x40xf32, #tpu.memory_space<vmem>>, %arg24: memref<3x40xf32, #tpu.memory_space<vmem>>, %arg25: memref<173x40xf32, #tpu.memory_space<vmem>>, %arg26: memref<42x40xf32, #tpu.memory_space<vmem>>, %arg27: memref<9x40xf32, #tpu.memory_space<vmem>>, %arg28: memref<1x40xf32, #tpu.memory_space<vmem>>, %arg29: memref<1x256xf32, #tpu.memory_space<vmem>>, %arg30: memref<8x32xf32, #tpu.memory_space<vmem>>, %arg31: memref<8x16xf32, #tpu.memory_space<vmem>>) attributes {dimension_semantics = [#tpu.dimension_semantics<parallel>], iteration_bounds = array<i64: 2>, scalar_prefetch = 0 : i64, scratch_operands = 11 : i64, tpu.core_type = #tpu.core_type<tc>, window_params = [{transform_indices = @transform_0, window_bounds = array<i64: 1, 700, 32>}, {pipeline_mode = #tpu.pipeline_mode<synchronous>, transform_indices = @transform_1, window_bounds = array<i64: 5, 32, 40>}, {pipeline_mode = #tpu.pipeline_mode<synchronous>, transform_indices = @transform_2, window_bounds = array<i64: 5, 40, 40>}, {pipeline_mode = #tpu.pipeline_mode<synchronous>, transform_indices = @transform_3, window_bounds = array<i64: 5, 40, 40>}, {pipeline_mode = #tpu.pipeline_mode<synchronous>, transform_indices = @transform_4, window_bounds = array<i64: 5, 40, 40>}, {pipeline_mode = #tpu.pipeline_mode<synchronous>, transform_indices = @transform_5, window_bounds = array<i64: 4, 1, 40>}, {pipeline_mode = #tpu.pipeline_mode<synchronous>, transform_indices = @transform_6, window_bounds = array<i64: 1, 40, 256>}, {pipeline_mode = #tpu.pipeline_mode<synchronous>, transform_indices = @transform_7, window_bounds = array<i64: 1, 256>}, {pipeline_mode = #tpu.pipeline_mode<synchronous>, transform_indices = @transform_8, window_bounds = array<i64: 6, 32, 32>}, {pipeline_mode = #tpu.pipeline_mode<synchronous>, transform_indices = @transform_9, window_bounds = array<i64: 6, 1, 32>}, {pipeline_mode = #tpu.pipeline_mode<synchronous>, transform_indices = @transform_10, window_bounds = array<i64: 32, 16>}, {pipeline_mode = #tpu.pipeline_mode<synchronous>, transform_indices = @transform_11, window_bounds = array<i64: 1, 16>}, {pipeline_mode = #tpu.pipeline_mode<synchronous>, transform_indices = @transform_12, window_bounds = array<i64: 16, 32>}, {pipeline_mode = #tpu.pipeline_mode<synchronous>, transform_indices = @transform_13, window_bounds = array<i64: 16, 32>}, {pipeline_mode = #tpu.pipeline_mode<synchronous>, transform_indices = @transform_14, window_bounds = array<i64: 1, 32>}, {pipeline_mode = #tpu.pipeline_mode<synchronous>, transform_indices = @transform_15, window_bounds = array<i64: 6, 32, 32>}, {pipeline_mode = #tpu.pipeline_mode<synchronous>, transform_indices = @transform_16, window_bounds = array<i64: 6, 1, 32>}, {pipeline_mode = #tpu.pipeline_mode<synchronous>, transform_indices = @transform_17, window_bounds = array<i64: 32, 3>}, {pipeline_mode = #tpu.pipeline_mode<synchronous>, transform_indices = @transform_18, window_bounds = array<i64: 1, 3>}, {transform_indices = @transform_19, window_bounds = array<i64: 1, 4, 3>}]} {
    %c0 = arith.constant 0 : index
    %c0_0 = arith.constant 0 : index
    %c0_1 = arith.constant 0 : index
    %0 = vector.load %arg6[%c0, %c0_0, %c0_1] : memref<4x1x40xf32, #tpu.memory_space<vmem>>, vector<1x1x40xf32>
    %1 = vector.shape_cast %0 : vector<1x1x40xf32> to vector<1x40xf32>
    %cst = arith.constant 0.000000e+00 : f32
    %2 = vector.broadcast %cst : f32 to vector<128x40xf32>
    %c0_2 = arith.constant 0 : index
    %c0_3 = arith.constant 0 : index
    %c0_4 = arith.constant 0 : index
    %3 = tpu.strided_load %arg1[%c0_2, %c0_3, %c0_4] {strides = array<i32: 1, 2, 1>} : memref<1x700x32xf32, #tpu.memory_space<vmem>>, vector<1x128x32xf32>
    %4 = vector.shape_cast %3 : vector<1x128x32xf32> to vector<128x32xf32>
    %c0_5 = arith.constant 0 : index
    %c0_6 = arith.constant 0 : index
    %c0_7 = arith.constant 0 : index
    %5 = vector.load %arg2[%c0_5, %c0_6, %c0_7] : memref<5x32x40xf32, #tpu.memory_space<vmem>>, vector<1x32x40xf32>
    %6 = vector.shape_cast %5 : vector<1x32x40xf32> to vector<32x40xf32>
    %cst_8 = arith.constant dense<0.000000e+00> : vector<128x40xf32>
    %7 = tpu.matmul %4, %6, %cst_8 {dimension_numbers = #tpu.dot_dimension_numbers<[1], [0], [0], [1], [0, 0, 1, 1], [], []>} : vector<128x32xf32>, vector<32x40xf32>, vector<128x40xf32> -> vector<128x40xf32>
    %8 = arith.addf %2, %7 : vector<128x40xf32>
    %c0_9 = arith.constant 0 : index
    %c1 = arith.constant 1 : index
    %c0_10 = arith.constant 0 : index
    %9 = tpu.strided_load %arg1[%c0_9, %c1, %c0_10] {strides = array<i32: 1, 2, 1>} : memref<1x700x32xf32, #tpu.memory_space<vmem>>, vector<1x128x32xf32>
    %10 = vector.shape_cast %9 : vector<1x128x32xf32> to vector<128x32xf32>
    %c1_11 = arith.constant 1 : index
    %c0_12 = arith.constant 0 : index
    %c0_13 = arith.constant 0 : index
    %11 = vector.load %arg2[%c1_11, %c0_12, %c0_13] : memref<5x32x40xf32, #tpu.memory_space<vmem>>, vector<1x32x40xf32>
    %12 = vector.shape_cast %11 : vector<1x32x40xf32> to vector<32x40xf32>
    %cst_14 = arith.constant dense<0.000000e+00> : vector<128x40xf32>
    %13 = tpu.matmul %10, %12, %cst_14 {dimension_numbers = #tpu.dot_dimension_numbers<[1], [0], [0], [1], [0, 0, 1, 1], [], []>} : vector<128x32xf32>, vector<32x40xf32>, vector<128x40xf32> -> vector<128x40xf32>
    %14 = arith.addf %8, %13 : vector<128x40xf32>
    %c0_15 = arith.constant 0 : index
    %c2 = arith.constant 2 : index
    %c0_16 = arith.constant 0 : index
    %15 = tpu.strided_load %arg1[%c0_15, %c2, %c0_16] {strides = array<i32: 1, 2, 1>} : memref<1x700x32xf32, #tpu.memory_space<vmem>>, vector<1x128x32xf32>
    %16 = vector.shape_cast %15 : vector<1x128x32xf32> to vector<128x32xf32>
    %c2_17 = arith.constant 2 : index
    %c0_18 = arith.constant 0 : index
    %c0_19 = arith.constant 0 : index
    %17 = vector.load %arg2[%c2_17, %c0_18, %c0_19] : memref<5x32x40xf32, #tpu.memory_space<vmem>>, vector<1x32x40xf32>
    %18 = vector.shape_cast %17 : vector<1x32x40xf32> to vector<32x40xf32>
    %cst_20 = arith.constant dense<0.000000e+00> : vector<128x40xf32>
    %19 = tpu.matmul %16, %18, %cst_20 {dimension_numbers = #tpu.dot_dimension_numbers<[1], [0], [0], [1], [0, 0, 1, 1], [], []>} : vector<128x32xf32>, vector<32x40xf32>, vector<128x40xf32> -> vector<128x40xf32>
    %20 = arith.addf %14, %19 : vector<128x40xf32>
    %c0_21 = arith.constant 0 : index
    %c3 = arith.constant 3 : index
    %c0_22 = arith.constant 0 : index
    %21 = tpu.strided_load %arg1[%c0_21, %c3, %c0_22] {strides = array<i32: 1, 2, 1>} : memref<1x700x32xf32, #tpu.memory_space<vmem>>, vector<1x128x32xf32>
    %22 = vector.shape_cast %21 : vector<1x128x32xf32> to vector<128x32xf32>
    %c3_23 = arith.constant 3 : index
    %c0_24 = arith.constant 0 : index
    %c0_25 = arith.constant 0 : index
    %23 = vector.load %arg2[%c3_23, %c0_24, %c0_25] : memref<5x32x40xf32, #tpu.memory_space<vmem>>, vector<1x32x40xf32>
    %24 = vector.shape_cast %23 : vector<1x32x40xf32> to vector<32x40xf32>
    %cst_26 = arith.constant dense<0.000000e+00> : vector<128x40xf32>
    %25 = tpu.matmul %22, %24, %cst_26 {dimension_numbers = #tpu.dot_dimension_numbers<[1], [0], [0], [1], [0, 0, 1, 1], [], []>} : vector<128x32xf32>, vector<32x40xf32>, vector<128x40xf32> -> vector<128x40xf32>
    %26 = arith.addf %20, %25 : vector<128x40xf32>
    %c0_27 = arith.constant 0 : index
    %c4 = arith.constant 4 : index
    %c0_28 = arith.constant 0 : index
    %27 = tpu.strided_load %arg1[%c0_27, %c4, %c0_28] {strides = array<i32: 1, 2, 1>} : memref<1x700x32xf32, #tpu.memory_space<vmem>>, vector<1x128x32xf32>
    %28 = vector.shape_cast %27 : vector<1x128x32xf32> to vector<128x32xf32>
    %c4_29 = arith.constant 4 : index
    %c0_30 = arith.constant 0 : index
    %c0_31 = arith.constant 0 : index
    %29 = vector.load %arg2[%c4_29, %c0_30, %c0_31] : memref<5x32x40xf32, #tpu.memory_space<vmem>>, vector<1x32x40xf32>
    %30 = vector.shape_cast %29 : vector<1x32x40xf32> to vector<32x40xf32>
    %cst_32 = arith.constant dense<0.000000e+00> : vector<128x40xf32>
    %31 = tpu.matmul %28, %30, %cst_32 {dimension_numbers = #tpu.dot_dimension_numbers<[1], [0], [0], [1], [0, 0, 1, 1], [], []>} : vector<128x32xf32>, vector<32x40xf32>, vector<128x40xf32> -> vector<128x40xf32>
    %32 = arith.addf %26, %31 : vector<128x40xf32>
    %33 = vector.broadcast %1 : vector<1x40xf32> to vector<128x40xf32>
    %34 = arith.addf %32, %33 : vector<128x40xf32>
    %cst_33 = arith.constant 0.000000e+00 : f32
    %35 = vector.broadcast %cst_33 : f32 to vector<128x40xf32>
    %36 = arith.maximumf %34, %35 : vector<128x40xf32>
    %c0_34 = arith.constant 0 : index
    %c0_35 = arith.constant 0 : index
    %37 = vector.load %arg21[%c0_34, %c0_35] : memref<348x40xf32, #tpu.memory_space<vmem>>, vector<128x40xf32>
    tpu.vector_store %arg21[%c0_34, %c0_35], %36 {strides = array<i32>} : memref<348x40xf32, #tpu.memory_space<vmem>>, vector<128x40xf32>,
    %cst_36 = arith.constant 0.000000e+00 : f32
    %38 = vector.broadcast %cst_36 : f32 to vector<128x40xf32>
    %c0_37 = arith.constant 0 : index
    %c256 = arith.constant 256 : index
    %c0_38 = arith.constant 0 : index
    %39 = tpu.strided_load %arg1[%c0_37, %c256, %c0_38] {strides = array<i32: 1, 2, 1>} : memref<1x700x32xf32, #tpu.memory_space<vmem>>, vector<1x128x32xf32>
    %40 = vector.shape_cast %39 : vector<1x128x32xf32> to vector<128x32xf32>
    %c0_39 = arith.constant 0 : index
    %c0_40 = arith.constant 0 : index
    %c0_41 = arith.constant 0 : index
    %41 = vector.load %arg2[%c0_39, %c0_40, %c0_41] : memref<5x32x40xf32, #tpu.memory_space<vmem>>, vector<1x32x40xf32>
    %42 = vector.shape_cast %41 : vector<1x32x40xf32> to vector<32x40xf32>
    %cst_42 = arith.constant dense<0.000000e+00> : vector<128x40xf32>
    %43 = tpu.matmul %40, %42, %cst_42 {dimension_numbers = #tpu.dot_dimension_numbers<[1], [0], [0], [1], [0, 0, 1, 1], [], []>} : vector<128x32xf32>, vector<32x40xf32>, vector<128x40xf32> -> vector<128x40xf32>
    %44 = arith.addf %38, %43 : vector<128x40xf32>
    %c0_43 = arith.constant 0 : index
    %c257 = arith.constant 257 : index
    %c0_44 = arith.constant 0 : index
    %45 = tpu.strided_load %arg1[%c0_43, %c257, %c0_44] {strides = array<i32: 1, 2, 1>} : memref<1x700x32xf32, #tpu.memory_space<vmem>>, vector<1x128x32xf32>
    %46 = vector.shape_cast %45 : vector<1x128x32xf32> to vector<128x32xf32>
    %c1_45 = arith.constant 1 : index
    %c0_46 = arith.constant 0 : index
    %c0_47 = arith.constant 0 : index
    %47 = vector.load %arg2[%c1_45, %c0_46, %c0_47] : memref<5x32x40xf32, #tpu.memory_space<vmem>>, vector<1x32x40xf32>
    %48 = vector.shape_cast %47 : vector<1x32x40xf32> to vector<32x40xf32>
    %cst_48 = arith.constant dense<0.000000e+00> : vector<128x40xf32>
    %49 = tpu.matmul %46, %48, %cst_48 {dimension_numbers = #tpu.dot_dimension_numbers<[1], [0], [0], [1], [0, 0, 1, 1], [], []>} : vector<128x32xf32>, vector<32x40xf32>, vector<128x40xf32> -> vector<128x40xf32>
    %50 = arith.addf %44, %49 : vector<128x40xf32>
    %c0_49 = arith.constant 0 : index
    %c258 = arith.constant 258 : index
    %c0_50 = arith.constant 0 : index
    %51 = tpu.strided_load %arg1[%c0_49, %c258, %c0_50] {strides = array<i32: 1, 2, 1>} : memref<1x700x32xf32, #tpu.memory_space<vmem>>, vector<1x128x32xf32>
    %52 = vector.shape_cast %51 : vector<1x128x32xf32> to vector<128x32xf32>
    %c2_51 = arith.constant 2 : index
    %c0_52 = arith.constant 0 : index
    %c0_53 = arith.constant 0 : index
    %53 = vector.load %arg2[%c2_51, %c0_52, %c0_53] : memref<5x32x40xf32, #tpu.memory_space<vmem>>, vector<1x32x40xf32>
    %54 = vector.shape_cast %53 : vector<1x32x40xf32> to vector<32x40xf32>
    %cst_54 = arith.constant dense<0.000000e+00> : vector<128x40xf32>
    %55 = tpu.matmul %52, %54, %cst_54 {dimension_numbers = #tpu.dot_dimension_numbers<[1], [0], [0], [1], [0, 0, 1, 1], [], []>} : vector<128x32xf32>, vector<32x40xf32>, vector<128x40xf32> -> vector<128x40xf32>
    %56 = arith.addf %50, %55 : vector<128x40xf32>
    %c0_55 = arith.constant 0 : index
    %c259 = arith.constant 259 : index
    %c0_56 = arith.constant 0 : index
    %57 = tpu.strided_load %arg1[%c0_55, %c259, %c0_56] {strides = array<i32: 1, 2, 1>} : memref<1x700x32xf32, #tpu.memory_space<vmem>>, vector<1x128x32xf32>
    %58 = vector.shape_cast %57 : vector<1x128x32xf32> to vector<128x32xf32>
    %c3_57 = arith.constant 3 : index
    %c0_58 = arith.constant 0 : index
    %c0_59 = arith.constant 0 : index
    %59 = vector.load %arg2[%c3_57, %c0_58, %c0_59] : memref<5x32x40xf32, #tpu.memory_space<vmem>>, vector<1x32x40xf32>
    %60 = vector.shape_cast %59 : vector<1x32x40xf32> to vector<32x40xf32>
    %cst_60 = arith.constant dense<0.000000e+00> : vector<128x40xf32>
    %61 = tpu.matmul %58, %60, %cst_60 {dimension_numbers = #tpu.dot_dimension_numbers<[1], [0], [0], [1], [0, 0, 1, 1], [], []>} : vector<128x32xf32>, vector<32x40xf32>, vector<128x40xf32> -> vector<128x40xf32>
    %62 = arith.addf %56, %61 : vector<128x40xf32>
    %c0_61 = arith.constant 0 : index
    %c260 = arith.constant 260 : index
    %c0_62 = arith.constant 0 : index
    %63 = tpu.strided_load %arg1[%c0_61, %c260, %c0_62] {strides = array<i32: 1, 2, 1>} : memref<1x700x32xf32, #tpu.memory_space<vmem>>, vector<1x128x32xf32>
    %64 = vector.shape_cast %63 : vector<1x128x32xf32> to vector<128x32xf32>
    %c4_63 = arith.constant 4 : index
    %c0_64 = arith.constant 0 : index
    %c0_65 = arith.constant 0 : index
    %65 = vector.load %arg2[%c4_63, %c0_64, %c0_65] : memref<5x32x40xf32, #tpu.memory_space<vmem>>, vector<1x32x40xf32>
    %66 = vector.shape_cast %65 : vector<1x32x40xf32> to vector<32x40xf32>
    %cst_66 = arith.constant dense<0.000000e+00> : vector<128x40xf32>
    %67 = tpu.matmul %64, %66, %cst_66 {dimension_numbers = #tpu.dot_dimension_numbers<[1], [0], [0], [1], [0, 0, 1, 1], [], []>} : vector<128x32xf32>, vector<32x40xf32>, vector<128x40xf32> -> vector<128x40xf32>
    %68 = arith.addf %62, %67 : vector<128x40xf32>
    %69 = vector.broadcast %1 : vector<1x40xf32> to vector<128x40xf32>
    %70 = arith.addf %68, %69 : vector<128x40xf32>
    %cst_67 = arith.constant 0.000000e+00 : f32
    %71 = vector.broadcast %cst_67 : f32 to vector<128x40xf32>
    %72 = arith.maximumf %70, %71 : vector<128x40xf32>
    %c128 = arith.constant 128 : index
    %c0_68 = arith.constant 0 : index
    %73 = vector.load %arg21[%c128, %c0_68] : memref<348x40xf32, #tpu.memory_space<vmem>>, vector<128x40xf32>
    tpu.vector_store %arg21[%c128, %c0_68], %72 {strides = array<i32>} : memref<348x40xf32, #tpu.memory_space<vmem>>, vector<128x40xf32>,
    %cst_69 = arith.constant 0.000000e+00 : f32
    %74 = vector.broadcast %cst_69 : f32 to vector<92x40xf32>
    %c0_70 = arith.constant 0 : index
    %c512 = arith.constant 512 : index
    %c0_71 = arith.constant 0 : index
    %75 = tpu.strided_load %arg1[%c0_70, %c512, %c0_71] {strides = array<i32: 1, 2, 1>} : memref<1x700x32xf32, #tpu.memory_space<vmem>>, vector<1x92x32xf32>
    %76 = vector.shape_cast %75 : vector<1x92x32xf32> to vector<92x32xf32>
    %c0_72 = arith.constant 0 : index
    %c0_73 = arith.constant 0 : index
    %c0_74 = arith.constant 0 : index
    %77 = vector.load %arg2[%c0_72, %c0_73, %c0_74] : memref<5x32x40xf32, #tpu.memory_space<vmem>>, vector<1x32x40xf32>
    %78 = vector.shape_cast %77 : vector<1x32x40xf32> to vector<32x40xf32>
    %cst_75 = arith.constant dense<0.000000e+00> : vector<92x40xf32>
    %79 = tpu.matmul %76, %78, %cst_75 {dimension_numbers = #tpu.dot_dimension_numbers<[1], [0], [0], [1], [0, 0, 1, 1], [], []>} : vector<92x32xf32>, vector<32x40xf32>, vector<92x40xf32> -> vector<92x40xf32>
    %80 = arith.addf %74, %79 : vector<92x40xf32>
    %c0_76 = arith.constant 0 : index
    %c513 = arith.constant 513 : index
    %c0_77 = arith.constant 0 : index
    %81 = tpu.strided_load %arg1[%c0_76, %c513, %c0_77] {strides = array<i32: 1, 2, 1>} : memref<1x700x32xf32, #tpu.memory_space<vmem>>, vector<1x92x32xf32>
    %82 = vector.shape_cast %81 : vector<1x92x32xf32> to vector<92x32xf32>
    %c1_78 = arith.constant 1 : index
    %c0_79 = arith.constant 0 : index
    %c0_80 = arith.constant 0 : index
    %83 = vector.load %arg2[%c1_78, %c0_79, %c0_80] : memref<5x32x40xf32, #tpu.memory_space<vmem>>, vector<1x32x40xf32>
    %84 = vector.shape_cast %83 : vector<1x32x40xf32> to vector<32x40xf32>
    %cst_81 = arith.constant dense<0.000000e+00> : vector<92x40xf32>
    %85 = tpu.matmul %82, %84, %cst_81 {dimension_numbers = #tpu.dot_dimension_numbers<[1], [0], [0], [1], [0, 0, 1, 1], [], []>} : vector<92x32xf32>, vector<32x40xf32>, vector<92x40xf32> -> vector<92x40xf32>
    %86 = arith.addf %80, %85 : vector<92x40xf32>
    %c0_82 = arith.constant 0 : index
    %c514 = arith.constant 514 : index
    %c0_83 = arith.constant 0 : index
    %87 = tpu.strided_load %arg1[%c0_82, %c514, %c0_83] {strides = array<i32: 1, 2, 1>} : memref<1x700x32xf32, #tpu.memory_space<vmem>>, vector<1x92x32xf32>
    %88 = vector.shape_cast %87 : vector<1x92x32xf32> to vector<92x32xf32>
    %c2_84 = arith.constant 2 : index
    %c0_85 = arith.constant 0 : index
    %c0_86 = arith.constant 0 : index
    %89 = vector.load %arg2[%c2_84, %c0_85, %c0_86] : memref<5x32x40xf32, #tpu.memory_space<vmem>>, vector<1x32x40xf32>
    %90 = vector.shape_cast %89 : vector<1x32x40xf32> to vector<32x40xf32>
    %cst_87 = arith.constant dense<0.000000e+00> : vector<92x40xf32>
    %91 = tpu.matmul %88, %90, %cst_87 {dimension_numbers = #tpu.dot_dimension_numbers<[1], [0], [0], [1], [0, 0, 1, 1], [], []>} : vector<92x32xf32>, vector<32x40xf32>, vector<92x40xf32> -> vector<92x40xf32>
    %92 = arith.addf %86, %91 : vector<92x40xf32>
    %c0_88 = arith.constant 0 : index
    %c515 = arith.constant 515 : index
    %c0_89 = arith.constant 0 : index
    %93 = tpu.strided_load %arg1[%c0_88, %c515, %c0_89] {strides = array<i32: 1, 2, 1>} : memref<1x700x32xf32, #tpu.memory_space<vmem>>, vector<1x92x32xf32>
    %94 = vector.shape_cast %93 : vector<1x92x32xf32> to vector<92x32xf32>
    %c3_90 = arith.constant 3 : index
    %c0_91 = arith.constant 0 : index
    %c0_92 = arith.constant 0 : index
    %95 = vector.load %arg2[%c3_90, %c0_91, %c0_92] : memref<5x32x40xf32, #tpu.memory_space<vmem>>, vector<1x32x40xf32>
    %96 = vector.shape_cast %95 : vector<1x32x40xf32> to vector<32x40xf32>
    %cst_93 = arith.constant dense<0.000000e+00> : vector<92x40xf32>
    %97 = tpu.matmul %94, %96, %cst_93 {dimension_numbers = #tpu.dot_dimension_numbers<[1], [0], [0], [1], [0, 0, 1, 1], [], []>} : vector<92x32xf32>, vector<32x40xf32>, vector<92x40xf32> -> vector<92x40xf32>
    %98 = arith.addf %92, %97 : vector<92x40xf32>
    %c0_94 = arith.constant 0 : index
    %c516 = arith.constant 516 : index
    %c0_95 = arith.constant 0 : index
    %99 = tpu.strided_load %arg1[%c0_94, %c516, %c0_95] {strides = array<i32: 1, 2, 1>} : memref<1x700x32xf32, #tpu.memory_space<vmem>>, vector<1x92x32xf32>
    %100 = vector.shape_cast %99 : vector<1x92x32xf32> to vector<92x32xf32>
    %c4_96 = arith.constant 4 : index
    %c0_97 = arith.constant 0 : index
    %c0_98 = arith.constant 0 : index
    %101 = vector.load %arg2[%c4_96, %c0_97, %c0_98] : memref<5x32x40xf32, #tpu.memory_space<vmem>>, vector<1x32x40xf32>
    %102 = vector.shape_cast %101 : vector<1x32x40xf32> to vector<32x40xf32>
    %cst_99 = arith.constant dense<0.000000e+00> : vector<92x40xf32>
    %103 = tpu.matmul %100, %102, %cst_99 {dimension_numbers = #tpu.dot_dimension_numbers<[1], [0], [0], [1], [0, 0, 1, 1], [], []>} : vector<92x32xf32>, vector<32x40xf32>, vector<92x40xf32> -> vector<92x40xf32>
    %104 = arith.addf %98, %103 : vector<92x40xf32>
    %105 = vector.broadcast %1 : vector<1x40xf32> to vector<92x40xf32>
    %106 = arith.addf %104, %105 : vector<92x40xf32>
    %cst_100 = arith.constant 0.000000e+00 : f32
    %107 = vector.broadcast %cst_100 : f32 to vector<92x40xf32>
    %108 = arith.maximumf %106, %107 : vector<92x40xf32>
    %c256_101 = arith.constant 256 : index
    %c0_102 = arith.constant 0 : index
    %109 = vector.load %arg21[%c256_101, %c0_102] : memref<348x40xf32, #tpu.memory_space<vmem>>, vector<92x40xf32>
    tpu.vector_store %arg21[%c256_101, %c0_102], %108 {strides = array<i32>} : memref<348x40xf32, #tpu.memory_space<vmem>>, vector<92x40xf32>,
    %c0_103 = arith.constant 0 : index
    %c0_104 = arith.constant 0 : index
    %110 = tpu.strided_load %arg21[%c0_103, %c0_104] {strides = array<i32: 2, 1>} : memref<348x40xf32, #tpu.memory_space<vmem>>, vector<128x40xf32>
    %c1_105 = arith.constant 1 : index
    %c0_106 = arith.constant 0 : index
    %111 = tpu.strided_load %arg21[%c1_105, %c0_106] {strides = array<i32: 2, 1>} : memref<348x40xf32, #tpu.memory_space<vmem>>, vector<128x40xf32>
    %112 = arith.maximumf %110, %111 : vector<128x40xf32>
    %c2_107 = arith.constant 2 : index
    %c0_108 = arith.constant 0 : index
    %113 = tpu.strided_load %arg21[%c2_107, %c0_108] {strides = array<i32: 2, 1>} : memref<348x40xf32, #tpu.memory_space<vmem>>, vector<128x40xf32>
    %114 = arith.maximumf %112, %113 : vector<128x40xf32>
    %c0_109 = arith.constant 0 : index
    %c0_110 = arith.constant 0 : index
    %115 = vector.load %arg25[%c0_109, %c0_110] : memref<173x40xf32, #tpu.memory_space<vmem>>, vector<128x40xf32>
    tpu.vector_store %arg25[%c0_109, %c0_110], %114 {strides = array<i32>} : memref<173x40xf32, #tpu.memory_space<vmem>>, vector<128x40xf32>,
    %c256_111 = arith.constant 256 : index
    %c0_112 = arith.constant 0 : index
    %116 = tpu.strided_load %arg21[%c256_111, %c0_112] {strides = array<i32: 2, 1>} : memref<348x40xf32, #tpu.memory_space<vmem>>, vector<45x40xf32>
    %c257_113 = arith.constant 257 : index
    %c0_114 = arith.constant 0 : index
    %117 = tpu.strided_load %arg21[%c257_113, %c0_114] {strides = array<i32: 2, 1>} : memref<348x40xf32, #tpu.memory_space<vmem>>, vector<45x40xf32>
    %118 = arith.maximumf %116, %117 : vector<45x40xf32>
    %c258_115 = arith.constant 258 : index
    %c0_116 = arith.constant 0 : index
    %119 = tpu.strided_load %arg21[%c258_115, %c0_116] {strides = array<i32: 2, 1>} : memref<348x40xf32, #tpu.memory_space<vmem>>, vector<45x40xf32>
    %120 = arith.maximumf %118, %119 : vector<45x40xf32>
    %c128_117 = arith.constant 128 : index
    %c0_118 = arith.constant 0 : index
    %121 = vector.load %arg25[%c128_117, %c0_118] : memref<173x40xf32, #tpu.memory_space<vmem>>, vector<45x40xf32>
    tpu.vector_store %arg25[%c128_117, %c0_118], %120 {strides = array<i32>} : memref<173x40xf32, #tpu.memory_space<vmem>>, vector<45x40xf32>,
    %c1_119 = arith.constant 1 : index
    %c0_120 = arith.constant 0 : index
    %c0_121 = arith.constant 0 : index
    %122 = vector.load %arg6[%c1_119, %c0_120, %c0_121] : memref<4x1x40xf32, #tpu.memory_space<vmem>>, vector<1x1x40xf32>
    %123 = vector.shape_cast %122 : vector<1x1x40xf32> to vector<1x40xf32>
    %cst_122 = arith.constant 0.000000e+00 : f32
    %124 = vector.broadcast %cst_122 : f32 to vector<85x40xf32>
    %c0_123 = arith.constant 0 : index
    %c0_124 = arith.constant 0 : index
    %125 = tpu.strided_load %arg25[%c0_123, %c0_124] {strides = array<i32: 2, 1>} : memref<173x40xf32, #tpu.memory_space<vmem>>, vector<85x40xf32>
    %c0_125 = arith.constant 0 : index
    %c0_126 = arith.constant 0 : index
    %c0_127 = arith.constant 0 : index
    %126 = vector.load %arg3[%c0_125, %c0_126, %c0_127] : memref<5x40x40xf32, #tpu.memory_space<vmem>>, vector<1x40x40xf32>
    %127 = vector.shape_cast %126 : vector<1x40x40xf32> to vector<40x40xf32>
    %cst_128 = arith.constant dense<0.000000e+00> : vector<85x40xf32>
    %128 = tpu.matmul %125, %127, %cst_128 {dimension_numbers = #tpu.dot_dimension_numbers<[1], [0], [0], [1], [0, 0, 1, 1], [], []>} : vector<85x40xf32>, vector<40x40xf32>, vector<85x40xf32> -> vector<85x40xf32>
    %129 = arith.addf %124, %128 : vector<85x40xf32>
    %c1_129 = arith.constant 1 : index
    %c0_130 = arith.constant 0 : index
    %130 = tpu.strided_load %arg25[%c1_129, %c0_130] {strides = array<i32: 2, 1>} : memref<173x40xf32, #tpu.memory_space<vmem>>, vector<85x40xf32>
    %c1_131 = arith.constant 1 : index
    %c0_132 = arith.constant 0 : index
    %c0_133 = arith.constant 0 : index
    %131 = vector.load %arg3[%c1_131, %c0_132, %c0_133] : memref<5x40x40xf32, #tpu.memory_space<vmem>>, vector<1x40x40xf32>
    %132 = vector.shape_cast %131 : vector<1x40x40xf32> to vector<40x40xf32>
    %cst_134 = arith.constant dense<0.000000e+00> : vector<85x40xf32>
    %133 = tpu.matmul %130, %132, %cst_134 {dimension_numbers = #tpu.dot_dimension_numbers<[1], [0], [0], [1], [0, 0, 1, 1], [], []>} : vector<85x40xf32>, vector<40x40xf32>, vector<85x40xf32> -> vector<85x40xf32>
    %134 = arith.addf %129, %133 : vector<85x40xf32>
    %c2_135 = arith.constant 2 : index
    %c0_136 = arith.constant 0 : index
    %135 = tpu.strided_load %arg25[%c2_135, %c0_136] {strides = array<i32: 2, 1>} : memref<173x40xf32, #tpu.memory_space<vmem>>, vector<85x40xf32>
    %c2_137 = arith.constant 2 : index
    %c0_138 = arith.constant 0 : index
    %c0_139 = arith.constant 0 : index
    %136 = vector.load %arg3[%c2_137, %c0_138, %c0_139] : memref<5x40x40xf32, #tpu.memory_space<vmem>>, vector<1x40x40xf32>
    %137 = vector.shape_cast %136 : vector<1x40x40xf32> to vector<40x40xf32>
    %cst_140 = arith.constant dense<0.000000e+00> : vector<85x40xf32>
    %138 = tpu.matmul %135, %137, %cst_140 {dimension_numbers = #tpu.dot_dimension_numbers<[1], [0], [0], [1], [0, 0, 1, 1], [], []>} : vector<85x40xf32>, vector<40x40xf32>, vector<85x40xf32> -> vector<85x40xf32>
    %139 = arith.addf %134, %138 : vector<85x40xf32>
    %c3_141 = arith.constant 3 : index
    %c0_142 = arith.constant 0 : index
    %140 = tpu.strided_load %arg25[%c3_141, %c0_142] {strides = array<i32: 2, 1>} : memref<173x40xf32, #tpu.memory_space<vmem>>, vector<85x40xf32>
    %c3_143 = arith.constant 3 : index
    %c0_144 = arith.constant 0 : index
    %c0_145 = arith.constant 0 : index
    %141 = vector.load %arg3[%c3_143, %c0_144, %c0_145] : memref<5x40x40xf32, #tpu.memory_space<vmem>>, vector<1x40x40xf32>
    %142 = vector.shape_cast %141 : vector<1x40x40xf32> to vector<40x40xf32>
    %cst_146 = arith.constant dense<0.000000e+00> : vector<85x40xf32>
    %143 = tpu.matmul %140, %142, %cst_146 {dimension_numbers = #tpu.dot_dimension_numbers<[1], [0], [0], [1], [0, 0, 1, 1], [], []>} : vector<85x40xf32>, vector<40x40xf32>, vector<85x40xf32> -> vector<85x40xf32>
    %144 = arith.addf %139, %143 : vector<85x40xf32>
    %c4_147 = arith.constant 4 : index
    %c0_148 = arith.constant 0 : index
    %145 = tpu.strided_load %arg25[%c4_147, %c0_148] {strides = array<i32: 2, 1>} : memref<173x40xf32, #tpu.memory_space<vmem>>, vector<85x40xf32>
    %c4_149 = arith.constant 4 : index
    %c0_150 = arith.constant 0 : index
    %c0_151 = arith.constant 0 : index
    %146 = vector.load %arg3[%c4_149, %c0_150, %c0_151] : memref<5x40x40xf32, #tpu.memory_space<vmem>>, vector<1x40x40xf32>
    %147 = vector.shape_cast %146 : vector<1x40x40xf32> to vector<40x40xf32>
    %cst_152 = arith.constant dense<0.000000e+00> : vector<85x40xf32>
    %148 = tpu.matmul %145, %147, %cst_152 {dimension_numbers = #tpu.dot_dimension_numbers<[1], [0], [0], [1], [0, 0, 1, 1], [], []>} : vector<85x40xf32>, vector<40x40xf32>, vector<85x40xf32> -> vector<85x40xf32>
    %149 = arith.addf %144, %148 : vector<85x40xf32>
    %150 = vector.broadcast %123 : vector<1x40xf32> to vector<85x40xf32>
    %151 = arith.addf %149, %150 : vector<85x40xf32>
    %cst_153 = arith.constant 0.000000e+00 : f32
    %152 = vector.broadcast %cst_153 : f32 to vector<85x40xf32>
    %153 = arith.maximumf %151, %152 : vector<85x40xf32>
    %c0_154 = arith.constant 0 : index
    %c0_155 = arith.constant 0 : index
    %154 = vector.load %arg22[%c0_154, %c0_155] : memref<85x40xf32, #tpu.memory_space<vmem>>, vector<85x40xf32>
    tpu.vector_store %arg22[%c0_154, %c0_155], %153 {strides = array<i32>} : memref<85x40xf32, #tpu.memory_space<vmem>>, vector<85x40xf32>,
    %c0_156 = arith.constant 0 : index
    %c0_157 = arith.constant 0 : index
    %155 = tpu.strided_load %arg22[%c0_156, %c0_157] {strides = array<i32: 2, 1>} : memref<85x40xf32, #tpu.memory_space<vmem>>, vector<42x40xf32>
    %c1_158 = arith.constant 1 : index
    %c0_159 = arith.constant 0 : index
    %156 = tpu.strided_load %arg22[%c1_158, %c0_159] {strides = array<i32: 2, 1>} : memref<85x40xf32, #tpu.memory_space<vmem>>, vector<42x40xf32>
    %157 = arith.maximumf %155, %156 : vector<42x40xf32>
    %c2_160 = arith.constant 2 : index
    %c0_161 = arith.constant 0 : index
    %158 = tpu.strided_load %arg22[%c2_160, %c0_161] {strides = array<i32: 2, 1>} : memref<85x40xf32, #tpu.memory_space<vmem>>, vector<42x40xf32>
    %159 = arith.maximumf %157, %158 : vector<42x40xf32>
    %c0_162 = arith.constant 0 : index
    %c0_163 = arith.constant 0 : index
    %160 = vector.load %arg26[%c0_162, %c0_163] : memref<42x40xf32, #tpu.memory_space<vmem>>, vector<42x40xf32>
    tpu.vector_store %arg26[%c0_162, %c0_163], %159 {strides = array<i32>} : memref<42x40xf32, #tpu.memory_space<vmem>>, vector<42x40xf32>,
    %c2_164 = arith.constant 2 : index
    %c0_165 = arith.constant 0 : index
    %c0_166 = arith.constant 0 : index
    %161 = vector.load %arg6[%c2_164, %c0_165, %c0_166] : memref<4x1x40xf32, #tpu.memory_space<vmem>>, vector<1x1x40xf32>
    %162 = vector.shape_cast %161 : vector<1x1x40xf32> to vector<1x40xf32>
    %cst_167 = arith.constant 0.000000e+00 : f32
    %163 = vector.broadcast %cst_167 : f32 to vector<19x40xf32>
    %c0_168 = arith.constant 0 : index
    %c0_169 = arith.constant 0 : index
    %164 = tpu.strided_load %arg26[%c0_168, %c0_169] {strides = array<i32: 2, 1>} : memref<42x40xf32, #tpu.memory_space<vmem>>, vector<19x40xf32>
    %c0_170 = arith.constant 0 : index
    %c0_171 = arith.constant 0 : index
    %c0_172 = arith.constant 0 : index
    %165 = vector.load %arg4[%c0_170, %c0_171, %c0_172] : memref<5x40x40xf32, #tpu.memory_space<vmem>>, vector<1x40x40xf32>
    %166 = vector.shape_cast %165 : vector<1x40x40xf32> to vector<40x40xf32>
    %cst_173 = arith.constant dense<0.000000e+00> : vector<19x40xf32>
    %167 = tpu.matmul %164, %166, %cst_173 {dimension_numbers = #tpu.dot_dimension_numbers<[1], [0], [0], [1], [0, 0, 1, 1], [], []>} : vector<19x40xf32>, vector<40x40xf32>, vector<19x40xf32> -> vector<19x40xf32>
    %168 = arith.addf %163, %167 : vector<19x40xf32>
    %c1_174 = arith.constant 1 : index
    %c0_175 = arith.constant 0 : index
    %169 = tpu.strided_load %arg26[%c1_174, %c0_175] {strides = array<i32: 2, 1>} : memref<42x40xf32, #tpu.memory_space<vmem>>, vector<19x40xf32>
    %c1_176 = arith.constant 1 : index
    %c0_177 = arith.constant 0 : index
    %c0_178 = arith.constant 0 : index
    %170 = vector.load %arg4[%c1_176, %c0_177, %c0_178] : memref<5x40x40xf32, #tpu.memory_space<vmem>>, vector<1x40x40xf32>
    %171 = vector.shape_cast %170 : vector<1x40x40xf32> to vector<40x40xf32>
    %cst_179 = arith.constant dense<0.000000e+00> : vector<19x40xf32>
    %172 = tpu.matmul %169, %171, %cst_179 {dimension_numbers = #tpu.dot_dimension_numbers<[1], [0], [0], [1], [0, 0, 1, 1], [], []>} : vector<19x40xf32>, vector<40x40xf32>, vector<19x40xf32> -> vector<19x40xf32>
    %173 = arith.addf %168, %172 : vector<19x40xf32>
    %c2_180 = arith.constant 2 : index
    %c0_181 = arith.constant 0 : index
    %174 = tpu.strided_load %arg26[%c2_180, %c0_181] {strides = array<i32: 2, 1>} : memref<42x40xf32, #tpu.memory_space<vmem>>, vector<19x40xf32>
    %c2_182 = arith.constant 2 : index
    %c0_183 = arith.constant 0 : index
    %c0_184 = arith.constant 0 : index
    %175 = vector.load %arg4[%c2_182, %c0_183, %c0_184] : memref<5x40x40xf32, #tpu.memory_space<vmem>>, vector<1x40x40xf32>
    %176 = vector.shape_cast %175 : vector<1x40x40xf32> to vector<40x40xf32>
    %cst_185 = arith.constant dense<0.000000e+00> : vector<19x40xf32>
    %177 = tpu.matmul %174, %176, %cst_185 {dimension_numbers = #tpu.dot_dimension_numbers<[1], [0], [0], [1], [0, 0, 1, 1], [], []>} : vector<19x40xf32>, vector<40x40xf32>, vector<19x40xf32> -> vector<19x40xf32>
    %178 = arith.addf %173, %177 : vector<19x40xf32>
    %c3_186 = arith.constant 3 : index
    %c0_187 = arith.constant 0 : index
    %179 = tpu.strided_load %arg26[%c3_186, %c0_187] {strides = array<i32: 2, 1>} : memref<42x40xf32, #tpu.memory_space<vmem>>, vector<19x40xf32>
    %c3_188 = arith.constant 3 : index
    %c0_189 = arith.constant 0 : index
    %c0_190 = arith.constant 0 : index
    %180 = vector.load %arg4[%c3_188, %c0_189, %c0_190] : memref<5x40x40xf32, #tpu.memory_space<vmem>>, vector<1x40x40xf32>
    %181 = vector.shape_cast %180 : vector<1x40x40xf32> to vector<40x40xf32>
    %cst_191 = arith.constant dense<0.000000e+00> : vector<19x40xf32>
    %182 = tpu.matmul %179, %181, %cst_191 {dimension_numbers = #tpu.dot_dimension_numbers<[1], [0], [0], [1], [0, 0, 1, 1], [], []>} : vector<19x40xf32>, vector<40x40xf32>, vector<19x40xf32> -> vector<19x40xf32>
    %183 = arith.addf %178, %182 : vector<19x40xf32>
    %c4_192 = arith.constant 4 : index
    %c0_193 = arith.constant 0 : index
    %184 = tpu.strided_load %arg26[%c4_192, %c0_193] {strides = array<i32: 2, 1>} : memref<42x40xf32, #tpu.memory_space<vmem>>, vector<19x40xf32>
    %c4_194 = arith.constant 4 : index
    %c0_195 = arith.constant 0 : index
    %c0_196 = arith.constant 0 : index
    %185 = vector.load %arg4[%c4_194, %c0_195, %c0_196] : memref<5x40x40xf32, #tpu.memory_space<vmem>>, vector<1x40x40xf32>
    %186 = vector.shape_cast %185 : vector<1x40x40xf32> to vector<40x40xf32>
    %cst_197 = arith.constant dense<0.000000e+00> : vector<19x40xf32>
    %187 = tpu.matmul %184, %186, %cst_197 {dimension_numbers = #tpu.dot_dimension_numbers<[1], [0], [0], [1], [0, 0, 1, 1], [], []>} : vector<19x40xf32>, vector<40x40xf32>, vector<19x40xf32> -> vector<19x40xf32>
    %188 = arith.addf %183, %187 : vector<19x40xf32>
    %189 = vector.broadcast %162 : vector<1x40xf32> to vector<19x40xf32>
    %190 = arith.addf %188, %189 : vector<19x40xf32>
    %cst_198 = arith.constant 0.000000e+00 : f32
    %191 = vector.broadcast %cst_198 : f32 to vector<19x40xf32>
    %192 = arith.maximumf %190, %191 : vector<19x40xf32>
    %c0_199 = arith.constant 0 : index
    %c0_200 = arith.constant 0 : index
    %193 = vector.load %arg23[%c0_199, %c0_200] : memref<19x40xf32, #tpu.memory_space<vmem>>, vector<19x40xf32>
    tpu.vector_store %arg23[%c0_199, %c0_200], %192 {strides = array<i32>} : memref<19x40xf32, #tpu.memory_space<vmem>>, vector<19x40xf32>,
    %c0_201 = arith.constant 0 : index
    %c0_202 = arith.constant 0 : index
    %194 = tpu.strided_load %arg23[%c0_201, %c0_202] {strides = array<i32: 2, 1>} : memref<19x40xf32, #tpu.memory_space<vmem>>, vector<9x40xf32>
    %c1_203 = arith.constant 1 : index
    %c0_204 = arith.constant 0 : index
    %195 = tpu.strided_load %arg23[%c1_203, %c0_204] {strides = array<i32: 2, 1>} : memref<19x40xf32, #tpu.memory_space<vmem>>, vector<9x40xf32>
    %196 = arith.maximumf %194, %195 : vector<9x40xf32>
    %c2_205 = arith.constant 2 : index
    %c0_206 = arith.constant 0 : index
    %197 = tpu.strided_load %arg23[%c2_205, %c0_206] {strides = array<i32: 2, 1>} : memref<19x40xf32, #tpu.memory_space<vmem>>, vector<9x40xf32>
    %198 = arith.maximumf %196, %197 : vector<9x40xf32>
    %c0_207 = arith.constant 0 : index
    %c0_208 = arith.constant 0 : index
    %199 = vector.load %arg27[%c0_207, %c0_208] : memref<9x40xf32, #tpu.memory_space<vmem>>, vector<9x40xf32>
    tpu.vector_store %arg27[%c0_207, %c0_208], %198 {strides = array<i32>} : memref<9x40xf32, #tpu.memory_space<vmem>>, vector<9x40xf32>,
    %c3_209 = arith.constant 3 : index
    %c0_210 = arith.constant 0 : index
    %c0_211 = arith.constant 0 : index
    %200 = vector.load %arg6[%c3_209, %c0_210, %c0_211] : memref<4x1x40xf32, #tpu.memory_space<vmem>>, vector<1x1x40xf32>
    %201 = vector.shape_cast %200 : vector<1x1x40xf32> to vector<1x40xf32>
    %cst_212 = arith.constant 0.000000e+00 : f32
    %202 = vector.broadcast %cst_212 : f32 to vector<3x40xf32>
    %c0_213 = arith.constant 0 : index
    %c0_214 = arith.constant 0 : index
    %203 = tpu.strided_load %arg27[%c0_213, %c0_214] {strides = array<i32: 2, 1>} : memref<9x40xf32, #tpu.memory_space<vmem>>, vector<3x40xf32>
    %c0_215 = arith.constant 0 : index
    %c0_216 = arith.constant 0 : index
    %c0_217 = arith.constant 0 : index
    %204 = vector.load %arg5[%c0_215, %c0_216, %c0_217] : memref<5x40x40xf32, #tpu.memory_space<vmem>>, vector<1x40x40xf32>
    %205 = vector.shape_cast %204 : vector<1x40x40xf32> to vector<40x40xf32>
    %cst_218 = arith.constant dense<0.000000e+00> : vector<3x40xf32>
    %206 = tpu.matmul %203, %205, %cst_218 {dimension_numbers = #tpu.dot_dimension_numbers<[1], [0], [0], [1], [0, 0, 1, 1], [], []>} : vector<3x40xf32>, vector<40x40xf32>, vector<3x40xf32> -> vector<3x40xf32>
    %207 = arith.addf %202, %206 : vector<3x40xf32>
    %c1_219 = arith.constant 1 : index
    %c0_220 = arith.constant 0 : index
    %208 = tpu.strided_load %arg27[%c1_219, %c0_220] {strides = array<i32: 2, 1>} : memref<9x40xf32, #tpu.memory_space<vmem>>, vector<3x40xf32>
    %c1_221 = arith.constant 1 : index
    %c0_222 = arith.constant 0 : index
    %c0_223 = arith.constant 0 : index
    %209 = vector.load %arg5[%c1_221, %c0_222, %c0_223] : memref<5x40x40xf32, #tpu.memory_space<vmem>>, vector<1x40x40xf32>
    %210 = vector.shape_cast %209 : vector<1x40x40xf32> to vector<40x40xf32>
    %cst_224 = arith.constant dense<0.000000e+00> : vector<3x40xf32>
    %211 = tpu.matmul %208, %210, %cst_224 {dimension_numbers = #tpu.dot_dimension_numbers<[1], [0], [0], [1], [0, 0, 1, 1], [], []>} : vector<3x40xf32>, vector<40x40xf32>, vector<3x40xf32> -> vector<3x40xf32>
    %212 = arith.addf %207, %211 : vector<3x40xf32>
    %c2_225 = arith.constant 2 : index
    %c0_226 = arith.constant 0 : index
    %213 = tpu.strided_load %arg27[%c2_225, %c0_226] {strides = array<i32: 2, 1>} : memref<9x40xf32, #tpu.memory_space<vmem>>, vector<3x40xf32>
    %c2_227 = arith.constant 2 : index
    %c0_228 = arith.constant 0 : index
    %c0_229 = arith.constant 0 : index
    %214 = vector.load %arg5[%c2_227, %c0_228, %c0_229] : memref<5x40x40xf32, #tpu.memory_space<vmem>>, vector<1x40x40xf32>
    %215 = vector.shape_cast %214 : vector<1x40x40xf32> to vector<40x40xf32>
    %cst_230 = arith.constant dense<0.000000e+00> : vector<3x40xf32>
    %216 = tpu.matmul %213, %215, %cst_230 {dimension_numbers = #tpu.dot_dimension_numbers<[1], [0], [0], [1], [0, 0, 1, 1], [], []>} : vector<3x40xf32>, vector<40x40xf32>, vector<3x40xf32> -> vector<3x40xf32>
    %217 = arith.addf %212, %216 : vector<3x40xf32>
    %c3_231 = arith.constant 3 : index
    %c0_232 = arith.constant 0 : index
    %218 = tpu.strided_load %arg27[%c3_231, %c0_232] {strides = array<i32: 2, 1>} : memref<9x40xf32, #tpu.memory_space<vmem>>, vector<3x40xf32>
    %c3_233 = arith.constant 3 : index
    %c0_234 = arith.constant 0 : index
    %c0_235 = arith.constant 0 : index
    %219 = vector.load %arg5[%c3_233, %c0_234, %c0_235] : memref<5x40x40xf32, #tpu.memory_space<vmem>>, vector<1x40x40xf32>
    %220 = vector.shape_cast %219 : vector<1x40x40xf32> to vector<40x40xf32>
    %cst_236 = arith.constant dense<0.000000e+00> : vector<3x40xf32>
    %221 = tpu.matmul %218, %220, %cst_236 {dimension_numbers = #tpu.dot_dimension_numbers<[1], [0], [0], [1], [0, 0, 1, 1], [], []>} : vector<3x40xf32>, vector<40x40xf32>, vector<3x40xf32> -> vector<3x40xf32>
    %222 = arith.addf %217, %221 : vector<3x40xf32>
    %c4_237 = arith.constant 4 : index
    %c0_238 = arith.constant 0 : index
    %223 = tpu.strided_load %arg27[%c4_237, %c0_238] {strides = array<i32: 2, 1>} : memref<9x40xf32, #tpu.memory_space<vmem>>, vector<3x40xf32>
    %c4_239 = arith.constant 4 : index
    %c0_240 = arith.constant 0 : index
    %c0_241 = arith.constant 0 : index
    %224 = vector.load %arg5[%c4_239, %c0_240, %c0_241] : memref<5x40x40xf32, #tpu.memory_space<vmem>>, vector<1x40x40xf32>
    %225 = vector.shape_cast %224 : vector<1x40x40xf32> to vector<40x40xf32>
    %cst_242 = arith.constant dense<0.000000e+00> : vector<3x40xf32>
    %226 = tpu.matmul %223, %225, %cst_242 {dimension_numbers = #tpu.dot_dimension_numbers<[1], [0], [0], [1], [0, 0, 1, 1], [], []>} : vector<3x40xf32>, vector<40x40xf32>, vector<3x40xf32> -> vector<3x40xf32>
    %227 = arith.addf %222, %226 : vector<3x40xf32>
    %228 = vector.broadcast %201 : vector<1x40xf32> to vector<3x40xf32>
    %229 = arith.addf %227, %228 : vector<3x40xf32>
    %cst_243 = arith.constant 0.000000e+00 : f32
    %230 = vector.broadcast %cst_243 : f32 to vector<3x40xf32>
    %231 = arith.maximumf %229, %230 : vector<3x40xf32>
    %c0_244 = arith.constant 0 : index
    %c0_245 = arith.constant 0 : index
    %232 = vector.load %arg24[%c0_244, %c0_245] : memref<3x40xf32, #tpu.memory_space<vmem>>, vector<3x40xf32>
    tpu.vector_store %arg24[%c0_244, %c0_245], %231 {strides = array<i32>} : memref<3x40xf32, #tpu.memory_space<vmem>>, vector<3x40xf32>,
    %c0_246 = arith.constant 0 : index
    %c0_247 = arith.constant 0 : index
    %233 = tpu.strided_load %arg24[%c0_246, %c0_247] {strides = array<i32: 2, 1>} : memref<3x40xf32, #tpu.memory_space<vmem>>, vector<1x40xf32>
    %c1_248 = arith.constant 1 : index
    %c0_249 = arith.constant 0 : index
    %234 = tpu.strided_load %arg24[%c1_248, %c0_249] {strides = array<i32: 2, 1>} : memref<3x40xf32, #tpu.memory_space<vmem>>, vector<1x40xf32>
    %235 = arith.maximumf %233, %234 : vector<1x40xf32>
    %c2_250 = arith.constant 2 : index
    %c0_251 = arith.constant 0 : index
    %236 = tpu.strided_load %arg24[%c2_250, %c0_251] {strides = array<i32: 2, 1>} : memref<3x40xf32, #tpu.memory_space<vmem>>, vector<1x40xf32>
    %237 = arith.maximumf %235, %236 : vector<1x40xf32>
    %c0_252 = arith.constant 0 : index
    %c0_253 = arith.constant 0 : index
    %238 = vector.load %arg28[%c0_252, %c0_253] : memref<1x40xf32, #tpu.memory_space<vmem>>, vector<1x40xf32>
    tpu.vector_store %arg28[%c0_252, %c0_253], %237 {strides = array<i32>} : memref<1x40xf32, #tpu.memory_space<vmem>>, vector<1x40xf32>,
    %c0_254 = arith.constant 0 : index
    %c0_255 = arith.constant 0 : index
    %239 = vector.load %arg8[%c0_254, %c0_255] : memref<1x256xf32, #tpu.memory_space<vmem>>, vector<1x256xf32>
    %c0_256 = arith.constant 0 : index
    %c0_257 = arith.constant 0 : index
    %240 = vector.load %arg28[%c0_256, %c0_257] : memref<1x40xf32, #tpu.memory_space<vmem>>, vector<1x40xf32>
    %c0_258 = arith.constant 0 : index
    %c0_259 = arith.constant 0 : index
    %c0_260 = arith.constant 0 : index
    %241 = vector.load %arg7[%c0_258, %c0_259, %c0_260] : memref<1x40x256xf32, #tpu.memory_space<vmem>>, vector<1x40x256xf32>
    %242 = vector.shape_cast %241 : vector<1x40x256xf32> to vector<40x256xf32>
    %cst_261 = arith.constant dense<0.000000e+00> : vector<1x256xf32>
    %243 = tpu.matmul %240, %242, %cst_261 {dimension_numbers = #tpu.dot_dimension_numbers<[1], [0], [0], [1], [0, 0, 1, 1], [], []>} : vector<1x40xf32>, vector<40x256xf32>, vector<1x256xf32> -> vector<1x256xf32>
    %244 = arith.addf %239, %243 : vector<1x256xf32>
    %cst_262 = arith.constant 0.000000e+00 : f32
    %245 = vector.broadcast %cst_262 : f32 to vector<1x256xf32>
    %246 = arith.maximumf %244, %245 : vector<1x256xf32>
    %c0_263 = arith.constant 0 : index
    %c0_264 = arith.constant 0 : index
    %247 = vector.load %arg29[%c0_263, %c0_264] : memref<1x256xf32, #tpu.memory_space<vmem>>, vector<1x256xf32>
    tpu.vector_store %arg29[%c0_263, %c0_264], %246 {strides = array<i32>} : memref<1x256xf32, #tpu.memory_space<vmem>>, vector<1x256xf32>,
    %c0_265 = arith.constant 0 : index
    %c0_266 = arith.constant 0 : index
    %248 = vector.load %arg29[%c0_265, %c0_266] : memref<1x256xf32, #tpu.memory_space<vmem>>, vector<1x32xf32>
    %c0_267 = arith.constant 0 : index
    %c0_268 = arith.constant 0 : index
    %249 = vector.load %arg30[%c0_267, %c0_268] : memref<8x32xf32, #tpu.memory_space<vmem>>, vector<1x32xf32>
    tpu.vector_store %arg30[%c0_267, %c0_268], %248 {strides = array<i32>} : memref<8x32xf32, #tpu.memory_space<vmem>>, vector<1x32xf32>,
    %c0_269 = arith.constant 0 : index
    %c32 = arith.constant 32 : index
    %250 = vector.load %arg29[%c0_269, %c32] : memref<1x256xf32, #tpu.memory_space<vmem>>, vector<1x32xf32>
    %c1_270 = arith.constant 1 : index
    %c0_271 = arith.constant 0 : index
    %251 = vector.load %arg30[%c1_270, %c0_271] : memref<8x32xf32, #tpu.memory_space<vmem>>, vector<1x32xf32>
    tpu.vector_store %arg30[%c1_270, %c0_271], %250 {strides = array<i32>} : memref<8x32xf32, #tpu.memory_space<vmem>>, vector<1x32xf32>,
    %c0_272 = arith.constant 0 : index
    %c64 = arith.constant 64 : index
    %252 = vector.load %arg29[%c0_272, %c64] : memref<1x256xf32, #tpu.memory_space<vmem>>, vector<1x32xf32>
    %c2_273 = arith.constant 2 : index
    %c0_274 = arith.constant 0 : index
    %253 = vector.load %arg30[%c2_273, %c0_274] : memref<8x32xf32, #tpu.memory_space<vmem>>, vector<1x32xf32>
    tpu.vector_store %arg30[%c2_273, %c0_274], %252 {strides = array<i32>} : memref<8x32xf32, #tpu.memory_space<vmem>>, vector<1x32xf32>,
    %c0_275 = arith.constant 0 : index
    %c96 = arith.constant 96 : index
    %254 = vector.load %arg29[%c0_275, %c96] : memref<1x256xf32, #tpu.memory_space<vmem>>, vector<1x32xf32>
    %c3_276 = arith.constant 3 : index
    %c0_277 = arith.constant 0 : index
    %255 = vector.load %arg30[%c3_276, %c0_277] : memref<8x32xf32, #tpu.memory_space<vmem>>, vector<1x32xf32>
    tpu.vector_store %arg30[%c3_276, %c0_277], %254 {strides = array<i32>} : memref<8x32xf32, #tpu.memory_space<vmem>>, vector<1x32xf32>,
    %c0_278 = arith.constant 0 : index
    %c128_279 = arith.constant 128 : index
    %256 = vector.load %arg29[%c0_278, %c128_279] : memref<1x256xf32, #tpu.memory_space<vmem>>, vector<1x32xf32>
    %c4_280 = arith.constant 4 : index
    %c0_281 = arith.constant 0 : index
    %257 = vector.load %arg30[%c4_280, %c0_281] : memref<8x32xf32, #tpu.memory_space<vmem>>, vector<1x32xf32>
    tpu.vector_store %arg30[%c4_280, %c0_281], %256 {strides = array<i32>} : memref<8x32xf32, #tpu.memory_space<vmem>>, vector<1x32xf32>,
    %c0_282 = arith.constant 0 : index
    %c160 = arith.constant 160 : index
    %258 = vector.load %arg29[%c0_282, %c160] : memref<1x256xf32, #tpu.memory_space<vmem>>, vector<1x32xf32>
    %c5 = arith.constant 5 : index
    %c0_283 = arith.constant 0 : index
    %259 = vector.load %arg30[%c5, %c0_283] : memref<8x32xf32, #tpu.memory_space<vmem>>, vector<1x32xf32>
    tpu.vector_store %arg30[%c5, %c0_283], %258 {strides = array<i32>} : memref<8x32xf32, #tpu.memory_space<vmem>>, vector<1x32xf32>,
    %c0_284 = arith.constant 0 : index
    %c192 = arith.constant 192 : index
    %260 = vector.load %arg29[%c0_284, %c192] : memref<1x256xf32, #tpu.memory_space<vmem>>, vector<1x32xf32>
    %c6 = arith.constant 6 : index
    %c0_285 = arith.constant 0 : index
    %261 = vector.load %arg30[%c6, %c0_285] : memref<8x32xf32, #tpu.memory_space<vmem>>, vector<1x32xf32>
    tpu.vector_store %arg30[%c6, %c0_285], %260 {strides = array<i32>} : memref<8x32xf32, #tpu.memory_space<vmem>>, vector<1x32xf32>,
    %c0_286 = arith.constant 0 : index
    %c224 = arith.constant 224 : index
    %262 = vector.load %arg29[%c0_286, %c224] : memref<1x256xf32, #tpu.memory_space<vmem>>, vector<1x32xf32>
    %c7 = arith.constant 7 : index
    %c0_287 = arith.constant 0 : index
    %263 = vector.load %arg30[%c7, %c0_287] : memref<8x32xf32, #tpu.memory_space<vmem>>, vector<1x32xf32>
    tpu.vector_store %arg30[%c7, %c0_287], %262 {strides = array<i32>} : memref<8x32xf32, #tpu.memory_space<vmem>>, vector<1x32xf32>,
    %c0_288 = arith.constant 0 : index
    %c0_289 = arith.constant 0 : index
    %264 = vector.load %arg30[%c0_288, %c0_289] : memref<8x32xf32, #tpu.memory_space<vmem>>, vector<8x32xf32>
    %c0_290 = arith.constant 0 : index
    %c0_291 = arith.constant 0 : index
    %c0_292 = arith.constant 0 : index
    %265 = vector.load %arg9[%c0_290, %c0_291, %c0_292] : memref<6x32x32xf32, #tpu.memory_space<vmem>>, vector<1x32x32xf32>
    %266 = vector.shape_cast %265 : vector<1x32x32xf32> to vector<32x32xf32>
    %cst_293 = arith.constant dense<0.000000e+00> : vector<8x32xf32>
    %267 = tpu.matmul %264, %266, %cst_293 {dimension_numbers = #tpu.dot_dimension_numbers<[1], [0], [0], [1], [0, 0, 1, 1], [], []>} : vector<8x32xf32>, vector<32x32xf32>, vector<8x32xf32> -> vector<8x32xf32>
    %c0_294 = arith.constant 0 : index
    %c0_295 = arith.constant 0 : index
    %c0_296 = arith.constant 0 : index
    %268 = vector.load %arg10[%c0_294, %c0_295, %c0_296] : memref<6x1x32xf32, #tpu.memory_space<vmem>>, vector<1x1x32xf32>
    %269 = vector.shape_cast %268 : vector<1x1x32xf32> to vector<1x32xf32>
    %270 = vector.broadcast %269 : vector<1x32xf32> to vector<8x32xf32>
    %271 = arith.addf %267, %270 : vector<8x32xf32>
    %cst_297 = arith.constant 0.000000e+00 : f32
    %272 = vector.broadcast %cst_297 : f32 to vector<8x32xf32>
    %273 = arith.maximumf %271, %272 : vector<8x32xf32>
    %c1_298 = arith.constant 1 : index
    %c0_299 = arith.constant 0 : index
    %c0_300 = arith.constant 0 : index
    %274 = vector.load %arg9[%c1_298, %c0_299, %c0_300] : memref<6x32x32xf32, #tpu.memory_space<vmem>>, vector<1x32x32xf32>
    %275 = vector.shape_cast %274 : vector<1x32x32xf32> to vector<32x32xf32>
    %cst_301 = arith.constant dense<0.000000e+00> : vector<8x32xf32>
    %276 = tpu.matmul %273, %275, %cst_301 {dimension_numbers = #tpu.dot_dimension_numbers<[1], [0], [0], [1], [0, 0, 1, 1], [], []>} : vector<8x32xf32>, vector<32x32xf32>, vector<8x32xf32> -> vector<8x32xf32>
    %c1_302 = arith.constant 1 : index
    %c0_303 = arith.constant 0 : index
    %c0_304 = arith.constant 0 : index
    %277 = vector.load %arg10[%c1_302, %c0_303, %c0_304] : memref<6x1x32xf32, #tpu.memory_space<vmem>>, vector<1x1x32xf32>
    %278 = vector.shape_cast %277 : vector<1x1x32xf32> to vector<1x32xf32>
    %279 = vector.broadcast %278 : vector<1x32xf32> to vector<8x32xf32>
    %280 = arith.addf %276, %279 : vector<8x32xf32>
    %cst_305 = arith.constant 0.000000e+00 : f32
    %281 = vector.broadcast %cst_305 : f32 to vector<8x32xf32>
    %282 = arith.maximumf %280, %281 : vector<8x32xf32>
    %c2_306 = arith.constant 2 : index
    %c0_307 = arith.constant 0 : index
    %c0_308 = arith.constant 0 : index
    %283 = vector.load %arg9[%c2_306, %c0_307, %c0_308] : memref<6x32x32xf32, #tpu.memory_space<vmem>>, vector<1x32x32xf32>
    %284 = vector.shape_cast %283 : vector<1x32x32xf32> to vector<32x32xf32>
    %cst_309 = arith.constant dense<0.000000e+00> : vector<8x32xf32>
    %285 = tpu.matmul %282, %284, %cst_309 {dimension_numbers = #tpu.dot_dimension_numbers<[1], [0], [0], [1], [0, 0, 1, 1], [], []>} : vector<8x32xf32>, vector<32x32xf32>, vector<8x32xf32> -> vector<8x32xf32>
    %c2_310 = arith.constant 2 : index
    %c0_311 = arith.constant 0 : index
    %c0_312 = arith.constant 0 : index
    %286 = vector.load %arg10[%c2_310, %c0_311, %c0_312] : memref<6x1x32xf32, #tpu.memory_space<vmem>>, vector<1x1x32xf32>
    %287 = vector.shape_cast %286 : vector<1x1x32xf32> to vector<1x32xf32>
    %288 = vector.broadcast %287 : vector<1x32xf32> to vector<8x32xf32>
    %289 = arith.addf %285, %288 : vector<8x32xf32>
    %cst_313 = arith.constant 0.000000e+00 : f32
    %290 = vector.broadcast %cst_313 : f32 to vector<8x32xf32>
    %291 = arith.maximumf %289, %290 : vector<8x32xf32>
    %c3_314 = arith.constant 3 : index
    %c0_315 = arith.constant 0 : index
    %c0_316 = arith.constant 0 : index
    %292 = vector.load %arg9[%c3_314, %c0_315, %c0_316] : memref<6x32x32xf32, #tpu.memory_space<vmem>>, vector<1x32x32xf32>
    %293 = vector.shape_cast %292 : vector<1x32x32xf32> to vector<32x32xf32>
    %cst_317 = arith.constant dense<0.000000e+00> : vector<8x32xf32>
    %294 = tpu.matmul %291, %293, %cst_317 {dimension_numbers = #tpu.dot_dimension_numbers<[1], [0], [0], [1], [0, 0, 1, 1], [], []>} : vector<8x32xf32>, vector<32x32xf32>, vector<8x32xf32> -> vector<8x32xf32>
    %c3_318 = arith.constant 3 : index
    %c0_319 = arith.constant 0 : index
    %c0_320 = arith.constant 0 : index
    %295 = vector.load %arg10[%c3_318, %c0_319, %c0_320] : memref<6x1x32xf32, #tpu.memory_space<vmem>>, vector<1x1x32xf32>
    %296 = vector.shape_cast %295 : vector<1x1x32xf32> to vector<1x32xf32>
    %297 = vector.broadcast %296 : vector<1x32xf32> to vector<8x32xf32>
    %298 = arith.addf %294, %297 : vector<8x32xf32>
    %cst_321 = arith.constant 0.000000e+00 : f32
    %299 = vector.broadcast %cst_321 : f32 to vector<8x32xf32>
    %300 = arith.maximumf %298, %299 : vector<8x32xf32>
    %c4_322 = arith.constant 4 : index
    %c0_323 = arith.constant 0 : index
    %c0_324 = arith.constant 0 : index
    %301 = vector.load %arg9[%c4_322, %c0_323, %c0_324] : memref<6x32x32xf32, #tpu.memory_space<vmem>>, vector<1x32x32xf32>
    %302 = vector.shape_cast %301 : vector<1x32x32xf32> to vector<32x32xf32>
    %cst_325 = arith.constant dense<0.000000e+00> : vector<8x32xf32>
    %303 = tpu.matmul %300, %302, %cst_325 {dimension_numbers = #tpu.dot_dimension_numbers<[1], [0], [0], [1], [0, 0, 1, 1], [], []>} : vector<8x32xf32>, vector<32x32xf32>, vector<8x32xf32> -> vector<8x32xf32>
    %c4_326 = arith.constant 4 : index
    %c0_327 = arith.constant 0 : index
    %c0_328 = arith.constant 0 : index
    %304 = vector.load %arg10[%c4_326, %c0_327, %c0_328] : memref<6x1x32xf32, #tpu.memory_space<vmem>>, vector<1x1x32xf32>
    %305 = vector.shape_cast %304 : vector<1x1x32xf32> to vector<1x32xf32>
    %306 = vector.broadcast %305 : vector<1x32xf32> to vector<8x32xf32>
    %307 = arith.addf %303, %306 : vector<8x32xf32>
    %cst_329 = arith.constant 0.000000e+00 : f32
    %308 = vector.broadcast %cst_329 : f32 to vector<8x32xf32>
    %309 = arith.maximumf %307, %308 : vector<8x32xf32>
    %c5_330 = arith.constant 5 : index
    %c0_331 = arith.constant 0 : index
    %c0_332 = arith.constant 0 : index
    %310 = vector.load %arg9[%c5_330, %c0_331, %c0_332] : memref<6x32x32xf32, #tpu.memory_space<vmem>>, vector<1x32x32xf32>
    %311 = vector.shape_cast %310 : vector<1x32x32xf32> to vector<32x32xf32>
    %cst_333 = arith.constant dense<0.000000e+00> : vector<8x32xf32>
    %312 = tpu.matmul %309, %311, %cst_333 {dimension_numbers = #tpu.dot_dimension_numbers<[1], [0], [0], [1], [0, 0, 1, 1], [], []>} : vector<8x32xf32>, vector<32x32xf32>, vector<8x32xf32> -> vector<8x32xf32>
    %c5_334 = arith.constant 5 : index
    %c0_335 = arith.constant 0 : index
    %c0_336 = arith.constant 0 : index
    %313 = vector.load %arg10[%c5_334, %c0_335, %c0_336] : memref<6x1x32xf32, #tpu.memory_space<vmem>>, vector<1x1x32xf32>
    %314 = vector.shape_cast %313 : vector<1x1x32xf32> to vector<1x32xf32>
    %315 = vector.broadcast %314 : vector<1x32xf32> to vector<8x32xf32>
    %316 = arith.addf %312, %315 : vector<8x32xf32>
    %cst_337 = arith.constant 0.000000e+00 : f32
    %317 = vector.broadcast %cst_337 : f32 to vector<8x32xf32>
    %318 = arith.maximumf %316, %317 : vector<8x32xf32>
    %c0_338 = arith.constant 0 : index
    %c0_339 = arith.constant 0 : index
    %319 = vector.load %arg11[%c0_338, %c0_339] : memref<32x16xf32, #tpu.memory_space<vmem>>, vector<32x16xf32>
    %cst_340 = arith.constant dense<0.000000e+00> : vector<8x16xf32>
    %320 = tpu.matmul %318, %319, %cst_340 {dimension_numbers = #tpu.dot_dimension_numbers<[1], [0], [0], [1], [0, 0, 1, 1], [], []>} : vector<8x32xf32>, vector<32x16xf32>, vector<8x16xf32> -> vector<8x16xf32>
    %c0_341 = arith.constant 0 : index
    %c0_342 = arith.constant 0 : index
    %321 = vector.load %arg12[%c0_341, %c0_342] : memref<1x16xf32, #tpu.memory_space<vmem>>, vector<1x16xf32>
    %322 = vector.broadcast %321 : vector<1x16xf32> to vector<8x16xf32>
    %323 = arith.addf %320, %322 : vector<8x16xf32>
    %c0_343 = arith.constant 0 : index
    %c0_344 = arith.constant 0 : index
    %324 = vector.load %arg31[%c0_343, %c0_344] : memref<8x16xf32, #tpu.memory_space<vmem>>, vector<8x16xf32>
    tpu.vector_store %arg31[%c0_343, %c0_344], %323 {strides = array<i32>} : memref<8x16xf32, #tpu.memory_space<vmem>>, vector<8x16xf32>,
    %c0_345 = arith.constant 0 : index
    %c0_346 = arith.constant 0 : index
    %325 = vector.load %arg31[%c0_345, %c0_346] : memref<8x16xf32, #tpu.memory_space<vmem>>, vector<4x16xf32>
    %c4_347 = arith.constant 4 : index
    %c0_348 = arith.constant 0 : index
    %326 = vector.load %arg31[%c4_347, %c0_348] : memref<8x16xf32, #tpu.memory_space<vmem>>, vector<4x16xf32>
    %c0_349 = arith.constant 0 : index
    %c0_350 = arith.constant 0 : index
    %327 = vector.load %arg13[%c0_349, %c0_350] : memref<16x32xf32, #tpu.memory_space<vmem>>, vector<16x32xf32>
    %cst_351 = arith.constant dense<0.000000e+00> : vector<4x32xf32>
    %328 = tpu.matmul %325, %327, %cst_351 {dimension_numbers = #tpu.dot_dimension_numbers<[1], [0], [0], [1], [0, 0, 1, 1], [], []>} : vector<4x16xf32>, vector<16x32xf32>, vector<4x32xf32> -> vector<4x32xf32>
    %c0_352 = arith.constant 0 : index
    %c0_353 = arith.constant 0 : index
    %329 = vector.load %arg14[%c0_352, %c0_353] : memref<16x32xf32, #tpu.memory_space<vmem>>, vector<16x32xf32>
    %cst_354 = arith.constant dense<0.000000e+00> : vector<4x32xf32>
    %330 = tpu.matmul %326, %329, %cst_354 {dimension_numbers = #tpu.dot_dimension_numbers<[1], [0], [0], [1], [0, 0, 1, 1], [], []>} : vector<4x16xf32>, vector<16x32xf32>, vector<4x32xf32> -> vector<4x32xf32>
    %331 = arith.addf %328, %330 : vector<4x32xf32>
    %c0_355 = arith.constant 0 : index
    %c0_356 = arith.constant 0 : index
    %332 = vector.load %arg15[%c0_355, %c0_356] : memref<1x32xf32, #tpu.memory_space<vmem>>, vector<1x32xf32>
    %333 = vector.broadcast %332 : vector<1x32xf32> to vector<4x32xf32>
    %334 = arith.addf %331, %333 : vector<4x32xf32>
    %cst_357 = arith.constant 0.000000e+00 : f32
    %335 = vector.broadcast %cst_357 : f32 to vector<4x32xf32>
    %336 = arith.maximumf %334, %335 : vector<4x32xf32>
    %c0_358 = arith.constant 0 : index
    %c0_359 = arith.constant 0 : index
    %c0_360 = arith.constant 0 : index
    %337 = vector.load %arg16[%c0_358, %c0_359, %c0_360] : memref<6x32x32xf32, #tpu.memory_space<vmem>>, vector<1x32x32xf32>
    %338 = vector.shape_cast %337 : vector<1x32x32xf32> to vector<32x32xf32>
    %cst_361 = arith.constant dense<0.000000e+00> : vector<4x32xf32>
    %339 = tpu.matmul %336, %338, %cst_361 {dimension_numbers = #tpu.dot_dimension_numbers<[1], [0], [0], [1], [0, 0, 1, 1], [], []>} : vector<4x32xf32>, vector<32x32xf32>, vector<4x32xf32> -> vector<4x32xf32>
    %c0_362 = arith.constant 0 : index
    %c0_363 = arith.constant 0 : index
    %c0_364 = arith.constant 0 : index
    %340 = vector.load %arg17[%c0_362, %c0_363, %c0_364] : memref<6x1x32xf32, #tpu.memory_space<vmem>>, vector<1x1x32xf32>
    %341 = vector.shape_cast %340 : vector<1x1x32xf32> to vector<1x32xf32>
    %342 = vector.broadcast %341 : vector<1x32xf32> to vector<4x32xf32>
    %343 = arith.addf %339, %342 : vector<4x32xf32>
    %cst_365 = arith.constant 0.000000e+00 : f32
    %344 = vector.broadcast %cst_365 : f32 to vector<4x32xf32>
    %345 = arith.maximumf %343, %344 : vector<4x32xf32>
    %c1_366 = arith.constant 1 : index
    %c0_367 = arith.constant 0 : index
    %c0_368 = arith.constant 0 : index
    %346 = vector.load %arg16[%c1_366, %c0_367, %c0_368] : memref<6x32x32xf32, #tpu.memory_space<vmem>>, vector<1x32x32xf32>
    %347 = vector.shape_cast %346 : vector<1x32x32xf32> to vector<32x32xf32>
    %cst_369 = arith.constant dense<0.000000e+00> : vector<4x32xf32>
    %348 = tpu.matmul %345, %347, %cst_369 {dimension_numbers = #tpu.dot_dimension_numbers<[1], [0], [0], [1], [0, 0, 1, 1], [], []>} : vector<4x32xf32>, vector<32x32xf32>, vector<4x32xf32> -> vector<4x32xf32>
    %c1_370 = arith.constant 1 : index
    %c0_371 = arith.constant 0 : index
    %c0_372 = arith.constant 0 : index
    %349 = vector.load %arg17[%c1_370, %c0_371, %c0_372] : memref<6x1x32xf32, #tpu.memory_space<vmem>>, vector<1x1x32xf32>
    %350 = vector.shape_cast %349 : vector<1x1x32xf32> to vector<1x32xf32>
    %351 = vector.broadcast %350 : vector<1x32xf32> to vector<4x32xf32>
    %352 = arith.addf %348, %351 : vector<4x32xf32>
    %cst_373 = arith.constant 0.000000e+00 : f32
    %353 = vector.broadcast %cst_373 : f32 to vector<4x32xf32>
    %354 = arith.maximumf %352, %353 : vector<4x32xf32>
    %c2_374 = arith.constant 2 : index
    %c0_375 = arith.constant 0 : index
    %c0_376 = arith.constant 0 : index
    %355 = vector.load %arg16[%c2_374, %c0_375, %c0_376] : memref<6x32x32xf32, #tpu.memory_space<vmem>>, vector<1x32x32xf32>
    %356 = vector.shape_cast %355 : vector<1x32x32xf32> to vector<32x32xf32>
    %cst_377 = arith.constant dense<0.000000e+00> : vector<4x32xf32>
    %357 = tpu.matmul %354, %356, %cst_377 {dimension_numbers = #tpu.dot_dimension_numbers<[1], [0], [0], [1], [0, 0, 1, 1], [], []>} : vector<4x32xf32>, vector<32x32xf32>, vector<4x32xf32> -> vector<4x32xf32>
    %c2_378 = arith.constant 2 : index
    %c0_379 = arith.constant 0 : index
    %c0_380 = arith.constant 0 : index
    %358 = vector.load %arg17[%c2_378, %c0_379, %c0_380] : memref<6x1x32xf32, #tpu.memory_space<vmem>>, vector<1x1x32xf32>
    %359 = vector.shape_cast %358 : vector<1x1x32xf32> to vector<1x32xf32>
    %360 = vector.broadcast %359 : vector<1x32xf32> to vector<4x32xf32>
    %361 = arith.addf %357, %360 : vector<4x32xf32>
    %cst_381 = arith.constant 0.000000e+00 : f32
    %362 = vector.broadcast %cst_381 : f32 to vector<4x32xf32>
    %363 = arith.maximumf %361, %362 : vector<4x32xf32>
    %c3_382 = arith.constant 3 : index
    %c0_383 = arith.constant 0 : index
    %c0_384 = arith.constant 0 : index
    %364 = vector.load %arg16[%c3_382, %c0_383, %c0_384] : memref<6x32x32xf32, #tpu.memory_space<vmem>>, vector<1x32x32xf32>
    %365 = vector.shape_cast %364 : vector<1x32x32xf32> to vector<32x32xf32>
    %cst_385 = arith.constant dense<0.000000e+00> : vector<4x32xf32>
    %366 = tpu.matmul %363, %365, %cst_385 {dimension_numbers = #tpu.dot_dimension_numbers<[1], [0], [0], [1], [0, 0, 1, 1], [], []>} : vector<4x32xf32>, vector<32x32xf32>, vector<4x32xf32> -> vector<4x32xf32>
    %c3_386 = arith.constant 3 : index
    %c0_387 = arith.constant 0 : index
    %c0_388 = arith.constant 0 : index
    %367 = vector.load %arg17[%c3_386, %c0_387, %c0_388] : memref<6x1x32xf32, #tpu.memory_space<vmem>>, vector<1x1x32xf32>
    %368 = vector.shape_cast %367 : vector<1x1x32xf32> to vector<1x32xf32>
    %369 = vector.broadcast %368 : vector<1x32xf32> to vector<4x32xf32>
    %370 = arith.addf %366, %369 : vector<4x32xf32>
    %cst_389 = arith.constant 0.000000e+00 : f32
    %371 = vector.broadcast %cst_389 : f32 to vector<4x32xf32>
    %372 = arith.maximumf %370, %371 : vector<4x32xf32>
    %c4_390 = arith.constant 4 : index
    %c0_391 = arith.constant 0 : index
    %c0_392 = arith.constant 0 : index
    %373 = vector.load %arg16[%c4_390, %c0_391, %c0_392] : memref<6x32x32xf32, #tpu.memory_space<vmem>>, vector<1x32x32xf32>
    %374 = vector.shape_cast %373 : vector<1x32x32xf32> to vector<32x32xf32>
    %cst_393 = arith.constant dense<0.000000e+00> : vector<4x32xf32>
    %375 = tpu.matmul %372, %374, %cst_393 {dimension_numbers = #tpu.dot_dimension_numbers<[1], [0], [0], [1], [0, 0, 1, 1], [], []>} : vector<4x32xf32>, vector<32x32xf32>, vector<4x32xf32> -> vector<4x32xf32>
    %c4_394 = arith.constant 4 : index
    %c0_395 = arith.constant 0 : index
    %c0_396 = arith.constant 0 : index
    %376 = vector.load %arg17[%c4_394, %c0_395, %c0_396] : memref<6x1x32xf32, #tpu.memory_space<vmem>>, vector<1x1x32xf32>
    %377 = vector.shape_cast %376 : vector<1x1x32xf32> to vector<1x32xf32>
    %378 = vector.broadcast %377 : vector<1x32xf32> to vector<4x32xf32>
    %379 = arith.addf %375, %378 : vector<4x32xf32>
    %cst_397 = arith.constant 0.000000e+00 : f32
    %380 = vector.broadcast %cst_397 : f32 to vector<4x32xf32>
    %381 = arith.maximumf %379, %380 : vector<4x32xf32>
    %c5_398 = arith.constant 5 : index
    %c0_399 = arith.constant 0 : index
    %c0_400 = arith.constant 0 : index
    %382 = vector.load %arg16[%c5_398, %c0_399, %c0_400] : memref<6x32x32xf32, #tpu.memory_space<vmem>>, vector<1x32x32xf32>
    %383 = vector.shape_cast %382 : vector<1x32x32xf32> to vector<32x32xf32>
    %cst_401 = arith.constant dense<0.000000e+00> : vector<4x32xf32>
    %384 = tpu.matmul %381, %383, %cst_401 {dimension_numbers = #tpu.dot_dimension_numbers<[1], [0], [0], [1], [0, 0, 1, 1], [], []>} : vector<4x32xf32>, vector<32x32xf32>, vector<4x32xf32> -> vector<4x32xf32>
    %c5_402 = arith.constant 5 : index
    %c0_403 = arith.constant 0 : index
    %c0_404 = arith.constant 0 : index
    %385 = vector.load %arg17[%c5_402, %c0_403, %c0_404] : memref<6x1x32xf32, #tpu.memory_space<vmem>>, vector<1x1x32xf32>
    %386 = vector.shape_cast %385 : vector<1x1x32xf32> to vector<1x32xf32>
    %387 = vector.broadcast %386 : vector<1x32xf32> to vector<4x32xf32>
    %388 = arith.addf %384, %387 : vector<4x32xf32>
    %cst_405 = arith.constant 0.000000e+00 : f32
    %389 = vector.broadcast %cst_405 : f32 to vector<4x32xf32>
    %390 = arith.maximumf %388, %389 : vector<4x32xf32>
    %c0_406 = arith.constant 0 : index
    %c0_407 = arith.constant 0 : index
    %391 = vector.load %arg18[%c0_406, %c0_407] : memref<32x3xf32, #tpu.memory_space<vmem>>, vector<32x3xf32>
    %cst_408 = arith.constant dense<0.000000e+00> : vector<4x3xf32>
    %392 = tpu.matmul %390, %391, %cst_408 {dimension_numbers = #tpu.dot_dimension_numbers<[1], [0], [0], [1], [0, 0, 1, 1], [], []>} : vector<4x32xf32>, vector<32x3xf32>, vector<4x3xf32> -> vector<4x3xf32>
    %c0_409 = arith.constant 0 : index
    %c0_410 = arith.constant 0 : index
    %393 = vector.load %arg19[%c0_409, %c0_410] : memref<1x3xf32, #tpu.memory_space<vmem>>, vector<1x3xf32>
    %394 = vector.broadcast %393 : vector<1x3xf32> to vector<4x3xf32>
    %395 = arith.addf %392, %394 : vector<4x3xf32>
    %cst_411 = arith.constant dense<0xFF800000> : vector<4xf32>
    %396 = vector.multi_reduction <maximumf>, %395, %cst_411 [1] : vector<4x3xf32> to vector<4xf32>
    %397 = vector.shape_cast %396 : vector<4xf32> to vector<4x1xf32>
    %398 = vector.broadcast %397 : vector<4x1xf32> to vector<4x3xf32>
    %399 = arith.subf %395, %398 : vector<4x3xf32>
    %400 = math.exp %399 : vector<4x3xf32>
    %cst_412 = arith.constant dense<0.000000e+00> : vector<4xf32>
    %401 = vector.multi_reduction <add>, %400, %cst_412 [1] : vector<4x3xf32> to vector<4xf32>
    %402 = vector.shape_cast %401 : vector<4xf32> to vector<4x1xf32>
    %403 = tpu.reciprocal %402 {approx = true} : vector<4x1xf32> -> vector<4x1xf32>
    %404 = vector.broadcast %403 : vector<4x1xf32> to vector<4x3xf32>
    %405 = arith.mulf %400, %404 : vector<4x3xf32>
    %c0_413 = arith.constant 0 : index
    %c0_414 = arith.constant 0 : index
    %c0_415 = arith.constant 0 : index
    %406 = vector.load %arg20[%c0_413, %c0_414, %c0_415] : memref<1x4x3xf32, #tpu.memory_space<vmem>>, vector<1x4x3xf32>
    %407 = vector.shape_cast %406 : vector<1x4x3xf32> to vector<4x3xf32>
    %408 = vector.shape_cast %405 : vector<4x3xf32> to vector<1x4x3xf32>
    tpu.vector_store %arg20[%c0_413, %c0_414, %c0_415], %408 {strides = array<i32>} : memref<1x4x3xf32, #tpu.memory_space<vmem>>, vector<1x4x3xf32>,
    return
  }
  func.func @transform_0(%arg0: i32) -> (i32, i32, i32) {
    %c0_i32 = arith.constant 0 : i32
    %c0_i32_0 = arith.constant 0 : i32
    %c0_i32_1 = arith.constant 0 : i32
    return %arg0, %c0_i32, %c0_i32_0 : i32, i32, i32
  }
  func.func @transform_1(%arg0: i32) -> (i32, i32, i32) {
    %c0_i32 = arith.constant 0 : i32
    %c0_i32_0 = arith.constant 0 : i32
    %c0_i32_1 = arith.constant 0 : i32
    %c0_i32_2 = arith.constant 0 : i32
    return %c0_i32, %c0_i32_0, %c0_i32_1 : i32, i32, i32
  }
  func.func @transform_2(%arg0: i32) -> (i32, i32, i32) {
    %c0_i32 = arith.constant 0 : i32
    %c0_i32_0 = arith.constant 0 : i32
    %c0_i32_1 = arith.constant 0 : i32
    %c0_i32_2 = arith.constant 0 : i32
    return %c0_i32, %c0_i32_0, %c0_i32_1 : i32, i32, i32
  }
  func.func @transform_3(%arg0: i32) -> (i32, i32, i32) {
    %c0_i32 = arith.constant 0 : i32
    %c0_i32_0 = arith.constant 0 : i32
    %c0_i32_1 = arith.constant 0 : i32
    %c0_i32_2 = arith.constant 0 : i32
    return %c0_i32, %c0_i32_0, %c0_i32_1 : i32, i32, i32
  }
  func.func @transform_4(%arg0: i32) -> (i32, i32, i32) {
    %c0_i32 = arith.constant 0 : i32
    %c0_i32_0 = arith.constant 0 : i32
    %c0_i32_1 = arith.constant 0 : i32
    %c0_i32_2 = arith.constant 0 : i32
    return %c0_i32, %c0_i32_0, %c0_i32_1 : i32, i32, i32
  }
  func.func @transform_5(%arg0: i32) -> (i32, i32, i32) {
    %c0_i32 = arith.constant 0 : i32
    %c0_i32_0 = arith.constant 0 : i32
    %c0_i32_1 = arith.constant 0 : i32
    %c0_i32_2 = arith.constant 0 : i32
    return %c0_i32, %c0_i32_0, %c0_i32_1 : i32, i32, i32
  }
  func.func @transform_6(%arg0: i32) -> (i32, i32, i32) {
    %c0_i32 = arith.constant 0 : i32
    %c0_i32_0 = arith.constant 0 : i32
    %c0_i32_1 = arith.constant 0 : i32
    %c0_i32_2 = arith.constant 0 : i32
    return %c0_i32, %c0_i32_0, %c0_i32_1 : i32, i32, i32
  }
  func.func @transform_7(%arg0: i32) -> (i32, i32) {
    %c0_i32 = arith.constant 0 : i32
    %c0_i32_0 = arith.constant 0 : i32
    %c0_i32_1 = arith.constant 0 : i32
    return %c0_i32, %c0_i32_0 : i32, i32
  }
  func.func @transform_8(%arg0: i32) -> (i32, i32, i32) {
    %c0_i32 = arith.constant 0 : i32
    %c0_i32_0 = arith.constant 0 : i32
    %c0_i32_1 = arith.constant 0 : i32
    %c0_i32_2 = arith.constant 0 : i32
    return %c0_i32, %c0_i32_0, %c0_i32_1 : i32, i32, i32
  }
  func.func @transform_9(%arg0: i32) -> (i32, i32, i32) {
    %c0_i32 = arith.constant 0 : i32
    %c0_i32_0 = arith.constant 0 : i32
    %c0_i32_1 = arith.constant 0 : i32
    %c0_i32_2 = arith.constant 0 : i32
    return %c0_i32, %c0_i32_0, %c0_i32_1 : i32, i32, i32
  }
  func.func @transform_10(%arg0: i32) -> (i32, i32) {
    %c0_i32 = arith.constant 0 : i32
    %c0_i32_0 = arith.constant 0 : i32
    %c0_i32_1 = arith.constant 0 : i32
    return %c0_i32, %c0_i32_0 : i32, i32
  }
  func.func @transform_11(%arg0: i32) -> (i32, i32) {
    %c0_i32 = arith.constant 0 : i32
    %c0_i32_0 = arith.constant 0 : i32
    %c0_i32_1 = arith.constant 0 : i32
    return %c0_i32, %c0_i32_0 : i32, i32
  }
  func.func @transform_12(%arg0: i32) -> (i32, i32) {
    %c0_i32 = arith.constant 0 : i32
    %c0_i32_0 = arith.constant 0 : i32
    %c0_i32_1 = arith.constant 0 : i32
    return %c0_i32, %c0_i32_0 : i32, i32
  }
  func.func @transform_13(%arg0: i32) -> (i32, i32) {
    %c0_i32 = arith.constant 0 : i32
    %c0_i32_0 = arith.constant 0 : i32
    %c0_i32_1 = arith.constant 0 : i32
    return %c0_i32, %c0_i32_0 : i32, i32
  }
  func.func @transform_14(%arg0: i32) -> (i32, i32) {
    %c0_i32 = arith.constant 0 : i32
    %c0_i32_0 = arith.constant 0 : i32
    %c0_i32_1 = arith.constant 0 : i32
    return %c0_i32, %c0_i32_0 : i32, i32
  }
  func.func @transform_15(%arg0: i32) -> (i32, i32, i32) {
    %c0_i32 = arith.constant 0 : i32
    %c0_i32_0 = arith.constant 0 : i32
    %c0_i32_1 = arith.constant 0 : i32
    %c0_i32_2 = arith.constant 0 : i32
    return %c0_i32, %c0_i32_0, %c0_i32_1 : i32, i32, i32
  }
  func.func @transform_16(%arg0: i32) -> (i32, i32, i32) {
    %c0_i32 = arith.constant 0 : i32
    %c0_i32_0 = arith.constant 0 : i32
    %c0_i32_1 = arith.constant 0 : i32
    %c0_i32_2 = arith.constant 0 : i32
    return %c0_i32, %c0_i32_0, %c0_i32_1 : i32, i32, i32
  }
  func.func @transform_17(%arg0: i32) -> (i32, i32) {
    %c0_i32 = arith.constant 0 : i32
    %c0_i32_0 = arith.constant 0 : i32
    %c0_i32_1 = arith.constant 0 : i32
    return %c0_i32, %c0_i32_0 : i32, i32
  }
  func.func @transform_18(%arg0: i32) -> (i32, i32) {
    %c0_i32 = arith.constant 0 : i32
    %c0_i32_0 = arith.constant 0 : i32
    %c0_i32_1 = arith.constant 0 : i32
    return %c0_i32, %c0_i32_0 : i32, i32
  }
  func.func @transform_19(%arg0: i32) -> (i32, i32, i32) {
    %c0_i32 = arith.constant 0 : i32
    %c0_i32_0 = arith.constant 0 : i32
    %c0_i32_1 = arith.constant 0 : i32
    return %arg0, %c0_i32, %c0_i32_0 : i32, i32, i32
  }
}

</mosaic_0001>

<bundles_post_ra>
// kernel: base_model_forward_impl.1
= control target key start
LH: loop header
LB: loop body
LE: loop exit
PB: predicated region body
PF: predicated region fallthrough
CT: control target
= control target key end

     0   :  { %s12473_s0 = inlined_call_operand.vmem [shape: f32[2,700,32], index: 0, kind: input, shape index: {}]   ;;  %s12474_s1 = inlined_call_operand.vmem [shape: f32[5,32,40], index: 1, kind: input, shape index: {}]   ;;  %s12475_s2 = inlined_call_operand.vmem [shape: f32[5,40,40], index: 2, kind: input, shape index: {}]   ;;  %s12476_s3 = inlined_call_operand.vmem [shape: f32[5,40,40], index: 3, kind: input, shape index: {}]   ;;  %s12477_s4 = inlined_call_operand.vmem [shape: f32[5,40,40], index: 4, kind: input, shape index: {}]   ;;  %s12478_s5 = inlined_call_operand.vmem [shape: f32[4,1,40], index: 5, kind: input, shape index: {}]   ;;  %s12479_s6 = inlined_call_operand.vmem [shape: f32[1,40,256], index: 6, kind: input, shape index: {}]   ;;  %s12480_s7 = inlined_call_operand.vmem [shape: f32[1,256], index: 7, kind: input, shape index: {}]   ;;  %s12481_s8 = inlined_call_operand.vmem [shape: f32[6,32,32], index: 8, kind: input, shape index: {}]   ;;  %s12482_s9 = inlined_call_operand.vmem [shape: f32[6,1,32], index: 9, kind: input, shape index: {}]   ;;  %s12483_s10 = inlined_call_operand.vmem [shape: f32[32,16], index: 10, kind: input, shape index: {}]   ;;  %s12484_s11 = inlined_call_operand.vmem [shape: f32[1,16], index: 11, kind: input, shape index: {}]   ;;  %s12485_s12 = inlined_call_operand.vmem [shape: f32[16,32], index: 12, kind: input, shape index: {}]   ;;  %s12486_s13 = inlined_call_operand.vmem [shape: f32[16,32], index: 13, kind: input, shape index: {}]   ;;  %s12487_s14 = inlined_call_operand.vmem [shape: f32[1,32], index: 14, kind: input, shape index: {}]   ;;  %s12488_s15 = inlined_call_operand.vmem [shape: f32[6,32,32], index: 15, kind: input, shape index: {}]   ;;  %s12489_s16 = inlined_call_operand.vmem [shape: f32[6,1,32], index: 16, kind: input, shape index: {}]   ;;  %s12490_s17 = inlined_call_operand.vmem [shape: f32[32,3], index: 17, kind: input, shape index: {}]   ;;  %s12491_s18 = inlined_call_operand.vmem [shape: f32[1,3], index: 18, kind: input, shape index: {}]   ;;  %s12492_s19 = inlined_call_operand.vmem [shape: f32[2,4,3], index: 19, kind: output, shape index: {}]  }
   0x1   :  { %12498 = sst [smem:[#allocation21_spill]] %s12473_s0  ;;  %s10288_s0 = smov 0  }
   0x2   :  { %12499 = sst [smem:[#allocation22_spill]] %s12474_s1 }
   0x3   :  { %12500 = sst [smem:[#allocation23_spill]] %s12475_s2 }
   0x4   :  { %12501 = sst [smem:[#allocation24_spill]] %s12476_s3 }
   0x5 LB: > { %s7929_s30 = sadd.s32 4294967295, %s10180_s0   ;;  %p7933_p0 = scmp.ge.s32.totalorder %s10180_s0, 1  ;;  %s10180_s0 = sphi %s10288_s0, %s29_s0  }
   0x6   : > { %p537_p1 = scmp.lt.s32.totalorder %s10180_s0, 3 }
   0x8   : > { %p538_p2 = pnand %p7933_p0, %p537_p1 }
   0xa   : > { %541 = sbr.rel (%p538_p2) target bundleno = 4894 (0x131e), region = 96 }
   0xf   : > { %s12502_s1 = sld [smem:[#allocation22_spill]]  ;;  %p592_p3 = scmp.lt.s32.totalorder %s7929_s30, 1  ;;  %vm674_vm0 = vcmask 261120   ;;  %vm10183_vm1 = vmmov 0   ;;  %vm1837_vm2 = vcmask 326656   ;;  %vm4111_vm3 = vcmask 322560  }
  0x10   : > { %s12503_s3 = sld [smem:[#allocation21_spill]]  ;;  %vm4309_vm4 = vcmask 323584   ;;  %vm5340_vm5 = vcmask 320512   ;;  %vm5870_vm6 = vcmask 321536   ;;  %vm5888_vm7 = vcmask 319488   ;;  %s10185_s24 = smov 32  }
  0x11   : > { %s12524_s30 = smov (!%p592_p3, %s7929_s30), 1  ;;  %s12504_s21 = sld [smem:[#allocation23_spill]]  ;;  %vm6427_vm9 = vcmask 253952   ;;  %vm7096_vm10 = vcmask 130048   ;;  %vm7863_vm11 = vcmask 19456  }
  0x12   : > { %s10154_s23 = smul.u32 704, %s12524_s30  ;;  %s12522_s22 = sld [smem:[#allocation24_spill]] }
  0x13   : > { %s10186_s25 = smov 96   ;;  %s10187_s28 = smov 64  }
  0x14   : > { %s7935_s20 = sshll.u32 %s12524_s30, 2 }
  0x15   : > { %v10299_v0 = vld [vmem:[%s12502_s1 + $0x38] sm:$0xff]  ;;  %v10309_v2 = vld [vmem:[%s12502_s1 + $0x30] sm:$0xff]  ;;  %v10323_v4 = vld [vmem:[%s12502_s1 + $0x28] sm:$0xff] }
  0x16   : > { %v10304_v1 = vld [vmem:[%s12502_s1 + $0x18] sm:$0xff]  ;;  %9161 = vmatprep.subr.mxu0 %v10299_v0  ;;  %v10316_v3 = vld [vmem:[%s12502_s1 + $0x10] sm:$0xff]  ;;  %v10328_v5 = vld [vmem:[%s12502_s1 + $0x8] sm:$0xff]  ;;  %s10354_s26 = scalar_lea.vmem %s12503_s3, %s10154_s23 }
  0x17   : > { %9193 = vmatprep.subr.mxu1 %v10304_v1  ;;  %9162 = vmatpush3.msra.mxu0 %v10299_v0  ;;  %v10339_v6 = vld [vmem:[%s12502_s1 + $0x20] sm:$0xff]  ;;  %v7952_v10 = vld [vmem:[%s10354_s26 + $0x11] ss:$2 sm:$0xff]  ;;  %v7936_v11 = vld [vmem:[%s10354_s26 + $0x10] ss:$2 sm:$0xff] }
  0x18   : > { %9194 = vmatpush3.msra.mxu1 %v10304_v1  ;;  %9163 = vmatprep.subr.mxu0 %v10309_v2  ;;  %v10344_v7 = vld [vmem:[%s12502_s1] sm:$0xff]  ;;  %v10367_v12 = vld [vmem:[%s12502_s1 + $0x58] sm:$0xff]  ;;  %v10378_v15 = vld [vmem:[%s12502_s1 + $0x50] sm:$0xff] }
  0x19   : > { %9195 = vmatprep.subr.mxu1 %v10316_v3  ;;  %9164 = vmatpush3.msra.mxu0 %v10309_v2  ;;  %v7951_v8 = vld [vmem:[%s10354_s26 + $0x1] ss:$2 sm:$0xff]  ;;  %v602_v9 = vld [vmem:[%s10354_s26] ss:$2 sm:$0xff]  ;;  %v10383_v16 = vld [vmem:[%s12502_s1 + $0x78] sm:$0xff] }
  0x1a   : > { %9196 = vmatpush3.msra.mxu1 %v10316_v3  ;;  %9165 = vmatprep.subr.mxu0 %v10323_v4  ;;  %v7953_v13 = vld [vmem:[%s10354_s26 + $0x21] ss:$2 sm:$0xff]  ;;  %v7937_v14 = vld [vmem:[%s10354_s26 + $0x20] ss:$2 sm:$0xff]  ;;  %v7954_v17 = vld [vmem:[%s10354_s26 + $0x31] ss:$2 sm:$0xff] }
  0x1b   : > { %9197 = vmatprep.subr.mxu1 %v10328_v5  ;;  %9166 = vmatpush3.msra.mxu0 %v10323_v4  ;;  %v7938_v18 = vld [vmem:[%s10354_s26 + $0x30] ss:$2 sm:$0xff]  ;;  %v7955_v19 = vld [vmem:[%s10354_s26 + $0x41] ss:$2 sm:$0xff]  ;;  %v7939_v20 = vld [vmem:[%s10354_s26 + $0x40] ss:$2 sm:$0xff] }
  0x1c   : > { %9198 = vmatpush3.msra.mxu1 %v10328_v5  ;;  %9167 = vmatprep.subr.mxu0 %v10339_v6  ;;  %v10400_v21 = vld [vmem:[%s12502_s1 + $0x48] sm:$0xff]  ;;  %v10405_v22 = vld [vmem:[%s12502_s1 + $0x70] sm:$0xff]  ;;  %v10422_v27 = vld [vmem:[%s12502_s1 + $0x40] sm:$0xff] }
  0x1d   : > { %9199 = vmatprep.subr.mxu1 %v10344_v7  ;;  %9168 = vmatpush3.msra.mxu0 %v10339_v6  ;;  %v7956_v23 = vld [vmem:[%s10354_s26 + $0x51] ss:$2 sm:$0xff]  ;;  %v7940_v24 = vld [vmem:[%s10354_s26 + $0x50] ss:$2 sm:$0xff]  ;;  %v7957_v25 = vld [vmem:[%s10354_s26 + $0x61] ss:$2 sm:$0xff] }
  0x1e   : > { %9169 = vmatprep.mubr.msk.f32.mxu0 %vm674_vm0, %v7951_v8  ;;  %9200 = vmatpush3.msra.mxu1 %v10344_v7  ;;  %v7941_v26 = vld [vmem:[%s10354_s26 + $0x60] ss:$2 sm:$0xff]  ;;  %v7958_v29 = vld [vmem:[%s10354_s26 + $0x71] ss:$2 sm:$0xff]  ;;  %v7942_v30 = vld [vmem:[%s10354_s26 + $0x70] ss:$2 sm:$0xff] }
  0x1f   : > { %9201 = vmatprep.mubr.msk.f32.mxu1 %vm674_vm0, %v602_v9  ;;  %9170 = vmatmul.mubr.msk.f32.vlgmr.msra.gmra.mxu0 %vm674_vm0, %v7952_v10  ;;  %v10427_v28 = vld [vmem:[%s12502_s1 + $0x68] sm:$0xff]  ;;  %v10444_v33 = vld [vmem:[%s12502_s1 + $0x60] sm:$0xff]  ;;  %v10449_v34 = vld [vmem:[%s12502_s1 + $0x98] sm:$0xff] }
  0x20   : > { %9202 = vmatmul.mubr.msk.f32.vlgmr.msra.gmra.mxu1 %vm674_vm0, %v7936_v11  ;;  %9225 = vmatprep.subr.mxu0 %v10367_v12  ;;  %v7959_v31 = vld [vmem:[%s10354_s26 + $0x81] ss:$2 sm:$0xff]  ;;  %v7943_v32 = vld [vmem:[%s10354_s26 + $0x80] ss:$2 sm:$0xff]  ;;  %v7960_v35 = vld [vmem:[%s10354_s26 + $0x91] ss:$2 sm:$0xff] }
  0x21   : > { %9172 = vmatprep.mubr.msk.f32.mxu0 %vm674_vm0, %v7953_v13  ;;  %9226 = vmatpush3.msra.mxu0 %v10367_v12  ;;  %v7944_v36 = vld [vmem:[%s10354_s26 + $0x90] ss:$2 sm:$0xff]  ;;  %v7961_v37 = vld [vmem:[%s10354_s26 + $0xa1] ss:$2 sm:$0xff]  ;;  %v7945_v38 = vld [vmem:[%s10354_s26 + $0xa0] ss:$2 sm:$0xff] }
  0x22   : > { %9204 = vmatprep.mubr.msk.f32.mxu1 %vm674_vm0, %v7937_v14  ;;  %9227 = vmatprep.subr.mxu0 %v10378_v15  ;;  %v7962_v39 = vld [vmem:[%s10354_s26 + $0xb1] ss:$2 sm:$0xff]  ;;  %v7946_v40 = vld [vmem:[%s10354_s26 + $0xb0] ss:$2 sm:$0xff]  ;;  %v7963_v41 = vld [vmem:[%s10354_s26 + $0xc1] ss:$2 sm:$0xff] }
  0x23   : > { %9257 = vmatprep.subr.mxu1 %v10383_v16  ;;  %9173 = vmatmul.mubr.msk.f32.gmra.mxu0 %vm674_vm0, %v7954_v17  ;;  %v7947_v42 = vld [vmem:[%s10354_s26 + $0xc0] ss:$2 sm:$0xff]  ;;  %v7964_v43 = vld [vmem:[%s10354_s26 + $0xd1] ss:$2 sm:$0xff]  ;;  %v7948_v44 = vld [vmem:[%s10354_s26 + $0xd0] ss:$2 sm:$0xff] }
  0x24   : > { %9205 = vmatmul.mubr.msk.f32.gmra.mxu1 %vm674_vm0, %v7938_v18  ;;  %9175 = vmatprep.mubr.msk.f32.mxu0 %vm674_vm0, %v7955_v19  ;;  %v7965_v45 = vld [vmem:[%s10354_s26 + $0xe1] ss:$2 sm:$0xff]  ;;  %v7949_v46 = vld [vmem:[%s10354_s26 + $0xe0] ss:$2 sm:$0xff]  ;;  %v7966_v47 = vld [vmem:[%s10354_s26 + $0xf1] ss:$2 sm:$0xff] }
  0x25   : > { %9207 = vmatprep.mubr.msk.f32.mxu1 %vm674_vm0, %v7939_v20  ;;  %9228 = vmatpush3.msra.mxu0 %v10378_v15  ;;  %v7950_v48 = vld [vmem:[%s10354_s26 + $0xf0] ss:$2 sm:$0xff]  ;;  %v8039_v50 = vld [vmem:[%s10354_s26 + $0x3] ss:$2 sm:$0xff]  ;;  %v8040_v52 = vld [vmem:[%s10354_s26 + $0x13] ss:$2 sm:$0xff] }
  0x26   : > { %9258 = vmatpush3.msra.mxu1 %v10383_v16  ;;  %9229 = vmatprep.subr.mxu0 %v10400_v21  ;;  %v8003_v49 = vld [vmem:[%s10354_s26 + $0x2] ss:$2 sm:$0xff]  ;;  %v8004_v51 = vld [vmem:[%s10354_s26 + $0x12] ss:$2 sm:$0xff]  ;;  %v8041_v54 = vld [vmem:[%s10354_s26 + $0x23] ss:$2 sm:$0xff] }
  0x27   : > { %9259 = vmatprep.subr.mxu1 %v10405_v22  ;;  %9176 = vmatmul.mubr.msk.f32.gmra.mxu0 %vm674_vm0, %v7956_v23  ;;  %v8005_v53 = vld [vmem:[%s10354_s26 + $0x22] ss:$2 sm:$0xff]  ;;  %v8006_v56 = vld [vmem:[%s10354_s26 + $0x32] ss:$2 sm:$0xff]  ;;  %v8042_v57 = vld [vmem:[%s10354_s26 + $0x33] ss:$2 sm:$0xff] }
  0x28   : > { %9208 = vmatmul.mubr.msk.f32.gmra.mxu1 %vm674_vm0, %v7940_v24  ;;  %9178 = vmatprep.mubr.msk.f32.mxu0 %vm674_vm0, %v7957_v25  ;;  %v10498_v55 = vld [vmem:[%s12502_s1 + $0x90] sm:$0xff]  ;;  %v10514_v60 = vld [vmem:[%s12502_s1 + $0x88] sm:$0xff]  ;;  %v10531_v9 = vld [vmem:[%s12502_s1 + $0x80] sm:$0xff] }
  0x29   : > { %9210 = vmatprep.mubr.msk.f32.mxu1 %vm674_vm0, %v7941_v26  ;;  %9230 = vmatpush3.msra.mxu0 %v10400_v21  ;;  %v8007_v58 = vld [vmem:[%s10354_s26 + $0x42] ss:$2 sm:$0xff]  ;;  %v8043_v59 = vld [vmem:[%s10354_s26 + $0x43] ss:$2 sm:$0xff]  ;;  %v8008_v61 = vld [vmem:[%s10354_s26 + $0x52] ss:$2 sm:$0xff] }
  0x2a   : > { %9260 = vmatpush3.msra.mxu1 %v10405_v22  ;;  %9231 = vmatprep.subr.mxu0 %v10422_v27  ;;  %v8044_v62 = vld [vmem:[%s10354_s26 + $0x53] ss:$2 sm:$0xff]  ;;  %v8009_v63 = vld [vmem:[%s10354_s26 + $0x62] ss:$2 sm:$0xff]  ;;  %v8045_v8 = vld [vmem:[%s10354_s26 + $0x63] ss:$2 sm:$0xff] }
  0x2b   : > { %9261 = vmatprep.subr.mxu1 %v10427_v28  ;;  %9179 = vmatmul.mubr.msk.f32.gmra.mxu0 %vm674_vm0, %v7958_v29  ;;  %v8010_v10 = vld [vmem:[%s10354_s26 + $0x72] ss:$2 sm:$0xff]  ;;  %v8046_v11 = vld [vmem:[%s10354_s26 + $0x73] ss:$2 sm:$0xff]  ;;  %v8011_v13 = vld [vmem:[%s10354_s26 + $0x82] ss:$2 sm:$0xff] }
  0x2c   : > { %9211 = vmatmul.mubr.msk.f32.gmra.mxu1 %vm674_vm0, %v7942_v30  ;;  %9181 = vmatprep.mubr.msk.f32.mxu0 %vm674_vm0, %v7959_v31  ;;  %v8047_v14 = vld [vmem:[%s10354_s26 + $0x83] ss:$2 sm:$0xff]  ;;  %v8012_v17 = vld [vmem:[%s10354_s26 + $0x92] ss:$2 sm:$0xff]  ;;  %v8048_v18 = vld [vmem:[%s10354_s26 + $0x93] ss:$2 sm:$0xff] }
  0x2d   : > { %9213 = vmatprep.mubr.msk.f32.mxu1 %vm674_vm0, %v7943_v32  ;;  %9232 = vmatpush3.msra.mxu0 %v10422_v27  ;;  %v8013_v19 = vld [vmem:[%s10354_s26 + $0xa2] ss:$2 sm:$0xff]  ;;  %v8049_v20 = vld [vmem:[%s10354_s26 + $0xa3] ss:$2 sm:$0xff]  ;;  %v8014_v23 = vld [vmem:[%s10354_s26 + $0xb2] ss:$2 sm:$0xff] }
  0x2e   : > { %9262 = vmatpush3.msra.mxu1 %v10427_v28  ;;  %9289 = vmatprep.subr.mxu0 %v10449_v34  ;;  %v8050_v24 = vld [vmem:[%s10354_s26 + $0xb3] ss:$2 sm:$0xff]  ;;  %v8015_v25 = vld [vmem:[%s10354_s26 + $0xc2] ss:$2 sm:$0xff]  ;;  %v8051_v26 = vld [vmem:[%s10354_s26 + $0xc3] ss:$2 sm:$0xff] }
  0x2f   : > { %9263 = vmatprep.subr.mxu1 %v10444_v33  ;;  %9182 = vmatmul.mubr.msk.f32.gmra.mxu0 %vm674_vm0, %v7960_v35  ;;  %v8016_v29 = vld [vmem:[%s10354_s26 + $0xd2] ss:$2 sm:$0xff]  ;;  %v8052_v30 = vld [vmem:[%s10354_s26 + $0xd3] ss:$2 sm:$0xff]  ;;  %v8017_v31 = vld [vmem:[%s10354_s26 + $0xe2] ss:$2 sm:$0xff] }
  0x30   : > { %9214 = vmatmul.mubr.msk.f32.gmra.mxu1 %vm674_vm0, %v7944_v36  ;;  %9184 = vmatprep.mubr.msk.f32.mxu0 %vm674_vm0, %v7961_v37  ;;  %v8053_v32 = vld [vmem:[%s10354_s26 + $0xe3] ss:$2 sm:$0xff]  ;;  %v8018_v35 = vld [vmem:[%s10354_s26 + $0xf2] ss:$2 sm:$0xff]  ;;  %v8054_v36 = vld [vmem:[%s10354_s26 + $0xf3] ss:$2 sm:$0xff] }
  0x31   : > { %9216 = vmatprep.mubr.msk.f32.mxu1 %vm674_vm0, %v7945_v38  ;;  %9264 = vmatpush3.msra.mxu1 %v10444_v33  ;;  %v8075_v37 = vld [vmem:[%s10354_s26 + $0x4] ss:$2 sm:$0xff]  ;;  %v8128_v38 = vld [vmem:[%s10354_s26 + $0x101] ss:$2 sm:$0xff] }
  0x32   : > { %9321 = vmatprep.subr.mxu1 %v10299_v0 }
  0x33   : > { %9185 = vmatmul.mubr.msk.f32.gmra.mxu0 %vm674_vm0, %v7962_v39  ;;  %v8076_v39 = vld [vmem:[%s10354_s26 + $0x14] ss:$2 sm:$0xff] }
  0x34   : > { %9217 = vmatmul.mubr.msk.f32.gmra.mxu1 %vm674_vm0, %v7946_v40  ;;  %9187 = vmatprep.mubr.msk.f32.mxu0 %vm674_vm0, %v7963_v41  ;;  %v8129_v40 = vld [vmem:[%s10354_s26 + $0x111] ss:$2 sm:$0xff]  ;;  %v8077_v41 = vld [vmem:[%s10354_s26 + $0x24] ss:$2 sm:$0xff] }
  0x35   : > { %9219 = vmatprep.mubr.msk.f32.mxu1 %vm674_vm0, %v7947_v42  ;;  %v8130_v42 = vld [vmem:[%s10354_s26 + $0x121] ss:$2 sm:$0xff] }
  0x37   : > { %9188 = vmatmul.mubr.msk.f32.gmra.mxu0 %vm674_vm0, %v7964_v43  ;;  %v8078_v43 = vld [vmem:[%s10354_s26 + $0x34] ss:$2 sm:$0xff] }
  0x38   : > { %9220 = vmatmul.mubr.msk.f32.gmra.mxu1 %vm674_vm0, %v7948_v44  ;;  %9190 = vmatprep.mubr.msk.f32.mxu0 %vm674_vm0, %v7965_v45  ;;  %v8131_v44 = vld [vmem:[%s10354_s26 + $0x131] ss:$2 sm:$0xff]  ;;  %v8079_v45 = vld [vmem:[%s10354_s26 + $0x44] ss:$2 sm:$0xff] }
  0x39   : > { %9222 = vmatprep.mubr.msk.f32.mxu1 %vm674_vm0, %v7949_v46  ;;  %v8132_v46 = vld [vmem:[%s10354_s26 + $0x141] ss:$2 sm:$0xff] }
  0x3b   : > { %9191 = vmatmul.mubr.msk.f32.gmra.mxu0 %vm674_vm0, %v7966_v47  ;;  %v8080_v47 = vld [vmem:[%s10354_s26 + $0x54] ss:$2 sm:$0xff] }
  0x3c   : > { %9223 = vmatmul.mubr.msk.f32.gmra.mxu1 %vm674_vm0, %v7950_v48  ;;  %9233 = vmatprep.mubr.msk.f32.mxu0 %vm674_vm0, %v8003_v49  ;;  %v8133_v48 = vld [vmem:[%s10354_s26 + $0x151] ss:$2 sm:$0xff]  ;;  %v8081_v49 = vld [vmem:[%s10354_s26 + $0x64] ss:$2 sm:$0xff] }
  0x3d   : > { %9265 = vmatprep.mubr.msk.f32.mxu1 %vm674_vm0, %v8039_v50  ;;  %v8134_v50 = vld [vmem:[%s10354_s26 + $0x161] ss:$2 sm:$0xff] }
  0x3f   : > { %9234 = vmatmul.mubr.msk.f32.vlgmr.msra.gmra.mxu0 %vm674_vm0, %v8004_v51  ;;  %v8082_v51 = vld [vmem:[%s10354_s26 + $0x74] ss:$2 sm:$0xff] }
  0x40   : > { %9266 = vmatmul.mubr.msk.f32.vlgmr.msra.gmra.mxu1 %vm674_vm0, %v8040_v52  ;;  %9290 = vmatpush3.msra.mxu0 %v10449_v34  ;;  %v8135_v52 = vld [vmem:[%s10354_s26 + $0x171] ss:$2 sm:$0xff] }
  0x41   : > { %9236 = vmatprep.mubr.msk.f32.mxu0 %vm674_vm0, %v8005_v53  ;;  %9268 = vmatprep.mubr.msk.f32.mxu1 %vm674_vm0, %v8041_v54  ;;  %v8083_v53 = vld [vmem:[%s10354_s26 + $0x84] ss:$2 sm:$0xff]  ;;  %v8136_v54 = vld [vmem:[%s10354_s26 + $0x181] ss:$2 sm:$0xff] }
  0x42   : > { %9291 = vmatprep.subr.mxu0 %v10498_v55  ;;  %9322 = vmatpush3.msra.mxu1 %v10299_v0 }
  0x43   : > { %9292 = vmatpush3.msra.mxu0 %v10498_v55  ;;  %9323 = vmatprep.subr.mxu1 %v10309_v2 }
  0x44   : > { %9237 = vmatmul.mubr.msk.f32.gmra.mxu0 %vm674_vm0, %v8006_v56  ;;  %9269 = vmatmul.mubr.msk.f32.gmra.mxu1 %vm674_vm0, %v8042_v57  ;;  %v8084_v56 = vld [vmem:[%s10354_s26 + $0x94] ss:$2 sm:$0xff]  ;;  %v8137_v57 = vld [vmem:[%s10354_s26 + $0x191] ss:$2 sm:$0xff] }
  0x45   : > { %9239 = vmatprep.mubr.msk.f32.mxu0 %vm674_vm0, %v8007_v58  ;;  %9271 = vmatprep.mubr.msk.f32.mxu1 %vm674_vm0, %v8043_v59  ;;  %v8085_v58 = vld [vmem:[%s10354_s26 + $0xa4] ss:$2 sm:$0xff]  ;;  %v8138_v59 = vld [vmem:[%s10354_s26 + $0x1a1] ss:$2 sm:$0xff] }
  0x46   : > { %9293 = vmatprep.subr.mxu0 %v10514_v60  ;;  %9324 = vmatpush3.msra.mxu1 %v10309_v2 }
  0x47   : > { %9294 = vmatpush3.msra.mxu0 %v10514_v60  ;;  %9325 = vmatprep.subr.mxu1 %v10323_v4 }
  0x48   : > { %9240 = vmatmul.mubr.msk.f32.gmra.mxu0 %vm674_vm0, %v8008_v61  ;;  %9272 = vmatmul.mubr.msk.f32.gmra.mxu1 %vm674_vm0, %v8044_v62  ;;  %v8086_v61 = vld [vmem:[%s10354_s26 + $0xb4] ss:$2 sm:$0xff]  ;;  %v8139_v62 = vld [vmem:[%s10354_s26 + $0x1b1] ss:$2 sm:$0xff] }
  0x49   : > { %9242 = vmatprep.mubr.msk.f32.mxu0 %vm674_vm0, %v8009_v63  ;;  %9274 = vmatprep.mubr.msk.f32.mxu1 %vm674_vm0, %v8045_v8  ;;  %v8087_v63 = vld [vmem:[%s10354_s26 + $0xc4] ss:$2 sm:$0xff]  ;;  %v8140_v8 = vld [vmem:[%s10354_s26 + $0x1c1] ss:$2 sm:$0xff] }
  0x4a   : > { %9295 = vmatprep.subr.mxu0 %v10531_v9  ;;  %9326 = vmatpush3.msra.mxu1 %v10323_v4 }
  0x4b   : > { %9296 = vmatpush3.msra.mxu0 %v10531_v9  ;;  %9327 = vmatprep.subr.mxu1 %v10339_v6 }
  0x4c   : > { %9243 = vmatmul.mubr.msk.f32.gmra.mxu0 %vm674_vm0, %v8010_v10  ;;  %9275 = vmatmul.mubr.msk.f32.gmra.mxu1 %vm674_vm0, %v8046_v11  ;;  %v8088_v10 = vld [vmem:[%s10354_s26 + $0xd4] ss:$2 sm:$0xff]  ;;  %v8141_v11 = vld [vmem:[%s10354_s26 + $0x1d1] ss:$2 sm:$0xff] }
  0x4d   : > { %9245 = vmatprep.mubr.msk.f32.mxu0 %vm674_vm0, %v8011_v13  ;;  %9277 = vmatprep.mubr.msk.f32.mxu1 %vm674_vm0, %v8047_v14  ;;  %v8089_v13 = vld [vmem:[%s10354_s26 + $0xe4] ss:$2 sm:$0xff]  ;;  %v8142_v14 = vld [vmem:[%s10354_s26 + $0x1e1] ss:$2 sm:$0xff] }
  0x4e   : > { %9353 = vmatprep.subr.mxu0 %v10304_v1  ;;  %9328 = vmatpush3.msra.mxu1 %v10339_v6 }
  0x4f   : > { %9385 = vmatprep.subr.mxu1 %v10367_v12 }
  0x50   : > { %9246 = vmatmul.mubr.msk.f32.gmra.mxu0 %vm674_vm0, %v8012_v17  ;;  %9278 = vmatmul.mubr.msk.f32.gmra.mxu1 %vm674_vm0, %v8048_v18  ;;  %v8090_v17 = vld [vmem:[%s10354_s26 + $0xf4] ss:$2 sm:$0xff]  ;;  %v8143_v18 = vld [vmem:[%s10354_s26 + $0x1f1] ss:$2 sm:$0xff] }
  0x51   : > { %9248 = vmatprep.mubr.msk.f32.mxu0 %vm674_vm0, %v8013_v19  ;;  %9280 = vmatprep.mubr.msk.f32.mxu1 %vm674_vm0, %v8049_v20  ;;  %v8112_v19 = vld [vmem:[%s10354_s26 + $0x100] ss:$2 sm:$0xff] }
  0x52   : > { %v8180_v20 = vld [vmem:[%s10354_s26 + $0x102] ss:$2 sm:$0xff] }
  0x54   : > { %9249 = vmatmul.mubr.msk.f32.gmra.mxu0 %vm674_vm0, %v8014_v23  ;;  %9281 = vmatmul.mubr.msk.f32.gmra.mxu1 %vm674_vm0, %v8050_v24  ;;  %v8113_v23 = vld [vmem:[%s10354_s26 + $0x110] ss:$2 sm:$0xff] }
  0x55   : > { %9251 = vmatprep.mubr.msk.f32.mxu0 %vm674_vm0, %v8015_v25  ;;  %9283 = vmatprep.mubr.msk.f32.mxu1 %vm674_vm0, %v8051_v26  ;;  %v8181_v24 = vld [vmem:[%s10354_s26 + $0x112] ss:$2 sm:$0xff]  ;;  %v8182_v26 = vld [vmem:[%s10354_s26 + $0x122] ss:$2 sm:$0xff] }
  0x56   : > { %v8114_v25 = vld [vmem:[%s10354_s26 + $0x120] ss:$2 sm:$0xff] }
  0x58   : > { %9252 = vmatmul.mubr.msk.f32.gmra.mxu0 %vm674_vm0, %v8016_v29  ;;  %9284 = vmatmul.mubr.msk.f32.gmra.mxu1 %vm674_vm0, %v8052_v30  ;;  %v8115_v29 = vld [vmem:[%s10354_s26 + $0x130] ss:$2 sm:$0xff] }
  0x59   : > { %9254 = vmatprep.mubr.msk.f32.mxu0 %vm674_vm0, %v8017_v31  ;;  %9286 = vmatprep.mubr.msk.f32.mxu1 %vm674_vm0, %v8053_v32  ;;  %v8183_v30 = vld [vmem:[%s10354_s26 + $0x132] ss:$2 sm:$0xff]  ;;  %v8184_v32 = vld [vmem:[%s10354_s26 + $0x142] ss:$2 sm:$0xff] }
  0x5a   : > { %v8116_v31 = vld [vmem:[%s10354_s26 + $0x140] ss:$2 sm:$0xff] }
  0x5c   : > { %9255 = vmatmul.mubr.msk.f32.gmra.mxu0 %vm674_vm0, %v8018_v35  ;;  %9287 = vmatmul.mubr.msk.f32.gmra.mxu1 %vm674_vm0, %v8054_v36  ;;  %v8117_v35 = vld [vmem:[%s10354_s26 + $0x150] ss:$2 sm:$0xff] }
  0x5d   : > { %9297 = vmatprep.mubr.msk.f32.mxu0 %vm674_vm0, %v8075_v37  ;;  %9329 = vmatprep.mubr.msk.f32.mxu1 %vm674_vm0, %v8128_v38  ;;  %v8185_v36 = vld [vmem:[%s10354_s26 + $0x152] ss:$2 sm:$0xff]  ;;  %v8186_v38 = vld [vmem:[%s10354_s26 + $0x162] ss:$2 sm:$0xff] }
  0x5e   : > { %v8118_v37 = vld [vmem:[%s10354_s26 + $0x160] ss:$2 sm:$0xff] }
  0x60   : > { %9298 = vmatmul.mubr.msk.f32.vlgmr.msra.gmra.mxu0 %vm674_vm0, %v8076_v39  ;;  %9330 = vmatmul.mubr.msk.f32.vlgmr.msra.gmra.mxu1 %vm674_vm0, %v8129_v40  ;;  %v8119_v39 = vld [vmem:[%s10354_s26 + $0x170] ss:$2 sm:$0xff] }
  0x61   : > { %9354 = vmatpush3.msra.mxu0 %v10304_v1  ;;  %9300 = vmatprep.mubr.msk.f32.mxu0 %vm674_vm0, %v8077_v41  ;;  %v8187_v40 = vld [vmem:[%s10354_s26 + $0x172] ss:$2 sm:$0xff] }
  0x62   : > { %9332 = vmatprep.mubr.msk.f32.mxu1 %vm674_vm0, %v8130_v42  ;;  %9355 = vmatprep.subr.mxu0 %v10316_v3  ;;  %v8120_v41 = vld [vmem:[%s10354_s26 + $0x180] ss:$2 sm:$0xff] }
  0x63   : > { %9356 = vmatpush3.msra.mxu0 %v10316_v3  ;;  %9386 = vmatpush3.msra.mxu1 %v10367_v12  ;;  %v8188_v42 = vld [vmem:[%s10354_s26 + $0x182] ss:$2 sm:$0xff] }
  0x64   : > { %9301 = vmatmul.mubr.msk.f32.gmra.mxu0 %vm674_vm0, %v8078_v43  ;;  %9333 = vmatmul.mubr.msk.f32.gmra.mxu1 %vm674_vm0, %v8131_v44  ;;  %v8121_v43 = vld [vmem:[%s10354_s26 + $0x190] ss:$2 sm:$0xff] }
  0x65   : > { %9303 = vmatprep.mubr.msk.f32.mxu0 %vm674_vm0, %v8079_v45  ;;  %9335 = vmatprep.mubr.msk.f32.mxu1 %vm674_vm0, %v8132_v46  ;;  %v8189_v44 = vld [vmem:[%s10354_s26 + $0x192] ss:$2 sm:$0xff]  ;;  %v8190_v46 = vld [vmem:[%s10354_s26 + $0x1a2] ss:$2 sm:$0xff] }
  0x66   : > { %9357 = vmatprep.subr.mxu0 %v10328_v5  ;;  %9387 = vmatprep.subr.mxu1 %v10378_v15  ;;  %v8122_v45 = vld [vmem:[%s10354_s26 + $0x1a0] ss:$2 sm:$0xff] }
  0x67   : > { %9358 = vmatpush3.msra.mxu0 %v10328_v5  ;;  %9388 = vmatpush3.msra.mxu1 %v10378_v15 }
  0x68   : > { %9304 = vmatmul.mubr.msk.f32.gmra.mxu0 %vm674_vm0, %v8080_v47  ;;  %9336 = vmatmul.mubr.msk.f32.gmra.mxu1 %vm674_vm0, %v8133_v48  ;;  %v8123_v47 = vld [vmem:[%s10354_s26 + $0x1b0] ss:$2 sm:$0xff] }
  0x69   : > { %9306 = vmatprep.mubr.msk.f32.mxu0 %vm674_vm0, %v8081_v49  ;;  %9338 = vmatprep.mubr.msk.f32.mxu1 %vm674_vm0, %v8134_v50  ;;  %v8191_v48 = vld [vmem:[%s10354_s26 + $0x1b2] ss:$2 sm:$0xff]  ;;  %v8192_v50 = vld [vmem:[%s10354_s26 + $0x1c2] ss:$2 sm:$0xff] }
  0x6a   : > { %9359 = vmatprep.subr.mxu0 %v10344_v7  ;;  %9389 = vmatprep.subr.mxu1 %v10400_v21  ;;  %v8124_v49 = vld [vmem:[%s10354_s26 + $0x1c0] ss:$2 sm:$0xff] }
  0x6b   : > { %9360 = vmatpush3.msra.mxu0 %v10344_v7  ;;  %9390 = vmatpush3.msra.mxu1 %v10400_v21 }
  0x6c   : > { %9307 = vmatmul.mubr.msk.f32.gmra.mxu0 %vm674_vm0, %v8082_v51  ;;  %9339 = vmatmul.mubr.msk.f32.gmra.mxu1 %vm674_vm0, %v8135_v52  ;;  %v8125_v51 = vld [vmem:[%s10354_s26 + $0x1d0] ss:$2 sm:$0xff] }
  0x6d   : > { %9309 = vmatprep.mubr.msk.f32.mxu0 %vm674_vm0, %v8083_v53  ;;  %9341 = vmatprep.mubr.msk.f32.mxu1 %vm674_vm0, %v8136_v54  ;;  %v8193_v52 = vld [vmem:[%s10354_s26 + $0x1d2] ss:$2 sm:$0xff]  ;;  %v8194_v54 = vld [vmem:[%s10354_s26 + $0x1e2] ss:$2 sm:$0xff] }
  0x6e   : > { %9391 = vmatprep.subr.mxu1 %v10422_v27  ;;  %9417 = vmatprep.subr.mxu0 %v10383_v16  ;;  %v8126_v53 = vld [vmem:[%s10354_s26 + $0x1e0] ss:$2 sm:$0xff] }
  0x6f   : > { %9392 = vmatpush3.msra.mxu1 %v10422_v27 }
  0x70   : > { %9310 = vmatmul.mubr.msk.f32.gmra.mxu0 %vm674_vm0, %v8084_v56  ;;  %9342 = vmatmul.mubr.msk.f32.gmra.mxu1 %vm674_vm0, %v8137_v57  ;;  %v8127_v56 = vld [vmem:[%s10354_s26 + $0x1f0] ss:$2 sm:$0xff] }
  0x71   : > { %9312 = vmatprep.mubr.msk.f32.mxu0 %vm674_vm0, %v8085_v58  ;;  %9344 = vmatprep.mubr.msk.f32.mxu1 %vm674_vm0, %v8138_v59  ;;  %v8195_v57 = vld [vmem:[%s10354_s26 + $0x1f2] ss:$2 sm:$0xff]  ;;  %v8216_v58 = vld [vmem:[%s10354_s26 + $0x103] ss:$2 sm:$0xff] }
  0x72   : > { %9449 = vmatprep.subr.mxu1 %v10449_v34  ;;  %v8252_v59 = vld [vmem:[%s10354_s26 + $0x104] ss:$2 sm:$0xff] }
  0x74   : > { %9313 = vmatmul.mubr.msk.f32.gmra.mxu0 %vm674_vm0, %v8086_v61  ;;  %9345 = vmatmul.mubr.msk.f32.gmra.mxu1 %vm674_vm0, %v8139_v62  ;;  %v8217_v61 = vld [vmem:[%s10354_s26 + $0x113] ss:$2 sm:$0xff]  ;;  %v8253_v62 = vld [vmem:[%s10354_s26 + $0x114] ss:$2 sm:$0xff] }
  0x75   : > { %9315 = vmatprep.mubr.msk.f32.mxu0 %vm674_vm0, %v8087_v63  ;;  %9347 = vmatprep.mubr.msk.f32.mxu1 %vm674_vm0, %v8140_v8  ;;  %v8218_v63 = vld [vmem:[%s10354_s26 + $0x123] ss:$2 sm:$0xff]  ;;  %v8254_v8 = vld [vmem:[%s10354_s26 + $0x124] ss:$2 sm:$0xff] }
  0x78   : > { %9316 = vmatmul.mubr.msk.f32.gmra.mxu0 %vm674_vm0, %v8088_v10  ;;  %9348 = vmatmul.mubr.msk.f32.gmra.mxu1 %vm674_vm0, %v8141_v11  ;;  %v8219_v10 = vld [vmem:[%s10354_s26 + $0x133] ss:$2 sm:$0xff]  ;;  %v8255_v11 = vld [vmem:[%s10354_s26 + $0x134] ss:$2 sm:$0xff] }
  0x79   : > { %9318 = vmatprep.mubr.msk.f32.mxu0 %vm674_vm0, %v8089_v13  ;;  %9350 = vmatprep.mubr.msk.f32.mxu1 %vm674_vm0, %v8142_v14  ;;  %v8220_v13 = vld [vmem:[%s10354_s26 + $0x143] ss:$2 sm:$0xff]  ;;  %v8256_v14 = vld [vmem:[%s10354_s26 + $0x144] ss:$2 sm:$0xff] }
  0x7c   : > { %9319 = vmatmul.mubr.msk.f32.gmra.mxu0 %vm674_vm0, %v8090_v17  ;;  %9351 = vmatmul.mubr.msk.f32.gmra.mxu1 %vm674_vm0, %v8143_v18  ;;  %v8257_v17 = vld [vmem:[%s10354_s26 + $0x154] ss:$2 sm:$0xff]  ;;  %v8222_v18 = vld [vmem:[%s10354_s26 + $0x163] ss:$2 sm:$0xff] }
  0x7d   : > { %9361 = vmatprep.mubr.msk.f32.mxu0 %vm674_vm0, %v8112_v19  ;;  %9393 = vmatprep.mubr.msk.f32.mxu1 %vm674_vm0, %v8180_v20  ;;  %v8258_v19 = vld [vmem:[%s10354_s26 + $0x164] ss:$2 sm:$0xff]  ;;  %v8224_v20 = vld [vmem:[%s10354_s26 + $0x183] ss:$2 sm:$0xff] }
  0x80   : > { %9362 = vmatmul.mubr.msk.f32.vlgmr.msra.gmra.mxu0 %vm674_vm0, %v8113_v23  ;;  %9394 = vmatmul.mubr.msk.f32.vlgmr.msra.gmra.mxu1 %vm674_vm0, %v8181_v24  ;;  %v8260_v23 = vld [vmem:[%s10354_s26 + $0x184] ss:$2 sm:$0xff]  ;;  %v8226_v24 = vld [vmem:[%s10354_s26 + $0x1a3] ss:$2 sm:$0xff] }
  0x81   : > { %9418 = vmatpush3.msra.mxu0 %v10383_v16  ;;  %9364 = vmatprep.mubr.msk.f32.mxu0 %vm674_vm0, %v8114_v25  ;;  %v8262_v25 = vld [vmem:[%s10354_s26 + $0x1a4] ss:$2 sm:$0xff] }
  0x82   : > { %9396 = vmatprep.mubr.msk.f32.mxu1 %vm674_vm0, %v8182_v26  ;;  %9419 = vmatprep.subr.mxu0 %v10405_v22  ;;  %v8228_v26 = vld [vmem:[%s10354_s26 + $0x1c3] ss:$2 sm:$0xff] }
  0x83   : > { %9420 = vmatpush3.msra.mxu0 %v10405_v22  ;;  %9450 = vmatpush3.msra.mxu1 %v10449_v34 }
  0x84   : > { %9365 = vmatmul.mubr.msk.f32.gmra.mxu0 %vm674_vm0, %v8115_v29  ;;  %9397 = vmatmul.mubr.msk.f32.gmra.mxu1 %vm674_vm0, %v8183_v30  ;;  %v8264_v29 = vld [vmem:[%s10354_s26 + $0x1c4] ss:$2 sm:$0xff]  ;;  %v8265_v30 = vld [vmem:[%s10354_s26 + $0x1d4] ss:$2 sm:$0xff] }
  0x85   : > { %9367 = vmatprep.mubr.msk.f32.mxu0 %vm674_vm0, %v8116_v31  ;;  %9399 = vmatprep.mubr.msk.f32.mxu1 %vm674_vm0, %v8184_v32  ;;  %v8230_v31 = vld [vmem:[%s10354_s26 + $0x1e3] ss:$2 sm:$0xff]  ;;  %v8266_v32 = vld [vmem:[%s10354_s26 + $0x1e4] ss:$2 sm:$0xff] }
  0x86   : > { %9421 = vmatprep.subr.mxu0 %v10427_v28  ;;  %9451 = vmatprep.subr.mxu1 %v10498_v55 }
  0x87   : > { %9422 = vmatpush3.msra.mxu0 %v10427_v28  ;;  %9452 = vmatpush3.msra.mxu1 %v10498_v55 }
  0x88   : > { %9368 = vmatmul.mubr.msk.f32.gmra.mxu0 %vm674_vm0, %v8117_v35  ;;  %9400 = vmatmul.mubr.msk.f32.gmra.mxu1 %vm674_vm0, %v8185_v36  ;;  %v8231_v35 = vld [vmem:[%s10354_s26 + $0x1f3] ss:$2 sm:$0xff]  ;;  %v8267_v36 = vld [vmem:[%s10354_s26 + $0x1f4] ss:$2 sm:$0xff] }
  0x89   : > { %9370 = vmatprep.mubr.msk.f32.mxu0 %vm674_vm0, %v8118_v37  ;;  %9402 = vmatprep.mubr.msk.f32.mxu1 %vm674_vm0, %v8186_v38  ;;  %v8300_v37 = vld [vmem:[%s10354_s26 + $0x201] ss:$2 sm:$0xff]  ;;  %v8288_v38 = vld [vmem:[%s10354_s26 + $0x200] ss:$2 sm:$0xff] }
  0x8a   : > { %9423 = vmatprep.subr.mxu0 %v10444_v33  ;;  %9453 = vmatprep.subr.mxu1 %v10514_v60 }
  0x8b   : > { %9424 = vmatpush3.msra.mxu0 %v10444_v33  ;;  %9454 = vmatpush3.msra.mxu1 %v10514_v60 }
  0x8c   : > { %9371 = vmatmul.mubr.msk.f32.gmra.mxu0 %vm674_vm0, %v8119_v39  ;;  %9403 = vmatmul.mubr.msk.f32.gmra.mxu1 %vm674_vm0, %v8187_v40  ;;  %v8301_v39 = vld [vmem:[%s10354_s26 + $0x211] ss:$2 sm:$0xff]  ;;  %v8289_v40 = vld [vmem:[%s10354_s26 + $0x210] ss:$2 sm:$0xff] }
  0x8d   : > { %9373 = vmatprep.mubr.msk.f32.mxu0 %vm674_vm0, %v8120_v41  ;;  %9405 = vmatprep.mubr.msk.f32.mxu1 %vm674_vm0, %v8188_v42  ;;  %v8302_v41 = vld [vmem:[%s10354_s26 + $0x221] ss:$2 sm:$0xff]  ;;  %v8290_v42 = vld [vmem:[%s10354_s26 + $0x220] ss:$2 sm:$0xff] }
  0x8e   : > { %9455 = vmatprep.subr.mxu1 %v10531_v9  ;;  %9481 = vmatprep.subr.mxu0 %v10299_v0 }
  0x8f   : > { %9456 = vmatpush3.msra.mxu1 %v10531_v9 }
  0x90   : > { %9374 = vmatmul.mubr.msk.f32.gmra.mxu0 %vm674_vm0, %v8121_v43  ;;  %9406 = vmatmul.mubr.msk.f32.gmra.mxu1 %vm674_vm0, %v8189_v44  ;;  %v8303_v43 = vld [vmem:[%s10354_s26 + $0x231] ss:$2 sm:$0xff]  ;;  %v8291_v44 = vld [vmem:[%s10354_s26 + $0x230] ss:$2 sm:$0xff] }
  0x91   : > { %9376 = vmatprep.mubr.msk.f32.mxu0 %vm674_vm0, %v8122_v45  ;;  %9408 = vmatprep.mubr.msk.f32.mxu1 %vm674_vm0, %v8190_v46  ;;  %v8304_v45 = vld [vmem:[%s10354_s26 + $0x241] ss:$2 sm:$0xff]  ;;  %v8292_v46 = vld [vmem:[%s10354_s26 + $0x240] ss:$2 sm:$0xff] }
  0x92   : > { %9507 = vmatprep.subr.mxu1 %v10304_v1 }
  0x94   : > { %9377 = vmatmul.mubr.msk.f32.gmra.mxu0 %vm674_vm0, %v8123_v47  ;;  %9409 = vmatmul.mubr.msk.f32.gmra.mxu1 %vm674_vm0, %v8191_v48  ;;  %v8293_v47 = vld [vmem:[%s10354_s26 + $0x250] ss:$2 sm:$0xff]  ;;  %v8306_v48 = vld [vmem:[%s10354_s26 + $0x261] ss:$2 sm:$0xff] }
  0x95   : > { %9379 = vmatprep.mubr.msk.f32.mxu0 %vm674_vm0, %v8124_v49  ;;  %9411 = vmatprep.mubr.msk.f32.mxu1 %vm674_vm0, %v8192_v50  ;;  %v8294_v49 = vld [vmem:[%s10354_s26 + $0x260] ss:$2 sm:$0xff]  ;;  %v8308_v50 = vld [vmem:[%s10354_s26 + $0x281] ss:$2 sm:$0xff] }
  0x98   : > { %9380 = vmatmul.mubr.msk.f32.gmra.mxu0 %vm674_vm0, %v8125_v51  ;;  %9412 = vmatmul.mubr.msk.f32.gmra.mxu1 %vm674_vm0, %v8193_v52  ;;  %v8296_v51 = vld [vmem:[%s10354_s26 + $0x280] ss:$2 sm:$0xff]  ;;  %v8310_v52 = vld [vmem:[%s10354_s26 + $0x2a1] ss:$2 sm:$0xff] }
  0x99   : > { %9382 = vmatprep.mubr.msk.f32.mxu0 %vm674_vm0, %v8126_v53  ;;  %9414 = vmatprep.mubr.msk.f32.mxu1 %vm674_vm0, %v8194_v54  ;;  %v8298_v53 = vld [vmem:[%s10354_s26 + $0x2a0] ss:$2 sm:$0xff] }
  0x9a   : > { %v8340_v54 = vld [vmem:[%s10354_s26 + $0x202] ss:$2 sm:$0xff] }
  0x9c   : > { %9383 = vmatmul.mubr.msk.f32.gmra.mxu0 %vm674_vm0, %v8127_v56  ;;  %9415 = vmatmul.mubr.msk.f32.gmra.mxu1 %vm674_vm0, %v8195_v57  ;;  %v8368_v56 = vld [vmem:[%s10354_s26 + $0x203] ss:$2 sm:$0xff]  ;;  %v12496_v57 = vmov 0.0  }
  0x9d   : > { %9425 = vmatprep.mubr.msk.f32.mxu0 %vm674_vm0, %v8216_v58  ;;  %9457 = vmatprep.mubr.msk.f32.mxu1 %vm674_vm0, %v8252_v59  ;;  %v8369_v58 = vld [vmem:[%s10354_s26 + $0x213] ss:$2 sm:$0xff]  ;;  %v8342_v59 = vld [vmem:[%s10354_s26 + $0x222] ss:$2 sm:$0xff] }
  0xa0   : > { %9426 = vmatmul.mubr.msk.f32.vlgmr.msra.gmra.mxu0 %vm674_vm0, %v8217_v61  ;;  %9458 = vmatmul.mubr.msk.f32.vlgmr.msra.gmra.mxu1 %vm674_vm0, %v8253_v62  ;;  %v8370_v61 = vld [vmem:[%s10354_s26 + $0x223] ss:$2 sm:$0xff] }
  0xa1   : > { %9482 = vmatpush3.msra.mxu0 %v10299_v0  ;;  %9428 = vmatprep.mubr.msk.f32.mxu0 %vm674_vm0, %v8218_v63  ;;  %v8221_v0 = vld [vmem:[%s10354_s26 + $0x153] ss:$2 sm:$0xff]  ;;  %v8429_v62 = vld [vmem:[%s12504_s21 + $0x48] sm:$0xff]  ;;  %v8343_v63 = vld [vmem:[%s10354_s26 + $0x232] ss:$2 sm:$0xff] }
  0xa2   : > { %9460 = vmatprep.mubr.msk.f32.mxu1 %vm674_vm0, %v8254_v8  ;;  %9483 = vmatprep.subr.mxu0 %v10309_v2  ;;  %v8371_v8 = vld [vmem:[%s10354_s26 + $0x233] ss:$2 sm:$0xff] }
  0xa3   : > { %9484 = vmatpush3.msra.mxu0 %v10309_v2  ;;  %9508 = vmatpush3.msra.mxu1 %v10304_v1  ;;  %v8223_v1 = vld [vmem:[%s10354_s26 + $0x173] ss:$2 sm:$0xff]  ;;  %v8259_v2 = vld [vmem:[%s10354_s26 + $0x174] ss:$2 sm:$0xff] }
  0xa4   : > { %9429 = vmatmul.mubr.msk.f32.gmra.mxu0 %vm674_vm0, %v8219_v10  ;;  %9461 = vmatmul.mubr.msk.f32.gmra.mxu1 %vm674_vm0, %v8255_v11  ;;  %v8344_v10 = vld [vmem:[%s10354_s26 + $0x242] ss:$2 sm:$0xff]  ;;  %v8372_v11 = vld [vmem:[%s10354_s26 + $0x243] ss:$2 sm:$0xff] }
  0xa5   : > { %9431 = vmatprep.mubr.msk.f32.mxu0 %vm674_vm0, %v8220_v13  ;;  %9463 = vmatprep.mubr.msk.f32.mxu1 %vm674_vm0, %v8256_v14  ;;  %v8345_v13 = vld [vmem:[%s10354_s26 + $0x252] ss:$2 sm:$0xff]  ;;  %v8373_v14 = vld [vmem:[%s10354_s26 + $0x253] ss:$2 sm:$0xff] }
  0xa6   : > { %9485 = vmatprep.subr.mxu0 %v10323_v4  ;;  %9509 = vmatprep.subr.mxu1 %v10316_v3 }
  0xa7   : > { %9486 = vmatpush3.msra.mxu0 %v10323_v4  ;;  %9510 = vmatpush3.msra.mxu1 %v10316_v3  ;;  %v8225_v3 = vld [vmem:[%s10354_s26 + $0x193] ss:$2 sm:$0xff]  ;;  %v8261_v4 = vld [vmem:[%s10354_s26 + $0x194] ss:$2 sm:$0xff] }
  0xa8   : > { %9432 = vmatmul.mubr.msk.f32.gmra.mxu0 %vm674_vm0, %v8221_v0  ;;  %9464 = vmatmul.mubr.msk.f32.gmra.mxu1 %vm674_vm0, %v8257_v17  ;;  %v8346_v0 = vld [vmem:[%s10354_s26 + $0x262] ss:$2 sm:$0xff] }
  0xa9   : > { %9434 = vmatprep.mubr.msk.f32.mxu0 %vm674_vm0, %v8222_v18  ;;  %9466 = vmatprep.mubr.msk.f32.mxu1 %vm674_vm0, %v8258_v19  ;;  %v8427_v19 = vld [vmem:[%s12504_s21 + $0x38] sm:$0xff] }
  0xaa   : > { %9487 = vmatprep.subr.mxu0 %v10339_v6  ;;  %9511 = vmatprep.subr.mxu1 %v10328_v5 }
  0xab   : > { %9488 = vmatpush3.msra.mxu0 %v10339_v6  ;;  %9512 = vmatpush3.msra.mxu1 %v10328_v5  ;;  %v8227_v5 = vld [vmem:[%s10354_s26 + $0x1b3] ss:$2 sm:$0xff]  ;;  %v8263_v6 = vld [vmem:[%s10354_s26 + $0x1b4] ss:$2 sm:$0xff] }
  0xac   : > { %9435 = vmatmul.mubr.msk.f32.gmra.mxu0 %vm674_vm0, %v8223_v1  ;;  %9467 = vmatmul.mubr.msk.f32.gmra.mxu1 %vm674_vm0, %v8259_v2  ;;  %v8347_v1 = vld [vmem:[%s10354_s26 + $0x272] ss:$2 sm:$0xff] }
  0xad   : > { %9437 = vmatprep.mubr.msk.f32.mxu0 %vm674_vm0, %v8224_v20  ;;  %9469 = vmatprep.mubr.msk.f32.mxu1 %vm674_vm0, %v8260_v23  ;;  %v8348_v23 = vld [vmem:[%s10354_s26 + $0x282] ss:$2 sm:$0xff] }
  0xae   : > { %9513 = vmatprep.subr.mxu1 %v10344_v7  ;;  %9533 = vmatprep.subr.mxu0 %v10367_v12 }
  0xaf   : > { %9514 = vmatpush3.msra.mxu1 %v10344_v7  ;;  %v8229_v7 = vld [vmem:[%s10354_s26 + $0x1d3] ss:$2 sm:$0xff] }
  0xb0   : > { %9438 = vmatmul.mubr.msk.f32.gmra.mxu0 %vm674_vm0, %v8225_v3  ;;  %9470 = vmatmul.mubr.msk.f32.gmra.mxu1 %vm674_vm0, %v8261_v4  ;;  %v8376_v3 = vld [vmem:[%s10354_s26 + $0x283] ss:$2 sm:$0xff] }
  0xb1   : > { %9440 = vmatprep.mubr.msk.f32.mxu0 %vm674_vm0, %v8226_v24  ;;  %9472 = vmatprep.mubr.msk.f32.mxu1 %vm674_vm0, %v8262_v25  ;;  %v8426_v25 = vld [vmem:[%s12504_s21 + $0x30] sm:$0xff] }
  0xb2   : > { %9559 = vmatprep.subr.mxu1 %v10383_v16 }
  0xb4   : > { %9441 = vmatmul.mubr.msk.f32.gmra.mxu0 %vm674_vm0, %v8227_v5  ;;  %9473 = vmatmul.mubr.msk.f32.gmra.mxu1 %vm674_vm0, %v8263_v6  ;;  %v8349_v5 = vld [vmem:[%s10354_s26 + $0x292] ss:$2 sm:$0xff] }
  0xb5   : > { %9443 = vmatprep.mubr.msk.f32.mxu0 %vm674_vm0, %v8228_v26  ;;  %9475 = vmatprep.mubr.msk.f32.mxu1 %vm674_vm0, %v8264_v29  ;;  %v8350_v29 = vld [vmem:[%s10354_s26 + $0x2a2] ss:$2 sm:$0xff] }
  0xb8   : > { %9444 = vmatmul.mubr.msk.f32.gmra.mxu0 %vm674_vm0, %v8229_v7  ;;  %9476 = vmatmul.mubr.msk.f32.gmra.mxu1 %vm674_vm0, %v8265_v30  ;;  %v8378_v7 = vld [vmem:[%s10354_s26 + $0x2a3] ss:$2 sm:$0xff] }
  0xb9   : > { %9446 = vmatprep.mubr.msk.f32.mxu0 %vm674_vm0, %v8230_v31  ;;  %9478 = vmatprep.mubr.msk.f32.mxu1 %vm674_vm0, %v8266_v32  ;;  %v8425_v32 = vld [vmem:[%s12504_s21 + $0x28] sm:$0xff] }
  0xbc   : > { %9447 = vmatmul.mubr.msk.f32.gmra.mxu0 %vm674_vm0, %v8231_v35  ;;  %9479 = vmatmul.mubr.msk.f32.gmra.mxu1 %vm674_vm0, %v8267_v36  ;;  %v8351_v35 = vld [vmem:[%s10354_s26 + $0x2b2] ss:$2 sm:$0xf]  ;;  %v8379_v36 = vld [vmem:[%s10354_s26 + $0x2b3] ss:$2 sm:$0xf] }
  0xbd   : > { %9489 = vmatprep.mubr.msk.f32.mxu0 %vm674_vm0, %v8300_v37  ;;  %9515 = vmatprep.mubr.msk.f32.mxu1 %vm674_vm0, %v8288_v38 }
  0xc0   : > { %9490 = vmatmul.mubr.msk.f32.vlgmr.msra.gmra.mxu0 %vm674_vm0, %v8301_v39  ;;  %9516 = vmatmul.mubr.msk.f32.vlgmr.msra.gmra.mxu1 %vm674_vm0, %v8289_v40  ;;  %v8396_v39 = vld [vmem:[%s10354_s26 + $0x204] ss:$2 sm:$0xff] }
  0xc1   : > { %9534 = vmatpush3.msra.mxu0 %v10367_v12  ;;  %9492 = vmatprep.mubr.msk.f32.mxu0 %vm674_vm0, %v8302_v41  ;;  %v8305_v12 = vld [vmem:[%s10354_s26 + $0x251] ss:$2 sm:$0xff] }
  0xc2   : > { %9518 = vmatprep.mubr.msk.f32.mxu1 %vm674_vm0, %v8290_v42  ;;  %9535 = vmatprep.subr.mxu0 %v10378_v15  ;;  %v8397_v42 = vld [vmem:[%s10354_s26 + $0x214] ss:$2 sm:$0xff] }
  0xc3   : > { %9536 = vmatpush3.msra.mxu0 %v10378_v15  ;;  %9560 = vmatpush3.msra.mxu1 %v10383_v16  ;;  %v8307_v15 = vld [vmem:[%s10354_s26 + $0x271] ss:$2 sm:$0xff]  ;;  %v8295_v16 = vld [vmem:[%s10354_s26 + $0x270] ss:$2 sm:$0xff] }
  0xc4   : > { %9493 = vmatmul.mubr.msk.f32.gmra.mxu0 %vm674_vm0, %v8303_v43  ;;  %9519 = vmatmul.mubr.msk.f32.gmra.mxu1 %vm674_vm0, %v8291_v44 }
  0xc5   : > { %9495 = vmatprep.mubr.msk.f32.mxu0 %vm674_vm0, %v8304_v45  ;;  %9521 = vmatprep.mubr.msk.f32.mxu1 %vm674_vm0, %v8292_v46  ;;  %v8398_v45 = vld [vmem:[%s10354_s26 + $0x224] ss:$2 sm:$0xff] }
  0xc6   : > { %9537 = vmatprep.subr.mxu0 %v10400_v21  ;;  %9561 = vmatprep.subr.mxu1 %v10405_v22  ;;  %v4338_v46 = vld [vmem:[%s12504_s21 + $0x20] sm:$0xff] }
  0xc7   : > { %9538 = vmatpush3.msra.mxu0 %v10400_v21  ;;  %9562 = vmatpush3.msra.mxu1 %v10405_v22  ;;  %v8309_v21 = vld [vmem:[%s10354_s26 + $0x291] ss:$2 sm:$0xff]  ;;  %v8297_v22 = vld [vmem:[%s10354_s26 + $0x290] ss:$2 sm:$0xff] }
  0xc8   : > { %9496 = vmatmul.mubr.msk.f32.gmra.mxu0 %vm674_vm0, %v8305_v12  ;;  %9522 = vmatmul.mubr.msk.f32.gmra.mxu1 %vm674_vm0, %v8293_v47 }
  0xc9   : > { %9498 = vmatprep.mubr.msk.f32.mxu0 %vm674_vm0, %v8306_v48  ;;  %9524 = vmatprep.mubr.msk.f32.mxu1 %vm674_vm0, %v8294_v49  ;;  %v4337_v48 = vld [vmem:[%s12504_s21 + $0x18] sm:$0xff] }
  0xca   : > { %9539 = vmatprep.subr.mxu0 %v10422_v27  ;;  %9563 = vmatprep.subr.mxu1 %v10427_v28  ;;  %v8399_v49 = vld [vmem:[%s10354_s26 + $0x234] ss:$2 sm:$0xff] }
  0xcb   : > { %9540 = vmatpush3.msra.mxu0 %v10422_v27  ;;  %9564 = vmatpush3.msra.mxu1 %v10427_v28  ;;  %v8311_v27 = vld [vmem:[%s10354_s26 + $0x2b1] ss:$2 sm:$0xf]  ;;  %v8299_v28 = vld [vmem:[%s10354_s26 + $0x2b0] ss:$2 sm:$0xf] }
  0xcc   : > { %9499 = vmatmul.mubr.msk.f32.gmra.mxu0 %vm674_vm0, %v8307_v15  ;;  %9525 = vmatmul.mubr.msk.f32.gmra.mxu1 %vm674_vm0, %v8295_v16 }
  0xcd   : > { %9501 = vmatprep.mubr.msk.f32.mxu0 %vm674_vm0, %v8308_v50  ;;  %9527 = vmatprep.mubr.msk.f32.mxu1 %vm674_vm0, %v8296_v51  ;;  %v8400_v50 = vld [vmem:[%s10354_s26 + $0x244] ss:$2 sm:$0xff] }
  0xce   : > { %9565 = vmatprep.subr.mxu1 %v10444_v33  ;;  %9585 = vmatprep.subr.mxu0 %v10449_v34  ;;  %v4336_v51 = vld [vmem:[%s12504_s21 + $0x10] sm:$0xff] }
  0xcf   : > { %9566 = vmatpush3.msra.mxu1 %v10444_v33  ;;  %v8341_v33 = vld [vmem:[%s10354_s26 + $0x212] ss:$2 sm:$0xff] }
  0xd0   : > { %9502 = vmatmul.mubr.msk.f32.gmra.mxu0 %vm674_vm0, %v8309_v21  ;;  %9528 = vmatmul.mubr.msk.f32.gmra.mxu1 %vm674_vm0, %v8297_v22 }
  0xd1   : > { %9504 = vmatprep.mubr.msk.f32.mxu0 %vm674_vm0, %v8310_v52  ;;  %9530 = vmatprep.mubr.msk.f32.mxu1 %vm674_vm0, %v8298_v53  ;;  %v4335_v52 = vld [vmem:[%s12504_s21 + $0x8] sm:$0xff]  ;;  %v8401_v53 = vld [vmem:[%s10354_s26 + $0x254] ss:$2 sm:$0xff] }
  0xd2   : > { %9611 = vmatprep.subr.mxu1 %v12496_v57 }
  0xd4   : > { %9505 = vmatmul.mubr.msk.f32.gmra.mxu0 %vm674_vm0, %v8311_v27  ;;  %9531 = vmatmul.mubr.msk.f32.gmra.mxu1 %vm674_vm0, %v8299_v28 }
  0xd5   : > { %9541 = vmatprep.mubr.msk.f32.mxu0 %vm674_vm0, %v8340_v54  ;;  %9567 = vmatprep.mubr.msk.f32.mxu1 %vm674_vm0, %v8368_v56  ;;  %v8402_v54 = vld [vmem:[%s10354_s26 + $0x264] ss:$2 sm:$0xff] }
  0xd6   : > { %v4334_v56 = vld [vmem:[%s12504_s21] sm:$0xff] }
  0xd8   : > { %9542 = vmatmul.mubr.msk.f32.vlgmr.msra.gmra.mxu0 %vm674_vm0, %v8341_v33  ;;  %9568 = vmatmul.mubr.msk.f32.vlgmr.msra.gmra.mxu1 %vm674_vm0, %v8369_v58 }
  0xd9   : > { %9586 = vmatpush3.msra.mxu0 %v10449_v34  ;;  %9544 = vmatprep.mubr.msk.f32.mxu0 %vm674_vm0, %v8342_v59  ;;  %v8428_v34 = vld [vmem:[%s12504_s21 + $0x40] sm:$0xff] }
  0xda   : > { %9570 = vmatprep.mubr.msk.f32.mxu1 %vm674_vm0, %v8370_v61  ;;  %9587 = vmatprep.subr.mxu0 %v10498_v55  ;;  %v8403_v59 = vld [vmem:[%s10354_s26 + $0x274] ss:$2 sm:$0xff] }
  0xdb   : > { %9588 = vmatpush3.msra.mxu0 %v10498_v55  ;;  %9612 = vmatpush3.msra.mxu1 %v8429_v62  ;;  %v8374_v55 = vld [vmem:[%s10354_s26 + $0x263] ss:$2 sm:$0xff] }
  0xdc   : > { %9545 = vmatmul.mubr.msk.f32.gmra.mxu0 %vm674_vm0, %v8343_v63  ;;  %9571 = vmatmul.mubr.msk.f32.gmra.mxu1 %vm674_vm0, %v8371_v8  ;;  %v8404_v63 = vld [vmem:[%s10354_s26 + $0x284] ss:$2 sm:$0xff] }
  0xdd   : > { %9547 = vmatprep.mubr.msk.f32.mxu0 %vm674_vm0, %v8344_v10  ;;  %9573 = vmatprep.mubr.msk.f32.mxu1 %vm674_vm0, %v8372_v11  ;;  %v8405_v11 = vld [vmem:[%s10354_s26 + $0x294] ss:$2 sm:$0xff] }
  0xde   : > { %9589 = vmatprep.subr.mxu0 %v10514_v60  ;;  %9613 = vmatprep.subr.mxu1 %v12496_v57 }
  0xdf   : > { %9590 = vmatpush3.msra.mxu0 %v10514_v60  ;;  %9614 = vmatpush3.msra.mxu1 %v8428_v34  ;;  %v10922_v17 = vpop.f32.mrf.mxu0  ;;  %v8375_v60 = vld [vmem:[%s10354_s26 + $0x273] ss:$2 sm:$0xff] }
  0xe0   : > { %v10924_v18 = vpop.f32.mrf.mxu1  ;;  %9548 = vmatmul.mubr.msk.f32.gmra.mxu0 %vm674_vm0, %v8345_v13  ;;  %9574 = vmatmul.mubr.msk.f32.gmra.mxu1 %vm674_vm0, %v8373_v14  ;;  %v8406_v14 = vld [vmem:[%s10354_s26 + $0x2a4] ss:$2 sm:$0xff] }
  0xe1   : > { %9550 = vmatprep.mubr.msk.f32.mxu0 %vm674_vm0, %v8346_v0  ;;  %9576 = vmatprep.mubr.msk.f32.mxu1 %vm674_vm0, %v8374_v55  ;;  %v10935_v2 = vpop.f32.mrf.mxu0 }
  0xe2   : > { %v10937_v20 = vpop.f32.mrf.mxu1  ;;  %9591 = vmatprep.subr.mxu0 %v10531_v9  ;;  %9615 = vmatprep.subr.mxu1 %v12496_v57 }
  0xe3   : > { %9592 = vmatpush3.msra.mxu0 %v10531_v9  ;;  %9616 = vmatpush3.msra.mxu1 %v8427_v19  ;;  %v10944_v4 = vpop.f32.mrf.mxu0  ;;  %v8377_v9 = vld [vmem:[%s10354_s26 + $0x293] ss:$2 sm:$0xff]  ;;  %v8407_v19 = vld [vmem:[%s10354_s26 + $0x2b4] ss:$2 sm:$0xf] }
  0xe4   : > { %v10946_v24 = vpop.f32.mrf.mxu1  ;;  %9551 = vmatmul.mubr.msk.f32.gmra.mxu0 %vm674_vm0, %v8347_v1  ;;  %9577 = vmatmul.mubr.msk.f32.gmra.mxu1 %vm674_vm0, %v8375_v60 }
  0xe5   : > { %9553 = vmatprep.mubr.msk.f32.mxu0 %vm674_vm0, %v8348_v23  ;;  %9579 = vmatprep.mubr.msk.f32.mxu1 %vm674_vm0, %v8376_v3  ;;  %v10957_v6 = vpop.f32.mrf.mxu0 }
  0xe6   : > { %v10959_v26 = vpop.f32.mrf.mxu1  ;;  %9654 = vmatprep.subr.mxu0 %v12496_v57  ;;  %9617 = vmatprep.subr.mxu1 %v12496_v57 }
  0xe7   : > { %9618 = vmatpush3.msra.mxu1 %v8426_v25  ;;  %v10965_v30 = vpop.f32.mrf.mxu0 }
  0xe8   : > { %v10967_v31 = vpop.f32.mrf.mxu1  ;;  %9554 = vmatmul.mubr.msk.f32.gmra.mxu0 %vm674_vm0, %v8349_v5  ;;  %9580 = vmatmul.mubr.msk.f32.gmra.mxu1 %vm674_vm0, %v8377_v9 }
  0xe9   : > { %9556 = vmatprep.mubr.msk.f32.mxu0 %vm674_vm0, %v8350_v29  ;;  %9582 = vmatprep.mubr.msk.f32.mxu1 %vm674_vm0, %v8378_v7  ;;  %v10978_v37 = vpop.f32.mrf.mxu0 }
  0xea   : > { %v10980_v38 = vpop.f32.mrf.mxu1  ;;  %9619 = vmatprep.subr.mxu1 %v12496_v57 }
  0xeb   : > { %9620 = vmatpush3.msra.mxu1 %v8425_v32  ;;  %v10984_v40 = vpop.f32.mrf.mxu0 }
  0xec   : > { %v10986_v41 = vpop.f32.mrf.mxu1  ;;  %9557 = vmatmul.mubr.msk.f32.gmra.mxu0 %vm674_vm0, %v8351_v35  ;;  %9583 = vmatmul.mubr.msk.f32.gmra.mxu1 %vm674_vm0, %v8379_v36 }
  0xed   : > { %9593 = vmatprep.mubr.msk.f32.mxu0 %vm674_vm0, %v8396_v39  ;;  %9621 = vmatprep.mubr.msk.f32.mxu1 %vm10183_vm1, %v12496_v57  ;;  %v10994_v43 = vpop.f32.mrf.mxu0 }
  0xee   : > { %v10996_v44 = vpop.f32.mrf.mxu1  ;;  %9697 = vmatprep.subr.mxu1 %v12496_v57 }
  0xef   : > { %v11003_v12 = vpop.f32.mrf.mxu0 }
  0xf0   : > { %v11005_v47 = vpop.f32.mrf.mxu1  ;;  %9594 = vmatmul.mubr.msk.f32.vlgmr.msra.gmra.mxu0 %vm674_vm0, %v8397_v42 }
  0xf1   : > { %9596 = vmatprep.mubr.msk.f32.mxu0 %vm674_vm0, %v8398_v45  ;;  %9655 = vmatpush3.msra.mxu0 %v4338_v46  ;;  %v11013_v15 = vpop.f32.mrf.mxu0 }
  0xf2   : > { %v11015_v16 = vpop.f32.mrf.mxu1  ;;  %9656 = vmatprep.subr.mxu0 %v12496_v57 }
  0xf3   : > { %9657 = vmatpush3.msra.mxu0 %v4337_v48  ;;  %v11022_v21 = vpop.f32.mrf.mxu0 }
  0xf4   : > { %v11024_v22 = vpop.f32.mrf.mxu1  ;;  %9597 = vmatmul.mubr.msk.f32.gmra.mxu0 %vm674_vm0, %v8399_v49  ;;  %9658 = vmatprep.subr.mxu0 %v12496_v57 }
  0xf5   : > { %9599 = vmatprep.mubr.msk.f32.mxu0 %vm674_vm0, %v8400_v50  ;;  %9659 = vmatpush3.msra.mxu0 %v4336_v51  ;;  %v11033_v27 = vpop.f32.mrf.mxu0 }
  0xf6   : > { %v11035_v28 = vpop.f32.mrf.mxu1  ;;  %9660 = vmatprep.subr.mxu0 %v12496_v57 }
  0xf7   : > { %9661 = vmatpush3.msra.mxu0 %v4335_v52  ;;  %v11042_v33 = vpop.f32.mrf.mxu0 }
  0xf8   : > { %v11044_v58 = vpop.f32.mrf.mxu1  ;;  %9600 = vmatmul.mubr.msk.f32.gmra.mxu0 %vm674_vm0, %v8401_v53  ;;  %9662 = vmatprep.subr.mxu0 %v12496_v57 }
  0xf9   : > { %9602 = vmatprep.mubr.msk.f32.mxu0 %vm674_vm0, %v8402_v54  ;;  %9663 = vmatpush3.msra.mxu0 %v4334_v56  ;;  %v11050_v61 = vpop.f32.mrf.mxu0 }
  0xfa   : > { %v11052_v62 = vpop.f32.mrf.mxu1  ;;  %9740 = vmatprep.subr.mxu0 %v12496_v57 }
  0xfb   : > { %v11056_v8 = vpop.f32.mrf.mxu0 }
  0xfc   : > { %v11058_v10 = vpop.f32.mrf.mxu1  ;;  %9603 = vmatmul.mubr.msk.f32.gmra.mxu0 %vm674_vm0, %v8403_v59  ;;  %v988_v59 = vadd.f32 %v10924_v18, %v10922_v17  ;;  %v993_v17 = vadd.f32 %v10959_v26, %v10957_v6 }
  0xfd   : > { %9605 = vmatprep.mubr.msk.f32.mxu0 %vm674_vm0, %v8404_v63  ;;  %v11063_v34 = vpop.f32.mrf.mxu0 }
  0xfe   : > { %12505 = vst [vmem:[#allocation13_spill] sm:$0xff] %v11063_v34  ;;  %v11065_v13 = vpop.f32.mrf.mxu1  ;;  %v998_v34 = vadd.f32 %v10946_v24, %v10944_v4  ;;  %v1008_v4 = vadd.f32 %v10967_v31, %v10965_v30 }
  0xff   : > { %12506 = vst [vmem:[#allocation14_spill] sm:$0xff] %v11065_v13  ;;  %v9235_v0 = vpop.f32.mrf.mxu0 }
 0x100   : > { %v9267_v55 = vpop.f32.mrf.mxu1  ;;  %9606 = vmatmul.mubr.msk.f32.gmra.mxu0 %vm674_vm0, %v8405_v11 }
 0x101   : > { %9608 = vmatprep.mubr.msk.f32.mxu0 %vm674_vm0, %v8406_v14  ;;  %v1212_v1 = vpop.f32.mrf.mxu0  ;;  %v983_v14 = vadd.f32 %v10937_v20, %v10935_v2  ;;  %v11121_v2 = vld [vmem:[%s12478_s5] ss:$0 sm:$0xff] }
 0x102   : > { %v1458_v60 = vpop.f32.mrf.mxu1 }
 0x104   : > { %v9238_v23 = vpop.f32.mrf.mxu0  ;;  %v9270_v3 = vpop.f32.mrf.mxu1  ;;  %9609 = vmatmul.mubr.msk.f32.gmra.mxu0 %vm674_vm0, %v8407_v19  ;;  %v1292_v19 = vadd.f32 %v9235_v0, %v988_v59 }
 0x105   : > { %9664 = vmatprep.mubr.msk.f32.mxu0 %vm10183_vm1, %v12496_v57 }
 0x106   : > { %v1222_v25 = vpop.f32.mrf.mxu0  ;;  %v1468_v5 = vpop.f32.mrf.mxu1  ;;  %v1538_v18 = vadd.f32 %v9267_v55, %v1292_v19 }
 0x108   : > { %v9241_v9 = vpop.f32.mrf.mxu0  ;;  %v9273_v29 = vpop.f32.mrf.mxu1 }
 0x109   : > { %v1296_v55 = vadd.f32 %v9241_v9, %v1008_v4 }
 0x10a   : > { %v1232_v7 = vpop.f32.mrf.mxu0  ;;  %v1478_v32 = vpop.f32.mrf.mxu1 }
 0x10c   : > { %v9244_v35 = vpop.f32.mrf.mxu0  ;;  %v11074_v36 = vpop.f32.mrf.mxu1 }
 0x10e   : > { %v1242_v39 = vpop.f32.mrf.mxu0  ;;  %v11076_v42 = vpop.f32.mrf.mxu1 }
 0x110   : > { %v11078_v45 = vpop.f32.mrf.mxu0  ;;  %v11080_v46 = vpop.f32.mrf.mxu1 }
 0x112   : > { %v11082_v48 = vpop.f32.mrf.mxu0  ;;  %v11084_v49 = vpop.f32.mrf.mxu1 }
 0x114   : > { %v11086_v50 = vpop.f32.mrf.mxu0  ;;  %v11088_v51 = vpop.f32.mrf.mxu1 }
 0x115   : > { %12507 = vst [vmem:[#allocation15_spill] sm:$0xff] %v11088_v51 }
 0x116   : > { %v11090_v52 = vpop.f32.mrf.mxu0  ;;  %v11092_v53 = vpop.f32.mrf.mxu1 }
 0x117   : > { %12508 = vst [vmem:[#allocation16_spill] sm:$0xff] %v11092_v53  ;;  %v1291_v53 = vadd.f32 %v1212_v1, %v983_v14  ;;  %v1293_v1 = vadd.f32 %v1222_v25, %v993_v17  ;;  %v1003_v14 = vadd.f32 %v10980_v38, %v10978_v37  ;;  %v1542_v17 = vadd.f32 %v9273_v29, %v1296_v55 }
 0x118   : > { %v11094_v54 = vpop.f32.mrf.mxu0  ;;  %v11096_v56 = vpop.f32.mrf.mxu1  ;;  %v1033_v55 = vadd.f32 %v11035_v28, %v11033_v27 }
 0x119   : > { %12509 = vst [vmem:[#allocation17_spill] sm:$0xff] %v11096_v56  ;;  %v1537_v24 = vadd.f32 %v1458_v60, %v1291_v53  ;;  %v1539_v60 = vadd.f32 %v1468_v5, %v1293_v1  ;;  %v1028_v5 = vadd.f32 %v11005_v47, %v11003_v12 }
 0x11a   : > { %v11100_v63 = vpop.f32.mrf.mxu0  ;;  %v11102_v11 = vpop.f32.mrf.mxu1 }
 0x11b   : > { %12510 = vst [vmem:[#allocation18_spill] sm:$0xff] %v11102_v11  ;;  %v1294_v11 = vadd.f32 %v9238_v23, %v998_v34  ;;  %v1300_v12 = vadd.f32 %v11078_v45, %v1028_v5  ;;  %v1038_v45 = vadd.f32 %v11024_v22, %v11022_v21 }
 0x11c   : > { %v11106_v57 = vpop.f32.mrf.mxu0  ;;  %v11108_v13 = vpop.f32.mrf.mxu1  ;;  %v12513_v5 = vld [vmem:[#allocation15_spill] sm:$0xff] }
 0x11d   : > { %v1540_v34 = vadd.f32 %v9270_v3, %v1294_v11  ;;  %v1013_v3 = vadd.f32 %v10996_v44, %v10994_v43  ;;  %v1302_v21 = vadd.f32 %v11086_v50, %v1038_v45 }
 0x11e   : > { %v11112_v56 = vpop.f32.mrf.mxu0  ;;  %v11114_v51 = vpop.f32.mrf.mxu1 }
 0x11f   : > { %12511 = vst [vmem:[#allocation19_spill] sm:$0xff] %v11114_v51  ;;  %v1295_v51 = vadd.f32 %v1232_v7, %v1003_v14 }
 0x120   : > { %v9299_v20 = vpop.f32.mrf.mxu0  ;;  %v11123_v0 = vpop.f32.mrf.mxu1 }
 0x121   : > { %12512 = vst [vmem:[#allocation20_spill] sm:$0xff] %v11123_v0  ;;  %v1784_v59 = vadd.f32 %v9299_v20, %v1538_v18  ;;  %v1018_v0 = vadd.f32 %v10986_v41, %v10984_v40  ;;  %v1541_v18 = vadd.f32 %v1478_v32, %v1295_v51 }
 0x122   : > { %v1704_v6 = vpop.f32.mrf.mxu0  ;;  %v11129_v26 = vpop.f32.mrf.mxu1 }
 0x123   : > { %v1806_v23 = vadd.f32 %v11121_v2, %v1784_v59  ;;  %v1783_v19 = vadd.f32 %v1704_v6, %v1537_v24  ;;  %v1298_v9 = vadd.f32 %v9244_v35, %v1018_v0  ;;  %v1297_v24 = vadd.f32 %v1242_v39, %v1013_v3 }
 0x124   : > { %v9302_v30 = vpop.f32.mrf.mxu0  ;;  %v11134_v31 = vpop.f32.mrf.mxu1  ;;  %v1023_v35 = vadd.f32 %v11015_v16, %v11013_v15 }
 0x125   : > { %v1822_v25 = vmax.f32 %v1806_v23, 0.0  ;;  %v1805_v37 = vadd.f32 %v11121_v2, %v1783_v19  ;;  %v1786_v38 = vadd.f32 %v9302_v30, %v1540_v34  ;;  %v1544_v0 = vadd.f32 %v11074_v36, %v1298_v9 }
 0x126   : > { %v1714_v53 = vpop.f32.mrf.mxu0  ;;  %v11139_v11 = vpop.f32.mrf.mxu1  ;;  %v1299_v51 = vadd.f32 %v11082_v48, %v1023_v35  ;;  %v1543_v15 = vadd.f32 %v11076_v42, %v1297_v24  ;;  %v1546_v48 = vadd.f32 %v11080_v46, %v1300_v12  ;;  %v1301_v46 = vadd.f32 %v11090_v52, %v1033_v55  ;;  %v12515_v12 = vld [vmem:[#allocation13_spill] sm:$0xff] }
 0x127   : > { %1839 = vst.msk [vmem:[#allocation2 + $0x8] sm:$0xff] %vm1837_vm2, %v1822_v25  ;;  %v1821_v40 = vmax.f32 %v1805_v37, 0.0  ;;  %v1808_v41 = vadd.f32 %v11121_v2, %v1786_v38  ;;  %v1785_v7 = vadd.f32 %v1714_v53, %v1539_v60  ;;  %v1048_v25 = vadd.f32 %v11044_v58, %v11042_v33 }
 0x128   : > { %v9305_v20 = vpop.f32.mrf.mxu0  ;;  %v11145_v4 = vpop.f32.mrf.mxu1  ;;  %v1545_v37 = vadd.f32 %v11084_v49, %v1299_v51  ;;  %v1043_v33 = vadd.f32 %v11052_v62, %v11050_v61 }
 0x129   : > { %1838 = vst.msk [vmem:[#allocation2] sm:$0xff] %vm1837_vm2, %v1821_v40  ;;  %v1824_v43 = vmax.f32 %v1808_v41, 0.0  ;;  %v1807_v44 = vadd.f32 %v11121_v2, %v1785_v7  ;;  %v1788_v29 = vadd.f32 %v9305_v20, %v1542_v17  ;;  %v1304_v58 = vadd.f32 %v11094_v54, %v1048_v25 }
 0x12a   : > { %v1724_v1 = vpop.f32.mrf.mxu0  ;;  %v11152_v59 = vpop.f32.mrf.mxu1  ;;  %v1058_v7 = vadd.f32 %v11058_v10, %v11056_v8  ;;  %v1303_v20 = vadd.f32 %v11100_v63, %v1043_v33  ;;  %v12516_v8 = vld [vmem:[#allocation14_spill] sm:$0xff] }
 0x12b   : > { %1841 = vst.msk [vmem:[#allocation2 + $0x18] sm:$0xff] %vm1837_vm2, %v1824_v43  ;;  %v1823_v47 = vmax.f32 %v1807_v44, 0.0  ;;  %v1810_v32 = vadd.f32 %v11121_v2, %v1788_v29  ;;  %v1787_v39 = vadd.f32 %v1724_v1, %v1541_v18  ;;  %v1548_v18 = vadd.f32 %v12513_v5, %v1302_v21  ;;  %v12514_v44 = vld [vmem:[#allocation16_spill] sm:$0xff] }
 0x12c   : > { %v9308_v14 = vpop.f32.mrf.mxu0  ;;  %v11158_v6 = vpop.f32.mrf.mxu1  ;;  %v1547_v29 = vadd.f32 %v12514_v44, %v1301_v46  ;;  %v1053_v10 = vadd.f32 %v12516_v8, %v12515_v12 }
 0x12d   : > { %1840 = vst.msk [vmem:[#allocation2 + $0x10] sm:$0xff] %vm1837_vm2, %v1823_v47  ;;  %v1826_v16 = vmax.f32 %v1810_v32, 0.0  ;;  %v1809_v36 = vadd.f32 %v11121_v2, %v1787_v39  ;;  %v1790_v34 = vadd.f32 %v9308_v14, %v1544_v0  ;;  %v12517_v47 = vld [vmem:[#allocation17_spill] sm:$0xff]  ;;  %v1306_v14 = vadd.f32 %v11106_v57, %v1058_v7 }
 0x12e   : > { %v1734_v23 = vpop.f32.mrf.mxu0  ;;  %v11167_v19 = vpop.f32.mrf.mxu1  ;;  %v1550_v32 = vadd.f32 %v12517_v47, %v1304_v58 }
 0x12f   : > { %1843 = vst.msk [vmem:[#allocation2 + $0x28] sm:$0xff] %vm1837_vm2, %v1826_v16  ;;  %v1825_v42 = vmax.f32 %v1809_v36, 0.0  ;;  %v1812_v30 = vadd.f32 %v11121_v2, %v1790_v34  ;;  %v1789_v60 = vadd.f32 %v1734_v23, %v1543_v15  ;;  %v12518_v34 = vld [vmem:[#allocation18_spill] sm:$0xff]  ;;  %v1552_v46 = vadd.f32 %v11108_v13, %v1306_v14 }
 0x130   : > { %v4113_v22 = vld [vmem:[#allocation2] ss:$2 sm:$0xff]  ;;  %v4145_v27 = vld [vmem:[#allocation2 + $0x1] ss:$2 sm:$0xff]  ;;  %v9311_v28 = vpop.f32.mrf.mxu0  ;;  %v11176_v38 = vpop.f32.mrf.mxu1  ;;  %v1549_v45 = vadd.f32 %v12518_v34, %v1303_v20 }
 0x131   : > { %1842 = vst.msk [vmem:[#allocation2 + $0x20] sm:$0xff] %vm1837_vm2, %v1825_v42  ;;  %v1828_v3 = vmax.f32 %v1812_v30, 0.0  ;;  %v1811_v9 = vadd.f32 %v11121_v2, %v1789_v60  ;;  %v1792_v53 = vadd.f32 %v9311_v28, %v1546_v48  ;;  %v4176_v17 = vmax.f32 %v4113_v22, %v4145_v27 }
 0x132   : > { %v1744_v49 = vpop.f32.mrf.mxu0  ;;  %v11184_v50 = vpop.f32.mrf.mxu1  ;;  %v1305_v30 = vadd.f32 %v11112_v56, %v1053_v10 }
 0x133   : > { %1845 = vst.msk [vmem:[#allocation2 + $0x38] sm:$0xff] %vm1837_vm2, %v1828_v3  ;;  %v1827_v40 = vmax.f32 %v1811_v9, 0.0  ;;  %v1814_v52 = vadd.f32 %v11121_v2, %v1792_v53  ;;  %v1791_v41 = vadd.f32 %v1744_v49, %v1545_v37 }
 0x134   : > { %v4115_v61 = vld [vmem:[#allocation2 + $0x10] ss:$2 sm:$0xff]  ;;  %v4147_v62 = vld [vmem:[#allocation2 + $0x11] ss:$2 sm:$0xff]  ;;  %v9314_v24 = vpop.f32.mrf.mxu0  ;;  %v11192_v43 = vpop.f32.mrf.mxu1 }
 0x135   : > { %v4193_v54 = vld [vmem:[#allocation2 + $0x2] ss:$2 sm:$0xff]  ;;  %1844 = vst.msk [vmem:[#allocation2 + $0x30] sm:$0xff] %vm1837_vm2, %v1827_v40  ;;  %v1830_v0 = vmax.f32 %v1814_v52, 0.0  ;;  %v1813_v1 = vadd.f32 %v11121_v2, %v1791_v41  ;;  %v1794_v63 = vadd.f32 %v9314_v24, %v1548_v18  ;;  %v4177_v15 = vmax.f32 %v4115_v61, %v4147_v62 }
 0x136   : > { %v4224_v35 = vmax.f32 %v4176_v17, %v4193_v54  ;;  %v1754_v39 = vpop.f32.mrf.mxu0  ;;  %v11200_v51 = vpop.f32.mrf.mxu1  ;;  %v12519_v17 = vld [vmem:[#allocation19_spill] sm:$0xff] }
 0x137   : > { %1847 = vst.msk [vmem:[#allocation2 + $0x48] sm:$0xff] %vm1837_vm2, %v1830_v0  ;;  %v1829_v16 = vmax.f32 %v1813_v1, 0.0  ;;  %v1793_v36 = vadd.f32 %v1754_v39, %v1547_v29  ;;  %v1816_v23 = vadd.f32 %v11121_v2, %v1794_v63  ;;  %v1551_v40 = vadd.f32 %v12519_v17, %v1305_v30 }
 0x138   : > { %4240 = vst.msk [vmem:[#allocation6] sm:$0xff] %vm1837_vm2, %v4224_v35  ;;  %v4195_v55 = vld [vmem:[#allocation2 + $0x12] ss:$2 sm:$0xff]  ;;  %v9317_v48 = vpop.f32.mrf.mxu0  ;;  %v11207_v42 = vpop.f32.mrf.mxu1  ;;  %v4149_v25 = vld [vmem:[#allocation2 + $0x21] ss:$2 sm:$0xff] }
 0x139   : > { %v4117_v60 = vld [vmem:[#allocation2 + $0x20] ss:$2 sm:$0xff]  ;;  %v4225_v57 = vmax.f32 %v4177_v15, %v4195_v55  ;;  %1846 = vst.msk [vmem:[#allocation2 + $0x40] sm:$0xff] %vm1837_vm2, %v1829_v16  ;;  %v1815_v37 = vadd.f32 %v11121_v2, %v1793_v36  ;;  %v1796_v21 = vadd.f32 %v9317_v48, %v1550_v32  ;;  %v1832_v22 = vmax.f32 %v1816_v23, 0.0 }
 0x13a   : > { %v1764_v27 = vpop.f32.mrf.mxu0  ;;  %v11212_v28 = vpop.f32.mrf.mxu1  ;;  %v4178_v53 = vmax.f32 %v4117_v60, %v4149_v25  ;;  %v12520_v48 = vmov 0.0  }
 0x13b   : > { %4241 = vst.msk [vmem:[#allocation6 + $0x8] sm:$0xff] %vm1837_vm2, %v4225_v57  ;;  %v1831_v3 = vmax.f32 %v1815_v37, 0.0  ;;  %v1818_v9 = vadd.f32 %v11121_v2, %v1796_v21  ;;  %v1795_v56 = vadd.f32 %v1764_v27, %v1549_v45  ;;  %1849 = vst.msk [vmem:[#allocation2 + $0x58] sm:$0xff] %vm1837_vm2, %v1832_v22 }
 0x13c   : > { %v4197_v33 = vld [vmem:[#allocation2 + $0x22] ss:$2 sm:$0xff]  ;;  %v9320_v58 = vpop.f32.mrf.mxu0  ;;  %v11218_v49 = vpop.f32.mrf.mxu1  ;;  %v4151_v41 = vld [vmem:[#allocation2 + $0x31] ss:$2 sm:$0xff] }
 0x13d   : > { %v4119_v52 = vld [vmem:[#allocation2 + $0x30] ss:$2 sm:$0xff]  ;;  %1848 = vst.msk [vmem:[#allocation2 + $0x50] sm:$0xff] %vm1837_vm2, %v1831_v3  ;;  %v1834_v13 = vmax.f32 %v1818_v9, 0.0  ;;  %v1817_v7 = vadd.f32 %v11121_v2, %v1795_v56  ;;  %v1798_v5 = vadd.f32 %v9320_v58, %v1552_v46  ;;  %v4226_v61 = vmax.f32 %v4178_v53, %v4197_v33 }
 0x13e   : > { %v1774_v18 = vpop.f32.mrf.mxu0  ;;  %v11223_v20 = vpop.f32.mrf.mxu1  ;;  %v4179_v44 = vmax.f32 %v4119_v52, %v4151_v41  ;;  %v8456_v58 = vld [vmem:[%s12504_s21 + $0x70] sm:$0xff] }
 0x13f   : > { %1851 = vst.msk [vmem:[#allocation2 + $0x68] sm:$0xff] %vm1837_vm2, %v1834_v13  ;;  %v1833_v62 = vmax.f32 %v1817_v7, 0.0  ;;  %v1820_v54 = vadd.f32 %v11121_v2, %v1798_v5  ;;  %v1797_v24 = vadd.f32 %v1774_v18, %v1551_v40  ;;  %4242 = vst.msk [vmem:[#allocation6 + $0x10] sm:$0xff] %vm1837_vm2, %v4226_v61 }
 0x140   : > { %v4121_v29 = vld [vmem:[#allocation2 + $0x40] ss:$2 sm:$0xff]  ;;  %v4153_v35 = vld [vmem:[#allocation2 + $0x41] ss:$2 sm:$0xff]  ;;  %v11227_v1 = vpop.f32.mrf.mxu0  ;;  %v11229_v12 = vpop.f32.mrf.mxu1 }
 0x141   : > { %v4199_v0 = vld [vmem:[#allocation2 + $0x32] ss:$2 sm:$0xff]  ;;  %1850 = vst.msk [vmem:[#allocation2 + $0x60] sm:$0xff] %vm1837_vm2, %v1833_v62  ;;  %v1836_v8 = vmax.f32 %v1820_v54, 0.0  ;;  %v1819_v10 = vadd.f32 %v11121_v2, %v1797_v24  ;;  %v4180_v15 = vmax.f32 %v4121_v29, %v4153_v35  ;;  %v8455_v29 = vld [vmem:[%s12504_s21 + $0x68] sm:$0xff] }
 0x142   : > { %v11234_v47 = vpop.f32.mrf.mxu0  ;;  %v11236_v32 = vpop.f32.mrf.mxu1  ;;  %v4340_v63 = vld [vmem:[#allocation6 + $0x1] ss:$2 sm:$0xff]  ;;  %v4313_v39 = vld [vmem:[#allocation6] ss:$2 sm:$0xff]  ;;  %v4227_v14 = vmax.f32 %v4179_v44, %v4199_v0 }
 0x143   : > { %1853 = vst.msk [vmem:[#allocation2 + $0x78] sm:$0xff] %vm1837_vm2, %v1836_v8  ;;  %v1835_v16 = vmax.f32 %v1819_v10, 0.0  ;;  %9622 = vmatmul.mubr.msk.f32.vlgmr.msra.gmra.mxu1 %vm1837_vm2, %v4340_v63  ;;  %9665 = vmatmul.mubr.msk.f32.vlgmr.msra.gmra.mxu0 %vm1837_vm2, %v4313_v39 }
 0x144   : > { %v4123_v36 = vld [vmem:[#allocation2 + $0x50] ss:$2 sm:$0xff]  ;;  %v4155_v34 = vld [vmem:[#allocation2 + $0x51] ss:$2 sm:$0xff]  ;;  %v11241_v55 = vpop.f32.mrf.mxu0  ;;  %v11243_v23 = vpop.f32.mrf.mxu1  ;;  %9624 = vmatprep.mubr.msk.f32.mxu1 %vm10183_vm1, %v12520_v48  ;;  %9667 = vmatprep.mubr.msk.f32.mxu0 %vm10183_vm1, %v12520_v48  ;;  %4243 = vst.msk [vmem:[#allocation6 + $0x18] sm:$0xff] %vm1837_vm2, %v4227_v14  ;;  %v8454_v14 = vld [vmem:[%s12504_s21 + $0x60] sm:$0xff] }
 0x145   : > { %v4201_v45 = vld [vmem:[#allocation2 + $0x42] ss:$2 sm:$0xff]  ;;  %1852 = vst.msk [vmem:[#allocation2 + $0x70] sm:$0xff] %vm1837_vm2, %v1835_v16  ;;  %v4181_v57 = vmax.f32 %v4123_v36, %v4155_v34  ;;  %9698 = vmatpush3.msra.mxu1 %v8456_v58 }
 0x146   : > { %v4228_v30 = vmax.f32 %v4180_v15, %v4201_v45  ;;  %v11251_v60 = vpop.f32.mrf.mxu0  ;;  %v11253_v25 = vpop.f32.mrf.mxu1  ;;  %9699 = vmatprep.subr.mxu1 %v12520_v48  ;;  %v8453_v15 = vld [vmem:[%s12504_s21 + $0x58] sm:$0xff]  ;;  %v12521_v34 = vld [vmem:[#allocation20_spill] sm:$0xff] }
 0x147   : > { %9700 = vmatpush3.msra.mxu1 %v8455_v29  ;;  %v2239_v45 = vadd.f32 %v11227_v1, %v12521_v34  ;;  %v2234_v1 = vadd.f32 %v11234_v47, %v11129_v26 }
 0x148   : > { %4244 = vst.msk [vmem:[#allocation6 + $0x20] sm:$0xff] %vm1837_vm2, %v4228_v30  ;;  %v4203_v37 = vld [vmem:[#allocation2 + $0x52] ss:$2 sm:$0xff]  ;;  %v11256_v21 = vpop.f32.mrf.mxu0  ;;  %v11258_v22 = vpop.f32.mrf.mxu1  ;;  %v4157_v46 = vld [vmem:[#allocation2 + $0x61] ss:$2 sm:$0xff]  ;;  %9701 = vmatprep.subr.mxu1 %v12520_v48 }
 0x149   : > { %v4125_v27 = vld [vmem:[#allocation2 + $0x60] ss:$2 sm:$0xff]  ;;  %v4229_v3 = vmax.f32 %v4181_v57, %v4203_v37  ;;  %9702 = vmatpush3.msra.mxu1 %v8454_v14  ;;  %v8472_v30 = vld [vmem:[%s12504_s21 + $0x98] sm:$0xff]  ;;  %v8452_v57 = vld [vmem:[%s12504_s21 + $0x50] sm:$0xff]  ;;  %v2542_v58 = vadd.f32 %v11229_v12, %v2239_v45 }
 0x14a   : > { %v11260_v9 = vpop.f32.mrf.mxu0  ;;  %v11262_v56 = vpop.f32.mrf.mxu1  ;;  %v4182_v17 = vmax.f32 %v4125_v27, %v4157_v46  ;;  %9703 = vmatprep.subr.mxu1 %v12520_v48  ;;  %v8471_v37 = vld [vmem:[%s12504_s21 + $0x90] sm:$0xff]  ;;  %9741 = vmatpush3.msra.mxu0 %v8472_v30  ;;  %v8469_v12 = vld [vmem:[%s12504_s21 + $0x80] sm:$0xff] }
 0x14b   : > { %v4342_v53 = vld [vmem:[#allocation6 + $0x11] ss:$2 sm:$0xff]  ;;  %v4315_v33 = vld [vmem:[#allocation6 + $0x10] ss:$2 sm:$0xff]  ;;  %4245 = vst.msk [vmem:[#allocation6 + $0x28] sm:$0xff] %vm1837_vm2, %v4229_v3  ;;  %9704 = vmatpush3.msra.mxu1 %v8453_v15  ;;  %9742 = vmatprep.subr.mxu0 %v12520_v48  ;;  %v2254_v14 = vadd.f32 %v11260_v9, %v11152_v59 }
 0x14c   : > { %v4205_v40 = vld [vmem:[#allocation2 + $0x62] ss:$2 sm:$0xff]  ;;  %9625 = vmatmul.mubr.msk.f32.gmra.mxu1 %vm1837_vm2, %v4342_v53  ;;  %9668 = vmatmul.mubr.msk.f32.gmra.mxu0 %vm1837_vm2, %v4315_v33  ;;  %v11270_v52 = vpop.f32.mrf.mxu0  ;;  %v11272_v41 = vpop.f32.mrf.mxu1 }
 0x14d   : > { %9627 = vmatprep.mubr.msk.f32.mxu1 %vm10183_vm1, %v12520_v48  ;;  %9670 = vmatprep.mubr.msk.f32.mxu0 %vm10183_vm1, %v12520_v48  ;;  %v4230_v5 = vmax.f32 %v4182_v17, %v4205_v40  ;;  %v8470_v3 = vld [vmem:[%s12504_s21 + $0x88] sm:$0xff]  ;;  %v2249_v17 = vadd.f32 %v11241_v55, %v11134_v31  ;;  %v2541_v40 = vadd.f32 %v11236_v32, %v2234_v1  ;;  %v8468_v32 = vld [vmem:[%s12504_s21 + $0x78] sm:$0xff] }
 0x14e   : > { %v11278_v13 = vpop.f32.mrf.mxu0  ;;  %v11280_v7 = vpop.f32.mrf.mxu1  ;;  %9705 = vmatprep.subr.mxu1 %v12520_v48  ;;  %9743 = vmatpush3.msra.mxu0 %v8471_v37  ;;  %v2259_v31 = vadd.f32 %v11256_v21, %v11145_v4 }
 0x14f   : > { %4246 = vst.msk [vmem:[#allocation6 + $0x30] sm:$0xff] %vm1837_vm2, %v4230_v5  ;;  %9706 = vmatpush3.msra.mxu1 %v8452_v57  ;;  %9744 = vmatprep.subr.mxu0 %v12520_v48  ;;  %v2244_v5 = vadd.f32 %v11251_v60, %v11139_v11  ;;  %v2544_v29 = vadd.f32 %v11243_v23, %v2249_v17 }
 0x150   : > { %v11283_v18 = vpop.f32.mrf.mxu0  ;;  %v11285_v61 = vpop.f32.mrf.mxu1  ;;  %9783 = vmatprep.subr.mxu1 %v12520_v48  ;;  %9745 = vmatpush3.msra.mxu0 %v8470_v3  ;;  %v2546_v23 = vadd.f32 %v11258_v22, %v2259_v31  ;;  %v2269_v57 = vadd.f32 %v11270_v52, %v11158_v6  ;;  %v2264_v17 = vadd.f32 %v11278_v13, %v11167_v19 }
 0x151   : > { %9746 = vmatprep.subr.mxu0 %v12520_v48  ;;  %v2543_v4 = vadd.f32 %v11253_v25, %v2244_v5  ;;  %v2545_v25 = vadd.f32 %v11262_v56, %v2254_v14 }
 0x152   : > { %v11288_v62 = vpop.f32.mrf.mxu0  ;;  %v11290_v54 = vpop.f32.mrf.mxu1  ;;  %v4344_v24 = vld [vmem:[#allocation6 + $0x21] ss:$2 sm:$0xff]  ;;  %v4317_v44 = vld [vmem:[#allocation6 + $0x20] ss:$2 sm:$0xff]  ;;  %9747 = vmatpush3.msra.mxu0 %v8469_v12  ;;  %v2548_v5 = vadd.f32 %v11272_v41, %v2269_v57 }
 0x153   : > { %9628 = vmatmul.mubr.msk.f32.gmra.mxu1 %vm1837_vm2, %v4344_v24  ;;  %9671 = vmatmul.mubr.msk.f32.gmra.mxu0 %vm1837_vm2, %v4317_v44  ;;  %v2274_v14 = vadd.f32 %v11288_v62, %v11184_v50 }
 0x154   : > { %v11297_v35 = vpop.f32.mrf.mxu0  ;;  %v11299_v0 = vpop.f32.mrf.mxu1  ;;  %9630 = vmatprep.mubr.msk.f32.mxu1 %vm10183_vm1, %v12520_v48  ;;  %9673 = vmatprep.mubr.msk.f32.mxu0 %vm10183_vm1, %v12520_v48 }
 0x155   : > { %9748 = vmatprep.subr.mxu0 %v12520_v48 }
 0x156   : > { %v11305_v8 = vpop.f32.mrf.mxu0  ;;  %v11307_v10 = vpop.f32.mrf.mxu1  ;;  %9749 = vmatpush3.msra.mxu0 %v8468_v32 }
 0x157   : > { %9826 = vmatprep.subr.mxu0 %v12520_v48 }
 0x158   : > { %v11310_v63 = vpop.f32.mrf.mxu0  ;;  %v11312_v39 = vpop.f32.mrf.mxu1 }
 0x15a   : > { %v11320_v16 = vpop.f32.mrf.mxu0  ;;  %v11322_v36 = vpop.f32.mrf.mxu1 }
 0x15c   : > { %v11336_v27 = vpop.f32.mrf.mxu0  ;;  %v11338_v46 = vpop.f32.mrf.mxu1 }
 0x15e   : > { %v11347_v53 = vpop.f32.mrf.mxu0  ;;  %v11349_v33 = vpop.f32.mrf.mxu1 }
 0x160   : > { %v9427_v26 = vpop.f32.mrf.mxu0  ;;  %v9459_v47 = vpop.f32.mrf.mxu1 }
 0x161   : > { %v2787_v24 = vadd.f32 %v9427_v26, %v2542_v58 }
 0x162   : > { %v2707_v55 = vpop.f32.mrf.mxu0  ;;  %v2952_v44 = vpop.f32.mrf.mxu1 }
 0x163   : > { %v3032_v11 = vadd.f32 %v9459_v47, %v2787_v24  ;;  %v2786_v60 = vadd.f32 %v2707_v55, %v2541_v40  ;;  %v2279_v24 = vadd.f32 %v11283_v18, %v11176_v38 }
 0x164   : > { %v9430_v15 = vpop.f32.mrf.mxu0  ;;  %v9462_v34 = vpop.f32.mrf.mxu1 }
 0x165   : > { %v3048_v21 = vadd.f32 %v11121_v2, %v3032_v11  ;;  %v3031_v45 = vadd.f32 %v2952_v44, %v2786_v60  ;;  %v2789_v30 = vadd.f32 %v9430_v15, %v2544_v29  ;;  %v2547_v44 = vadd.f32 %v11280_v7, %v2264_v17  ;;  %v4127_v7 = vld [vmem:[#allocation2 + $0x70] ss:$2 sm:$0xff] }
 0x166   : > { %v2717_v37 = vpop.f32.mrf.mxu0  ;;  %v2962_v1 = vpop.f32.mrf.mxu1  ;;  %v2550_v18 = vadd.f32 %v11285_v61, %v2279_v24  ;;  %v2289_v15 = vadd.f32 %v11297_v35, %v11192_v43 }
 0x167   : > { %v3064_v3 = vmax.f32 %v3048_v21, 0.0  ;;  %v3047_v59 = vadd.f32 %v11121_v2, %v3031_v45  ;;  %v3034_v9 = vadd.f32 %v9462_v34, %v2789_v30  ;;  %v2788_v58 = vadd.f32 %v2717_v37, %v2543_v4  ;;  %v4159_v21 = vld [vmem:[#allocation2 + $0x71] ss:$2 sm:$0xff] }
 0x168   : > { %v9433_v26 = vpop.f32.mrf.mxu0  ;;  %v9465_v47 = vpop.f32.mrf.mxu1  ;;  %v4183_v35 = vmax.f32 %v4127_v7, %v4159_v21 }
 0x169   : > { %3080 = vst.msk [vmem:[#allocation2 + $0x88] sm:$0xff] %vm1837_vm2, %v3064_v3  ;;  %v3063_v22 = vmax.f32 %v3047_v59, 0.0  ;;  %v3050_v40 = vadd.f32 %v11121_v2, %v3034_v9  ;;  %v3033_v6 = vadd.f32 %v2962_v1, %v2788_v58  ;;  %v2791_v52 = vadd.f32 %v9433_v26, %v2546_v23 }
 0x16a   : > { %v2727_v12 = vpop.f32.mrf.mxu0  ;;  %v2972_v31 = vpop.f32.mrf.mxu1  ;;  %v2549_v3 = vadd.f32 %v11290_v54, %v2274_v14  ;;  %v2284_v59 = vadd.f32 %v11305_v8, %v11200_v51  ;;  %v2299_v9 = vadd.f32 %v11310_v63, %v11207_v42 }
 0x16b   : > { %3079 = vst.msk [vmem:[#allocation2 + $0x80] sm:$0xff] %vm1837_vm2, %v3063_v22  ;;  %v3066_v56 = vmax.f32 %v3050_v40, 0.0  ;;  %v3049_v19 = vadd.f32 %v11121_v2, %v3033_v6  ;;  %v3036_v13 = vadd.f32 %v9465_v47, %v2791_v52  ;;  %v2790_v55 = vadd.f32 %v2727_v12, %v2545_v25 }
 0x16c   : > { %v9436_v32 = vpop.f32.mrf.mxu0  ;;  %v9468_v29 = vpop.f32.mrf.mxu1  ;;  %v2552_v22 = vadd.f32 %v11299_v0, %v2289_v15  ;;  %v2554_v0 = vadd.f32 %v11312_v39, %v2299_v9 }
 0x16d   : > { %3082 = vst.msk [vmem:[#allocation2 + $0x98] sm:$0xff] %vm1837_vm2, %v3066_v56  ;;  %v3065_v11 = vmax.f32 %v3049_v19, 0.0  ;;  %v3052_v41 = vadd.f32 %v11121_v2, %v3036_v13  ;;  %v3035_v60 = vadd.f32 %v2972_v31, %v2790_v55  ;;  %v2793_v38 = vadd.f32 %v9436_v32, %v2548_v5 }
 0x16e   : > { %v2737_v34 = vpop.f32.mrf.mxu0  ;;  %v2982_v4 = vpop.f32.mrf.mxu1  ;;  %v2551_v31 = vadd.f32 %v11307_v10, %v2284_v59  ;;  %v2294_v56 = vadd.f32 %v11320_v16, %v11212_v28 }
 0x16f   : > { %3081 = vst.msk [vmem:[#allocation2 + $0x90] sm:$0xff] %vm1837_vm2, %v3065_v11  ;;  %v3068_v45 = vmax.f32 %v3052_v41, 0.0  ;;  %v3051_v30 = vadd.f32 %v11121_v2, %v3035_v60  ;;  %v3038_v23 = vadd.f32 %v9468_v29, %v2793_v38  ;;  %v2792_v57 = vadd.f32 %v2737_v34, %v2547_v44 }
 0x170   : > { %v9439_v37 = vpop.f32.mrf.mxu0  ;;  %v9471_v1 = vpop.f32.mrf.mxu1  ;;  %v2309_v11 = vadd.f32 %v11336_v27, %v11218_v49  ;;  %v2553_v49 = vadd.f32 %v11322_v36, %v2294_v56  ;;  %v2304_v27 = vadd.f32 %v11347_v53, %v11223_v20 }
 0x171   : > { %3084 = vst.msk [vmem:[#allocation2 + $0xa8] sm:$0xff] %vm1837_vm2, %v3068_v45  ;;  %v3067_v61 = vmax.f32 %v3051_v30, 0.0  ;;  %v3054_v50 = vadd.f32 %v11121_v2, %v3038_v23  ;;  %v3037_v62 = vadd.f32 %v2982_v4, %v2792_v57  ;;  %v2795_v43 = vadd.f32 %v9439_v37, %v2550_v18 }
 0x172   : > { %v4129_v58 = vld [vmem:[#allocation2 + $0x80] ss:$2 sm:$0xff]  ;;  %v4161_v25 = vld [vmem:[#allocation2 + $0x81] ss:$2 sm:$0xff]  ;;  %v2747_v26 = vpop.f32.mrf.mxu0  ;;  %v2992_v47 = vpop.f32.mrf.mxu1  ;;  %v2556_v23 = vadd.f32 %v11338_v46, %v2309_v11  ;;  %v2555_v46 = vadd.f32 %v11349_v33, %v2304_v27 }
 0x173   : > { %v4207_v17 = vld [vmem:[#allocation2 + $0x72] ss:$2 sm:$0xff]  ;;  %3083 = vst.msk [vmem:[#allocation2 + $0xa0] sm:$0xff] %vm1837_vm2, %v3067_v61  ;;  %v3070_v40 = vmax.f32 %v3054_v50, 0.0  ;;  %v3053_v6 = vadd.f32 %v11121_v2, %v3037_v62  ;;  %v3040_v52 = vadd.f32 %v9471_v1, %v2795_v43  ;;  %v2794_v54 = vadd.f32 %v2747_v26, %v2549_v3 }
 0x174   : > { %v9442_v5 = vpop.f32.mrf.mxu0  ;;  %v9474_v24 = vpop.f32.mrf.mxu1  ;;  %v4231_v51 = vmax.f32 %v4183_v35, %v4207_v17  ;;  %v4184_v8 = vmax.f32 %v4129_v58, %v4161_v25 }
 0x175   : > { %3086 = vst.msk [vmem:[#allocation2 + $0xb8] sm:$0xff] %vm1837_vm2, %v3070_v40  ;;  %v3069_v42 = vmax.f32 %v3053_v6, 0.0  ;;  %v3056_v63 = vadd.f32 %v11121_v2, %v3040_v52  ;;  %v2797_v12 = vadd.f32 %v9442_v5, %v2552_v22  ;;  %v3039_v44 = vadd.f32 %v2992_v47, %v2794_v54 }
 0x176   : > { %v4131_v19 = vld [vmem:[#allocation2 + $0x90] ss:$2 sm:$0xff]  ;;  %v4163_v13 = vld [vmem:[#allocation2 + $0x91] ss:$2 sm:$0xff]  ;;  %v2757_v32 = vpop.f32.mrf.mxu0  ;;  %v3002_v29 = vpop.f32.mrf.mxu1  ;;  %4247 = vst.msk [vmem:[#allocation6 + $0x38] sm:$0xff] %vm1837_vm2, %v4231_v51 }
 0x177   : > { %v4209_v55 = vld [vmem:[#allocation2 + $0x82] ss:$2 sm:$0xff]  ;;  %3085 = vst.msk [vmem:[#allocation2 + $0xb0] sm:$0xff] %vm1837_vm2, %v3069_v42  ;;  %v3072_v10 = vmax.f32 %v3056_v63, 0.0  ;;  %v3042_v60 = vadd.f32 %v9474_v24, %v2797_v12  ;;  %v3055_v39 = vadd.f32 %v11121_v2, %v3039_v44  ;;  %v2796_v38 = vadd.f32 %v2757_v32, %v2551_v31 }
 0x178   : > { %v4232_v41 = vmax.f32 %v4184_v8, %v4209_v55  ;;  %v9445_v28 = vpop.f32.mrf.mxu0  ;;  %v9477_v16 = vpop.f32.mrf.mxu1  ;;  %v4185_v18 = vmax.f32 %v4131_v19, %v4163_v13 }
 0x179   : > { %3088 = vst.msk [vmem:[#allocation2 + $0xc8] sm:$0xff] %vm1837_vm2, %v3072_v10  ;;  %v3058_v14 = vadd.f32 %v11121_v2, %v3042_v60  ;;  %v2799_v15 = vadd.f32 %v9445_v28, %v2554_v0  ;;  %v3041_v21 = vadd.f32 %v3002_v29, %v2796_v38  ;;  %v3071_v37 = vmax.f32 %v3055_v39, 0.0 }
 0x17a   : > { %4248 = vst.msk [vmem:[#allocation6 + $0x40] sm:$0xff] %vm1837_vm2, %v4232_v41  ;;  %v4133_v34 = vld [vmem:[#allocation2 + $0xa0] ss:$2 sm:$0xff]  ;;  %v4165_v4 = vld [vmem:[#allocation2 + $0xa1] ss:$2 sm:$0xff]  ;;  %v2767_v45 = vpop.f32.mrf.mxu0  ;;  %v3012_v30 = vpop.f32.mrf.mxu1 }
 0x17b   : > { %v4211_v7 = vld [vmem:[#allocation2 + $0x92] ss:$2 sm:$0xff]  ;;  %v3074_v1 = vmax.f32 %v3058_v14, 0.0  ;;  %v3057_v61 = vadd.f32 %v11121_v2, %v3041_v21  ;;  %v3044_v50 = vadd.f32 %v9477_v16, %v2799_v15  ;;  %v2798_v62 = vadd.f32 %v2767_v45, %v2553_v49  ;;  %3087 = vst.msk [vmem:[#allocation2 + $0xc0] sm:$0xff] %vm1837_vm2, %v3071_v37 }
 0x17c   : > { %v4233_v57 = vmax.f32 %v4185_v18, %v4211_v7  ;;  %v9448_v43 = vpop.f32.mrf.mxu0  ;;  %v9480_v36 = vpop.f32.mrf.mxu1  ;;  %v4186_v35 = vmax.f32 %v4133_v34, %v4165_v4 }
 0x17d   : > { %3090 = vst.msk [vmem:[#allocation2 + $0xd8] sm:$0xff] %vm1837_vm2, %v3074_v1  ;;  %v2801_v20 = vadd.f32 %v9448_v43, %v2556_v23  ;;  %v4346_v53 = vld [vmem:[#allocation6 + $0x31] ss:$2 sm:$0xff]  ;;  %v4319_v3 = vld [vmem:[#allocation6 + $0x30] ss:$2 sm:$0xff]  ;;  %v3060_v9 = vadd.f32 %v11121_v2, %v3044_v50  ;;  %v3043_v58 = vadd.f32 %v3012_v30, %v2798_v62  ;;  %v3073_v47 = vmax.f32 %v3057_v61, 0.0 }
 0x17e   : > { %4249 = vst.msk [vmem:[#allocation6 + $0x48] sm:$0xff] %vm1837_vm2, %v4233_v57  ;;  %v4213_v59 = vld [vmem:[#allocation2 + $0xa2] ss:$2 sm:$0xff]  ;;  %9631 = vmatmul.mubr.msk.f32.gmra.mxu1 %vm1837_vm2, %v4346_v53  ;;  %9674 = vmatmul.mubr.msk.f32.gmra.mxu0 %vm1837_vm2, %v4319_v3  ;;  %v2777_v25 = vpop.f32.mrf.mxu0  ;;  %v3022_v17 = vpop.f32.mrf.mxu1  ;;  %v4167_v40 = vld [vmem:[#allocation2 + $0xb1] ss:$2 sm:$0xff] }
 0x17f   : > { %v4234_v26 = vmax.f32 %v4186_v35, %v4213_v59  ;;  %v3046_v22 = vadd.f32 %v9480_v36, %v2801_v20  ;;  %9633 = vmatprep.mubr.msk.f32.mxu1 %vm10183_vm1, %v12520_v48  ;;  %9676 = vmatprep.mubr.msk.f32.mxu0 %vm10183_vm1, %v12520_v48  ;;  %v4135_v33 = vld [vmem:[#allocation2 + $0xb0] ss:$2 sm:$0xff]  ;;  %v3076_v6 = vmax.f32 %v3060_v9, 0.0  ;;  %v3059_v52 = vadd.f32 %v11121_v2, %v3043_v58 }
 0x180   : > { %v2800_v54 = vadd.f32 %v2777_v25, %v2555_v46  ;;  %v11440_v5 = vpop.f32.mrf.mxu0  ;;  %v11442_v24 = vpop.f32.mrf.mxu1  ;;  %3089 = vst.msk [vmem:[#allocation2 + $0xd0] sm:$0xff] %vm1837_vm2, %v3073_v47  ;;  %v4187_v31 = vmax.f32 %v4135_v33, %v4167_v40 }
 0x181   : > { %4250 = vst.msk [vmem:[#allocation6 + $0x50] sm:$0xff] %vm1837_vm2, %v4234_v26  ;;  %v3062_v51 = vadd.f32 %v11121_v2, %v3046_v22  ;;  %3092 = vst.msk [vmem:[#allocation2 + $0xe8] sm:$0xff] %vm1837_vm2, %v3076_v6  ;;  %v3075_v8 = vmax.f32 %v3059_v52, 0.0 }
 0x182   : > { %v3045_v42 = vadd.f32 %v3022_v17, %v2800_v54  ;;  %v11448_v63 = vpop.f32.mrf.mxu0  ;;  %v11450_v12 = vpop.f32.mrf.mxu1  ;;  %v4137_v56 = vld [vmem:[#allocation2 + $0xc0] ss:$2 sm:$0xff]  ;;  %v4169_v19 = vld [vmem:[#allocation2 + $0xc1] ss:$2 sm:$0xff] }
 0x183   : > { %v3078_v0 = vmax.f32 %v3062_v51, 0.0  ;;  %v4215_v13 = vld [vmem:[#allocation2 + $0xb2] ss:$2 sm:$0xff]  ;;  %3091 = vst.msk [vmem:[#allocation2 + $0xe0] sm:$0xff] %vm1837_vm2, %v3075_v8  ;;  %v4188_v38 = vmax.f32 %v4137_v56, %v4169_v19  ;;  %v3420_v56 = vadd.f32 %v11442_v24, %v11440_v5 }
 0x184   : > { %v3061_v55 = vadd.f32 %v11121_v2, %v3045_v42  ;;  %v11454_v44 = vpop.f32.mrf.mxu0  ;;  %v11456_v32 = vpop.f32.mrf.mxu1  ;;  %v4235_v29 = vmax.f32 %v4187_v31, %v4215_v13 }
 0x185   : > { %3094 = vst.msk [vmem:[#allocation2 + $0xf8] sm:$0xff] %vm1837_vm2, %v3078_v0  ;;  %v4348_v11 = vld [vmem:[#allocation6 + $0x41] ss:$2 sm:$0xff]  ;;  %v4321_v41 = vld [vmem:[#allocation6 + $0x40] ss:$2 sm:$0xff] }
 0x186   : > { %v3077_v10 = vmax.f32 %v3061_v55, 0.0  ;;  %9634 = vmatmul.mubr.msk.f32.gmra.mxu1 %vm1837_vm2, %v4348_v11  ;;  %9677 = vmatmul.mubr.msk.f32.gmra.mxu0 %vm1837_vm2, %v4321_v41  ;;  %v11461_v60 = vpop.f32.mrf.mxu0  ;;  %v11463_v39 = vpop.f32.mrf.mxu1  ;;  %4251 = vst.msk [vmem:[#allocation6 + $0x58] sm:$0xff] %vm1837_vm2, %v4235_v29  ;;  %v3415_v55 = vadd.f32 %v11450_v12, %v11448_v63  ;;  %v3430_v41 = vadd.f32 %v11456_v32, %v11454_v44 }
 0x187   : > { %9636 = vmatprep.mubr.msk.f32.mxu1 %vm10183_vm1, %v12520_v48  ;;  %9679 = vmatprep.mubr.msk.f32.mxu0 %vm10183_vm1, %v12520_v48  ;;  %v4139_v2 = vld [vmem:[#allocation2 + $0xd0] ss:$2 sm:$0xff]  ;;  %v4171_v28 = vld [vmem:[#allocation2 + $0xd1] ss:$2 sm:$0xff] }
 0x188   : > { %v4217_v16 = vld [vmem:[#allocation2 + $0xc2] ss:$2 sm:$0xff]  ;;  %3093 = vst.msk [vmem:[#allocation2 + $0xf0] sm:$0xff] %vm1837_vm2, %v3077_v10  ;;  %v11471_v18 = vpop.f32.mrf.mxu0  ;;  %v11473_v14 = vpop.f32.mrf.mxu1  ;;  %v4189_v49 = vmax.f32 %v4139_v2, %v4171_v28  ;;  %v3425_v28 = vadd.f32 %v11463_v39, %v11461_v60  ;;  %v11537_v60 = vld [vmem:[%s12478_s5] ss:$0 sm:$0xff] }
 0x189   : > { %v4236_v15 = vmax.f32 %v4188_v38, %v4217_v16  ;;  %v3440_v24 = vadd.f32 %v11473_v14, %v11471_v18 }
 0x18a   : > { %v11475_v27 = vpop.f32.mrf.mxu0  ;;  %v11477_v34 = vpop.f32.mrf.mxu1  ;;  %v4141_v4 = vld [vmem:[#allocation2 + $0xe0] ss:$2 sm:$0xff]  ;;  %v4173_v7 = vld [vmem:[#allocation2 + $0xe1] ss:$2 sm:$0xff] }
 0x18b   : > { %4252 = vst.msk [vmem:[#allocation6 + $0x60] sm:$0xff] %vm1837_vm2, %v4236_v15  ;;  %v4219_v21 = vld [vmem:[#allocation2 + $0xd2] ss:$2 sm:$0xff]  ;;  %v4190_v57 = vmax.f32 %v4141_v4, %v4173_v7  ;;  %v3435_v4 = vadd.f32 %v11477_v34, %v11475_v27 }
 0x18c   : > { %v4237_v45 = vmax.f32 %v4189_v49, %v4219_v21  ;;  %v11480_v30 = vpop.f32.mrf.mxu0  ;;  %v11482_v23 = vpop.f32.mrf.mxu1 }
 0x18d   : > { %v4350_v37 = vld [vmem:[#allocation6 + $0x51] ss:$2 sm:$0xff]  ;;  %v4323_v1 = vld [vmem:[#allocation6 + $0x50] ss:$2 sm:$0xff]  ;;  %v3450_v18 = vadd.f32 %v11482_v23, %v11480_v30 }
 0x18e   : > { %4253 = vst.msk [vmem:[#allocation6 + $0x68] sm:$0xff] %vm1837_vm2, %v4237_v45  ;;  %v11485_v61 = vpop.f32.mrf.mxu0  ;;  %v11487_v50 = vpop.f32.mrf.mxu1  ;;  %9637 = vmatmul.mubr.msk.f32.gmra.mxu1 %vm1837_vm2, %v4350_v37  ;;  %9680 = vmatmul.mubr.msk.f32.gmra.mxu0 %vm1837_vm2, %v4323_v1 }
 0x18f   : > { %v4221_v62 = vld [vmem:[#allocation2 + $0xe2] ss:$2 sm:$0xff]  ;;  %9639 = vmatprep.mubr.msk.f32.mxu1 %vm10183_vm1, %v12520_v48  ;;  %9682 = vmatprep.mubr.msk.f32.mxu0 %vm10183_vm1, %v12520_v48 }
 0x190   : > { %v4238_v43 = vmax.f32 %v4190_v57, %v4221_v62  ;;  %v11491_v36 = vpop.f32.mrf.mxu0  ;;  %v11493_v35 = vpop.f32.mrf.mxu1  ;;  %v3445_v62 = vadd.f32 %v11487_v50, %v11485_v61 }
 0x191   : > { %v3460_v61 = vadd.f32 %v11493_v35, %v11491_v36 }
 0x192   : > { %4254 = vst.msk [vmem:[#allocation6 + $0x70] sm:$0xff] %vm1837_vm2, %v4238_v43  ;;  %v11500_v20 = vpop.f32.mrf.mxu0  ;;  %v11502_v53 = vpop.f32.mrf.mxu1 }
 0x193   : > { %v3455_v50 = vadd.f32 %v11502_v53, %v11500_v20 }
 0x194   : > { %v11504_v3 = vpop.f32.mrf.mxu0  ;;  %v11506_v46 = vpop.f32.mrf.mxu1 }
 0x195   : > { %v4352_v59 = vld [vmem:[#allocation6 + $0x61] ss:$2 sm:$0xff]  ;;  %v4325_v9 = vld [vmem:[#allocation6 + $0x60] ss:$2 sm:$0xff] }
 0x196   : > { %9640 = vmatmul.mubr.msk.f32.gmra.mxu1 %vm1837_vm2, %v4352_v59  ;;  %9683 = vmatmul.mubr.msk.f32.gmra.mxu0 %vm1837_vm2, %v4325_v9  ;;  %v11510_v58 = vpop.f32.mrf.mxu0  ;;  %v11512_v25 = vpop.f32.mrf.mxu1 }
 0x197   : > { %9642 = vmatprep.mubr.msk.f32.mxu1 %vm10183_vm1, %v12520_v48  ;;  %9685 = vmatprep.mubr.msk.f32.mxu0 %vm10183_vm1, %v12520_v48 }
 0x198   : > { %v9543_v17 = vpop.f32.mrf.mxu0  ;;  %v9569_v26 = vpop.f32.mrf.mxu1 }
 0x199   : > { %v3663_v29 = vadd.f32 %v9543_v17, %v3420_v56 }
 0x19a   : > { %v3603_v47 = vpop.f32.mrf.mxu0  ;;  %v3804_v22 = vpop.f32.mrf.mxu1 }
 0x19b   : > { %v3662_v10 = vadd.f32 %v3603_v47, %v3415_v55  ;;  %v3864_v16 = vadd.f32 %v9569_v26, %v3663_v29  ;;  %v3470_v29 = vadd.f32 %v11506_v46, %v11504_v3 }
 0x19c   : > { %v9546_v33 = vpop.f32.mrf.mxu0  ;;  %v9572_v6 = vpop.f32.mrf.mxu1 }
 0x19d   : > { %v3665_v5 = vadd.f32 %v9546_v33, %v3430_v41  ;;  %v3863_v63 = vadd.f32 %v3804_v22, %v3662_v10 }
 0x19e   : > { %v3613_v40 = vpop.f32.mrf.mxu0  ;;  %v3814_v54 = vpop.f32.mrf.mxu1 }
 0x19f   : > { %v3664_v12 = vadd.f32 %v3613_v40, %v3425_v28  ;;  %v3866_v21 = vadd.f32 %v9572_v6, %v3665_v5 }
 0x1a0   : > { %v9549_v52 = vpop.f32.mrf.mxu0  ;;  %v9575_v42 = vpop.f32.mrf.mxu1 }
 0x1a1   : > { %v3667_v44 = vadd.f32 %v9549_v52, %v3440_v24  ;;  %v3865_v37 = vadd.f32 %v3814_v54, %v3664_v12 }
 0x1a2   : > { %v3623_v51 = vpop.f32.mrf.mxu0  ;;  %v3824_v19 = vpop.f32.mrf.mxu1 }
 0x1a3   : > { %v3666_v14 = vadd.f32 %v3623_v51, %v3435_v4  ;;  %v3868_v43 = vadd.f32 %v9575_v42, %v3667_v44  ;;  %v4175_v42 = vld [vmem:[#allocation2 + $0xf1] ss:$2 sm:$0xff] }
 0x1a4   : > { %v9552_v8 = vpop.f32.mrf.mxu0  ;;  %v9578_v38 = vpop.f32.mrf.mxu1 }
 0x1a5   : > { %v3669_v17 = vadd.f32 %v9552_v8, %v3450_v18  ;;  %v3867_v23 = vadd.f32 %v3824_v19, %v3666_v14  ;;  %v4143_v8 = vld [vmem:[#allocation2 + $0xf0] ss:$2 sm:$0xff] }
 0x1a6   : > { %v3633_v31 = vpop.f32.mrf.mxu0  ;;  %v3834_v32 = vpop.f32.mrf.mxu1 }
 0x1a7   : > { %v3668_v33 = vadd.f32 %v3633_v31, %v3445_v62  ;;  %v3870_v56 = vadd.f32 %v9578_v38, %v3669_v17  ;;  %v4191_v38 = vmax.f32 %v4143_v8, %v4175_v42 }
 0x1a8   : > { %v9555_v0 = vpop.f32.mrf.mxu0  ;;  %v9581_v59 = vpop.f32.mrf.mxu1 }
 0x1a9   : > { %v3671_v41 = vadd.f32 %v9555_v0, %v3460_v61  ;;  %v3869_v35 = vadd.f32 %v3834_v32, %v3668_v33 }
 0x1aa   : > { %v3643_v13 = vpop.f32.mrf.mxu0  ;;  %v3844_v54 = vpop.f32.mrf.mxu1 }
 0x1ab   : > { %v3670_v10 = vadd.f32 %v3643_v13, %v3455_v50  ;;  %v3872_v13 = vadd.f32 %v9581_v59, %v3671_v41 }
 0x1ac   : > { %v11522_v11 = vpop.f32.mrf.mxu0  ;;  %v9584_v5 = vpop.f32.mrf.mxu1 }
 0x1ae   : > { %v11526_v2 = vpop.f32.mrf.mxu0 }
 0x1b0   : > { %v9595_v15 = vpop.f32.mrf.mxu0 }
 0x1b1   : > { %v4065_v49 = vadd.f32 %v9595_v15, %v3864_v16  ;;  %v3465_v16 = vadd.f32 %v11512_v25, %v11510_v58  ;;  %v3673_v15 = vadd.f32 %v11522_v11, %v3470_v29  ;;  %v3854_v11 = vpop.f32.mrf.mxu1 }
 0x1b2   : > { %v4005_v7 = vpop.f32.mrf.mxu0 }
 0x1b3   : > { %v4077_v39 = vadd.f32 %v11537_v60, %v4065_v49  ;;  %v4064_v45 = vadd.f32 %v4005_v7, %v3863_v63  ;;  %v3871_v63 = vadd.f32 %v3844_v54, %v3670_v10  ;;  %v3672_v32 = vadd.f32 %v11526_v2, %v3465_v16 }
 0x1b4   : > { %v9598_v57 = vpop.f32.mrf.mxu0 }
 0x1b5   : > { %v4089_v1 = vmax.f32 %v4077_v39, 0.0  ;;  %v4076_v27 = vadd.f32 %v11537_v60, %v4064_v45  ;;  %v4067_v34 = vadd.f32 %v9598_v57, %v3866_v21  ;;  %v3874_v45 = vadd.f32 %v9584_v5, %v3673_v15 }
 0x1b6   : > { %v4015_v9 = vpop.f32.mrf.mxu0  ;;  %v3873_v62 = vadd.f32 %v3854_v11, %v3672_v32  ;;  %v4676_v32 = vld [vmem:[#allocation6 + $0x12] ss:$2 sm:$0xff]  ;;  %v4870_v11 = vld [vmem:[#allocation6 + $0x23] ss:$2 sm:$0xff] }
 0x1b7   : > { %4101 = vst.msk [vmem:[#allocation2 + $0x108] sm:$0xff] %vm1837_vm2, %v4089_v1  ;;  %v4088_v26 = vmax.f32 %v4076_v27, 0.0  ;;  %v4079_v47 = vadd.f32 %v11537_v60, %v4067_v34  ;;  %v4066_v30 = vadd.f32 %v4015_v9, %v3865_v37 }
 0x1b8   : > { %v9601_v22 = vpop.f32.mrf.mxu0 }
 0x1b9   : > { %4100 = vst.msk [vmem:[#allocation2 + $0x100] sm:$0xff] %vm1837_vm2, %v4088_v26  ;;  %v4091_v40 = vmax.f32 %v4079_v47, 0.0  ;;  %v4078_v6 = vadd.f32 %v11537_v60, %v4066_v30  ;;  %v4069_v52 = vadd.f32 %v9601_v22, %v3868_v43 }
 0x1ba   : > { %v4025_v51 = vpop.f32.mrf.mxu0 }
 0x1bb   : > { %4103 = vst.msk [vmem:[#allocation2 + $0x118] sm:$0xff] %vm1837_vm2, %v4091_v40  ;;  %v4090_v31 = vmax.f32 %v4078_v6, 0.0  ;;  %v4081_v19 = vadd.f32 %v11537_v60, %v4069_v52  ;;  %v4068_v55 = vadd.f32 %v4025_v51, %v3867_v23 }
 0x1bc   : > { %v9604_v36 = vpop.f32.mrf.mxu0 }
 0x1bd   : > { %4102 = vst.msk [vmem:[#allocation2 + $0x110] sm:$0xff] %vm1837_vm2, %v4090_v31  ;;  %v4093_v20 = vmax.f32 %v4081_v19, 0.0  ;;  %v4080_v53 = vadd.f32 %v11537_v60, %v4068_v55  ;;  %v4071_v28 = vadd.f32 %v9604_v36, %v3870_v56 }
 0x1be   : > { %v4035_v24 = vpop.f32.mrf.mxu0 }
 0x1bf   : > { %4105 = vst.msk [vmem:[#allocation2 + $0x128] sm:$0xff] %vm1837_vm2, %v4093_v20  ;;  %v4092_v3 = vmax.f32 %v4080_v53, 0.0  ;;  %v4083_v46 = vadd.f32 %v11537_v60, %v4071_v28  ;;  %v4070_v0 = vadd.f32 %v4035_v24, %v3869_v35 }
 0x1c0   : > { %v4223_v12 = vld [vmem:[#allocation2 + $0xf2] ss:$2 sm:$0xff]  ;;  %v4269_v4 = vld [vmem:[#allocation2 + $0x101] ss:$2 sm:$0xff]  ;;  %v9607_v44 = vpop.f32.mrf.mxu0 }
 0x1c1   : > { %v4257_v49 = vld [vmem:[#allocation2 + $0x100] ss:$2 sm:$0xff]  ;;  %v4239_v7 = vmax.f32 %v4191_v38, %v4223_v12  ;;  %4104 = vst.msk [vmem:[#allocation2 + $0x120] sm:$0xff] %vm1837_vm2, %v4092_v3  ;;  %v4095_v58 = vmax.f32 %v4083_v46, 0.0  ;;  %v4082_v25 = vadd.f32 %v11537_v60, %v4070_v0  ;;  %v4073_v21 = vadd.f32 %v9607_v44, %v3872_v13  ;;  %v8487_v44 = vld [vmem:[%s12504_s21 + $0xb8] sm:$0xff] }
 0x1c2   : > { %v4045_v39 = vpop.f32.mrf.mxu0  ;;  %v4280_v18 = vmax.f32 %v4257_v49, %v4269_v4  ;;  %v8488_v12 = vld [vmem:[%s12504_s21 + $0xc0] sm:$0xff] }
 0x1c3   : > { %4255 = vst.msk [vmem:[#allocation6 + $0x78] sm:$0xff] %vm1837_vm2, %v4239_v7  ;;  %4107 = vst.msk [vmem:[#allocation2 + $0x138] sm:$0xff] %vm1837_vm2, %v4095_v58  ;;  %v4094_v14 = vmax.f32 %v4082_v25, 0.0  ;;  %v4072_v57 = vadd.f32 %v4045_v39, %v3871_v63  ;;  %v4085_v27 = vadd.f32 %v11537_v60, %v4073_v21  ;;  %v4674_v49 = vld [vmem:[#allocation6 + $0x2] ss:$2 sm:$0xff]  ;;  %v8485_v21 = vld [vmem:[%s12504_s21 + $0xa8] sm:$0xff] }
 0x1c4   : > { %v4259_v37 = vld [vmem:[#allocation2 + $0x110] ss:$2 sm:$0xff]  ;;  %v4271_v1 = vld [vmem:[#allocation2 + $0x111] ss:$2 sm:$0xff]  ;;  %v9610_v34 = vpop.f32.mrf.mxu0 }
 0x1c5   : > { %v4287_v2 = vld [vmem:[#allocation2 + $0x102] ss:$2 sm:$0xff]  ;;  %4106 = vst.msk [vmem:[#allocation2 + $0x130] sm:$0xff] %vm1837_vm2, %v4094_v14  ;;  %v4084_v59 = vadd.f32 %v11537_v60, %v4072_v57  ;;  %v4075_v9 = vadd.f32 %v9610_v34, %v3874_v45  ;;  %v4097_v17 = vmax.f32 %v4085_v27, 0.0  ;;  %v4281_v47 = vmax.f32 %v4259_v37, %v4271_v1  ;;  %v4866_v4 = vld [vmem:[#allocation6 + $0x3] ss:$2 sm:$0xff] }
 0x1c6   : > { %v4298_v43 = vmax.f32 %v4280_v18, %v4287_v2  ;;  %v4055_v26 = vpop.f32.mrf.mxu0  ;;  %v4868_v7 = vld [vmem:[#allocation6 + $0x13] ss:$2 sm:$0xff]  ;;  %v4678_v25 = vld [vmem:[#allocation6 + $0x22] ss:$2 sm:$0xff]  ;;  %v4680_v39 = vld [vmem:[#allocation6 + $0x32] ss:$2 sm:$0xff] }
 0x1c7   : > { %v4096_v30 = vmax.f32 %v4084_v59, 0.0  ;;  %v4087_v23 = vadd.f32 %v11537_v60, %v4075_v9  ;;  %v4074_v22 = vadd.f32 %v4055_v26, %v3873_v62  ;;  %4109 = vst.msk [vmem:[#allocation2 + $0x148] sm:$0xff] %vm1837_vm2, %v4097_v17  ;;  %v8486_v58 = vld [vmem:[%s12504_s21 + $0xb0] sm:$0xff]  ;;  %v8484_v18 = vld [vmem:[%s12504_s21 + $0xa0] sm:$0xff] }
 0x1c8   : > { %4304 = vst.msk [vmem:[#allocation6 + $0x80] sm:$0xff] %vm1837_vm2, %v4298_v43  ;;  %v4261_v33 = vld [vmem:[#allocation2 + $0x120] ss:$2 sm:$0xff]  ;;  %v4273_v40 = vld [vmem:[#allocation2 + $0x121] ss:$2 sm:$0xff] }
 0x1c9   : > { %v4289_v6 = vld [vmem:[#allocation2 + $0x112] ss:$2 sm:$0xff]  ;;  %4108 = vst.msk [vmem:[#allocation2 + $0x140] sm:$0xff] %vm1837_vm2, %v4096_v30  ;;  %v4099_v61 = vmax.f32 %v4087_v23, 0.0  ;;  %v4086_v50 = vadd.f32 %v11537_v60, %v4074_v22  ;;  %v4282_v8 = vmax.f32 %v4261_v33, %v4273_v40  ;;  %v4872_v45 = vld [vmem:[#allocation6 + $0x33] ss:$2 sm:$0xff] }
 0x1ca   : > { %v4299_v52 = vmax.f32 %v4281_v47, %v4289_v6  ;;  %v4354_v54 = vld [vmem:[#allocation6 + $0x71] ss:$2 sm:$0xff]  ;;  %v4327_v51 = vld [vmem:[#allocation6 + $0x70] ss:$2 sm:$0xff] }
 0x1cb   : > { %4112 = vst.msk [vmem:[#allocation2 + $0x158] sm:$0xf] %vm4111_vm3, %v4099_v61  ;;  %v4098_v42 = vmax.f32 %v4086_v50, 0.0  ;;  %9643 = vmatmul.mubr.msk.f32.gmra.mxu1 %vm1837_vm2, %v4354_v54  ;;  %9686 = vmatmul.mubr.msk.f32.gmra.mxu0 %vm1837_vm2, %v4327_v51  ;;  %v4682_v14 = vld [vmem:[#allocation6 + $0x42] ss:$2 sm:$0xff] }
 0x1cc   : > { %4305 = vst.msk [vmem:[#allocation6 + $0x88] sm:$0xff] %vm1837_vm2, %v4299_v52  ;;  %v4263_v56 = vld [vmem:[#allocation2 + $0x130] ss:$2 sm:$0xff]  ;;  %v4275_v31 = vld [vmem:[#allocation2 + $0x131] ss:$2 sm:$0xff]  ;;  %9645 = vmatprep.mubr.msk.f32.mxu1 %vm10183_vm1, %v12520_v48  ;;  %9688 = vmatprep.mubr.msk.f32.mxu0 %vm10183_vm1, %v12520_v48 }
 0x1cd   : > { %v4291_v19 = vld [vmem:[#allocation2 + $0x122] ss:$2 sm:$0xff]  ;;  %4110 = vst.msk [vmem:[#allocation2 + $0x150] sm:$0xff] %vm1837_vm2, %v4098_v42  ;;  %v4283_v55 = vmax.f32 %v4263_v56, %v4275_v31  ;;  %v4874_v57 = vld [vmem:[#allocation6 + $0x43] ss:$2 sm:$0xff] }
 0x1ce   : > { %v4300_v60 = vmax.f32 %v4282_v8, %v4291_v19  ;;  %v4684_v37 = vld [vmem:[#allocation6 + $0x52] ss:$2 sm:$0xff]  ;;  %v4876_v1 = vld [vmem:[#allocation6 + $0x53] ss:$2 sm:$0xff]  ;;  %v4686_v2 = vld [vmem:[#allocation6 + $0x62] ss:$2 sm:$0xff] }
 0x1cf   : > { %v4878_v27 = vld [vmem:[#allocation6 + $0x63] ss:$2 sm:$0xff]  ;;  %v4688_v34 = vld [vmem:[#allocation6 + $0x72] ss:$2 sm:$0xff]  ;;  %v4880_v62 = vld [vmem:[#allocation6 + $0x73] ss:$2 sm:$0xff] }
 0x1d0   : > { %4306 = vst.msk [vmem:[#allocation6 + $0x90] sm:$0xff] %vm1837_vm2, %v4300_v60  ;;  %v4293_v29 = vld [vmem:[#allocation2 + $0x132] ss:$2 sm:$0xff]  ;;  %v4277_v10 = vld [vmem:[#allocation2 + $0x141] ss:$2 sm:$0xff] }
 0x1d1   : > { %v4265_v41 = vld [vmem:[#allocation2 + $0x140] ss:$2 sm:$0xff]  ;;  %v4301_v36 = vmax.f32 %v4283_v55, %v4293_v29 }
 0x1d2   : > { %v4284_v53 = vmax.f32 %v4265_v41, %v4277_v10  ;;  %v5058_v51 = vld [vmem:[#allocation6 + $0x4] ss:$2 sm:$0xff]  ;;  %v5060_v31 = vld [vmem:[#allocation6 + $0x14] ss:$2 sm:$0xff] }
 0x1d3   : > { %v4356_v35 = vld [vmem:[#allocation6 + $0x81] ss:$2 sm:$0xff]  ;;  %v4329_v20 = vld [vmem:[#allocation6 + $0x80] ss:$2 sm:$0xff]  ;;  %4307 = vst.msk [vmem:[#allocation6 + $0x98] sm:$0xff] %vm1837_vm2, %v4301_v36 }
 0x1d4   : > { %9646 = vmatmul.mubr.msk.f32.gmra.mxu1 %vm1837_vm2, %v4356_v35  ;;  %9689 = vmatmul.mubr.msk.f32.gmra.mxu0 %vm1837_vm2, %v4329_v20  ;;  %v4267_v28 = vld [vmem:[#allocation2 + $0x150] ss:$2 sm:$0x1f]  ;;  %v4279_v38 = vld [vmem:[#allocation2 + $0x151] ss:$2 sm:$0x1f] }
 0x1d5   : > { %9648 = vmatprep.mubr.msk.f32.mxu1 %vm10183_vm1, %v12520_v48  ;;  %9691 = vmatprep.mubr.msk.f32.mxu0 %vm10183_vm1, %v12520_v48  ;;  %v4285_v16 = vmax.f32 %v4267_v28, %v4279_v38  ;;  %v4295_v5 = vld [vmem:[#allocation2 + $0x142] ss:$2 sm:$0xff]  ;;  %v4297_v24 = vld [vmem:[#allocation2 + $0x152] ss:$2 sm:$0x1f] }
 0x1d6   : > { %v4302_v15 = vmax.f32 %v4284_v53, %v4295_v5  ;;  %v5062_v55 = vld [vmem:[#allocation6 + $0x24] ss:$2 sm:$0xff]  ;;  %v5064_v29 = vld [vmem:[#allocation6 + $0x34] ss:$2 sm:$0xff] }
 0x1d7   : > { %v4303_v3 = vmax.f32 %v4285_v16, %v4297_v24  ;;  %v4690_v17 = vld [vmem:[#allocation6 + $0x82] ss:$2 sm:$0xff]  ;;  %v4882_v26 = vld [vmem:[#allocation6 + $0x83] ss:$2 sm:$0xff] }
 0x1d8   : > { %4308 = vst.msk [vmem:[#allocation6 + $0xa0] sm:$0xff] %vm1837_vm2, %v4302_v15  ;;  %v5066_v41 = vld [vmem:[#allocation6 + $0x44] ss:$2 sm:$0xff]  ;;  %v5068_v10 = vld [vmem:[#allocation6 + $0x54] ss:$2 sm:$0xff] }
 0x1d9   : > { %4310 = vst.msk [vmem:[#allocation6 + $0xa8] sm:$0x1f] %vm4309_vm4, %v4303_v3  ;;  %v5070_v36 = vld [vmem:[#allocation6 + $0x64] ss:$2 sm:$0xff]  ;;  %v5072_v35 = vld [vmem:[#allocation6 + $0x74] ss:$2 sm:$0xff] }
 0x1da   : > { %v4358_v46 = vld [vmem:[#allocation6 + $0x91] ss:$2 sm:$0xff]  ;;  %v4331_v0 = vld [vmem:[#allocation6 + $0x90] ss:$2 sm:$0xff] }
 0x1db   : > { %9649 = vmatmul.mubr.msk.f32.gmra.mxu1 %vm1837_vm2, %v4358_v46  ;;  %9692 = vmatmul.mubr.msk.f32.gmra.mxu0 %vm1837_vm2, %v4331_v0  ;;  %v5074_v20 = vld [vmem:[#allocation6 + $0x84] ss:$2 sm:$0xff] }
 0x1dc   : > { %9651 = vmatprep.mubr.msk.f32.mxu1 %vm10183_vm1, %v12520_v48  ;;  %9694 = vmatprep.mubr.msk.f32.mxu0 %vm10183_vm1, %v12520_v48 }
 0x1df   : > { %v4692_v23 = vld [vmem:[#allocation6 + $0x92] ss:$2 sm:$0xff]  ;;  %v4884_v22 = vld [vmem:[#allocation6 + $0x93] ss:$2 sm:$0xff] }
 0x1e0   : > { %v4360_v13 = vld [vmem:[#allocation6 + $0xa1] ss:$2 sm:$0x1f]  ;;  %v4333_v63 = vld [vmem:[#allocation6 + $0xa0] ss:$2 sm:$0x1f] }
 0x1e1   : > { %9652 = vmatmul.mubr.msk.f32.gmra.mxu1 %vm1837_vm2, %v4360_v13  ;;  %9695 = vmatmul.mubr.msk.f32.gmra.mxu0 %vm1837_vm2, %v4333_v63  ;;  %v4694_v6 = vld [vmem:[#allocation6 + $0xa2] ss:$2 sm:$0x1f]  ;;  %v4886_v52 = vld [vmem:[#allocation6 + $0xa3] ss:$2 sm:$0x1f] }
 0x1e2   : > { %9707 = vmatprep.mubr.msk.f32.mxu1 %vm10183_vm1, %v12520_v48  ;;  %9750 = vmatprep.mubr.msk.f32.mxu0 %vm10183_vm1, %v12520_v48  ;;  %v5076_v53 = vld [vmem:[#allocation6 + $0x94] ss:$2 sm:$0xff]  ;;  %v5078_v28 = vld [vmem:[#allocation6 + $0xa4] ss:$2 sm:$0x1f] }
 0x1e5   : > { %9708 = vmatmul.mubr.msk.f32.vlgmr.msra.gmra.mxu1 %vm1837_vm2, %v4674_v49  ;;  %9751 = vmatmul.mubr.msk.f32.vlgmr.msra.gmra.mxu0 %vm1837_vm2, %v4866_v4 }
 0x1e6   : > { %9784 = vmatpush3.msra.mxu1 %v8488_v12  ;;  %9710 = vmatprep.mubr.msk.f32.mxu1 %vm10183_vm1, %v12520_v48 }
 0x1e7   : > { %9753 = vmatprep.mubr.msk.f32.mxu0 %vm10183_vm1, %v12520_v48  ;;  %9785 = vmatprep.subr.mxu1 %v12520_v48 }
 0x1e8   : > { %9786 = vmatpush3.msra.mxu1 %v8487_v44 }
 0x1e9   : > { %9711 = vmatmul.mubr.msk.f32.gmra.mxu1 %vm1837_vm2, %v4676_v32  ;;  %9754 = vmatmul.mubr.msk.f32.gmra.mxu0 %vm1837_vm2, %v4868_v7 }
 0x1ea   : > { %9713 = vmatprep.mubr.msk.f32.mxu1 %vm10183_vm1, %v12520_v48  ;;  %9756 = vmatprep.mubr.msk.f32.mxu0 %vm10183_vm1, %v12520_v48 }
 0x1eb   : > { %9787 = vmatprep.subr.mxu1 %v12520_v48 }
 0x1ec   : > { %9788 = vmatpush3.msra.mxu1 %v8486_v58 }
 0x1ed   : > { %9714 = vmatmul.mubr.msk.f32.gmra.mxu1 %vm1837_vm2, %v4678_v25  ;;  %9757 = vmatmul.mubr.msk.f32.gmra.mxu0 %vm1837_vm2, %v4870_v11 }
 0x1ee   : > { %9716 = vmatprep.mubr.msk.f32.mxu1 %vm10183_vm1, %v12520_v48  ;;  %9759 = vmatprep.mubr.msk.f32.mxu0 %vm10183_vm1, %v12520_v48 }
 0x1ef   : > { %9789 = vmatprep.subr.mxu1 %v12520_v48 }
 0x1f0   : > { %9790 = vmatpush3.msra.mxu1 %v8485_v21 }
 0x1f1   : > { %9717 = vmatmul.mubr.msk.f32.gmra.mxu1 %vm1837_vm2, %v4680_v39  ;;  %9760 = vmatmul.mubr.msk.f32.gmra.mxu0 %vm1837_vm2, %v4872_v45  ;;  %v8506_v39 = vld [vmem:[%s12522_s22 + $0x48] sm:$0xff]  ;;  %v8505_v45 = vld [vmem:[%s12522_s22 + $0x40] sm:$0xff] }
 0x1f2   : > { %9719 = vmatprep.mubr.msk.f32.mxu1 %vm10183_vm1, %v12520_v48  ;;  %9762 = vmatprep.mubr.msk.f32.mxu0 %vm10183_vm1, %v12520_v48 }
 0x1f3   : > { %9791 = vmatprep.subr.mxu1 %v12520_v48  ;;  %9827 = vmatpush3.msra.mxu0 %v8506_v39 }
 0x1f4   : > { %9792 = vmatpush3.msra.mxu1 %v8484_v18  ;;  %9828 = vmatprep.subr.mxu0 %v12520_v48  ;;  %v8504_v18 = vld [vmem:[%s12522_s22 + $0x38] sm:$0xff] }
 0x1f5   : > { %9720 = vmatmul.mubr.msk.f32.gmra.mxu1 %vm1837_vm2, %v4682_v14  ;;  %9763 = vmatmul.mubr.msk.f32.gmra.mxu0 %vm1837_vm2, %v4874_v57  ;;  %v8503_v14 = vld [vmem:[%s12522_s22 + $0x30] sm:$0xff] }
 0x1f6   : > { %9722 = vmatprep.mubr.msk.f32.mxu1 %vm10183_vm1, %v12520_v48  ;;  %9765 = vmatprep.mubr.msk.f32.mxu0 %vm10183_vm1, %v12520_v48  ;;  %v8517_v57 = vld [vmem:[%s12522_s22 + $0x70] sm:$0xff] }
 0x1f7   : > { %9864 = vmatprep.subr.mxu1 %v12520_v48  ;;  %9829 = vmatpush3.msra.mxu0 %v8505_v45 }
 0x1f8   : > { %9830 = vmatprep.subr.mxu0 %v12520_v48 }
 0x1f9   : > { %9723 = vmatmul.mubr.msk.f32.gmra.mxu1 %vm1837_vm2, %v4684_v37  ;;  %9766 = vmatmul.mubr.msk.f32.gmra.mxu0 %vm1837_vm2, %v4876_v1  ;;  %v8502_v37 = vld [vmem:[%s12522_s22 + $0x28] sm:$0xff] }
 0x1fa   : > { %9725 = vmatprep.mubr.msk.f32.mxu1 %vm10183_vm1, %v12520_v48  ;;  %9768 = vmatprep.mubr.msk.f32.mxu0 %vm10183_vm1, %v12520_v48  ;;  %v8516_v1 = vld [vmem:[%s12522_s22 + $0x68] sm:$0xff] }
 0x1fb   : > { %9831 = vmatpush3.msra.mxu0 %v8504_v18 }
 0x1fc   : > { %9832 = vmatprep.subr.mxu0 %v12520_v48 }
 0x1fd   : > { %9726 = vmatmul.mubr.msk.f32.gmra.mxu1 %vm1837_vm2, %v4686_v2  ;;  %9769 = vmatmul.mubr.msk.f32.gmra.mxu0 %vm1837_vm2, %v4878_v27  ;;  %v8515_v2 = vld [vmem:[%s12522_s22 + $0x60] sm:$0xff]  ;;  %v8514_v27 = vld [vmem:[%s12522_s22 + $0x58] sm:$0xff] }
 0x1fe   : > { %9728 = vmatprep.mubr.msk.f32.mxu1 %vm10183_vm1, %v12520_v48  ;;  %9771 = vmatprep.mubr.msk.f32.mxu0 %vm10183_vm1, %v12520_v48 }
 0x1ff   : > { %9833 = vmatpush3.msra.mxu0 %v8503_v14 }
 0x200   : > { %9834 = vmatprep.subr.mxu0 %v12520_v48 }
 0x201   : > { %9729 = vmatmul.mubr.msk.f32.gmra.mxu1 %vm1837_vm2, %v4688_v34  ;;  %9772 = vmatmul.mubr.msk.f32.gmra.mxu0 %vm1837_vm2, %v4880_v62  ;;  %v8513_v34 = vld [vmem:[%s12522_s22 + $0x50] sm:$0xff] }
 0x202   : > { %9731 = vmatprep.mubr.msk.f32.mxu1 %vm10183_vm1, %v12520_v48  ;;  %9774 = vmatprep.mubr.msk.f32.mxu0 %vm10183_vm1, %v12520_v48 }
 0x203   : > { %v4466_v43 = vpop.f32.mrf.mxu1  ;;  %v4619_v59 = vpop.f32.mrf.mxu0  ;;  %9835 = vmatpush3.msra.mxu0 %v8502_v37 }
 0x204   : > { %v11676_v9 = vadd.f32 %v4619_v59, %v4466_v43  ;;  %9845 = vmatprep.subr.mxu0 %v12520_v48 }
 0x205   : > { %v9623_v47 = vpop.f32.mrf.mxu1  ;;  %v9666_v30 = vpop.f32.mrf.mxu0  ;;  %9732 = vmatmul.mubr.msk.f32.gmra.mxu1 %vm1837_vm2, %v4690_v17  ;;  %9775 = vmatmul.mubr.msk.f32.gmra.mxu0 %vm1837_vm2, %v4882_v26 }
 0x206   : > { %9734 = vmatprep.mubr.msk.f32.mxu1 %vm10183_vm1, %v12520_v48  ;;  %9777 = vmatprep.mubr.msk.f32.mxu0 %vm10183_vm1, %v12520_v48 }
 0x209   : > { %9735 = vmatmul.mubr.msk.f32.gmra.mxu1 %vm1837_vm2, %v4692_v23  ;;  %9778 = vmatmul.mubr.msk.f32.gmra.mxu0 %vm1837_vm2, %v4884_v22 }
 0x20a   : > { %9737 = vmatprep.mubr.msk.f32.mxu1 %vm10183_vm1, %v12520_v48  ;;  %9780 = vmatprep.mubr.msk.f32.mxu0 %vm10183_vm1, %v12520_v48 }
 0x20c   : > { %v4471_v33 = vpop.f32.mrf.mxu1  ;;  %v4624_v40 = vpop.f32.mrf.mxu0 }
 0x20d   : > { %v11690_v61 = vadd.f32 %v4624_v40, %v4471_v33  ;;  %9738 = vmatmul.mubr.msk.f32.gmra.mxu1 %vm1837_vm2, %v4694_v6  ;;  %9781 = vmatmul.mubr.msk.f32.gmra.mxu0 %vm1837_vm2, %v4886_v52 }
 0x20e   : > { %v9626_v50 = vpop.f32.mrf.mxu1  ;;  %v9669_v54 = vpop.f32.mrf.mxu0  ;;  %9793 = vmatprep.mubr.msk.f32.mxu1 %vm10183_vm1, %v12520_v48  ;;  %9836 = vmatprep.mubr.msk.f32.mxu0 %vm10183_vm1, %v12520_v48 }
 0x211   : > { %9794 = vmatmul.mubr.msk.f32.vlgmr.msra.gmra.mxu1 %vm1837_vm2, %v5058_v51 }
 0x212   : > { %9796 = vmatprep.mubr.msk.f32.mxu1 %vm10183_vm1, %v12520_v48  ;;  %9865 = vmatpush3.msra.mxu1 %v8517_v57 }
 0x213   : > { %v4476_v8 = vpop.f32.mrf.mxu1  ;;  %v4629_v42 = vpop.f32.mrf.mxu0  ;;  %9866 = vmatprep.subr.mxu1 %v12520_v48 }
 0x214   : > { %v11701_v56 = vadd.f32 %v4629_v42, %v4476_v8  ;;  %9867 = vmatpush3.msra.mxu1 %v8516_v1 }
 0x215   : > { %v9629_v19 = vpop.f32.mrf.mxu1  ;;  %v9672_v60 = vpop.f32.mrf.mxu0  ;;  %9797 = vmatmul.mubr.msk.f32.gmra.mxu1 %vm1837_vm2, %v5060_v31  ;;  %9868 = vmatprep.subr.mxu1 %v12520_v48 }
 0x216   : > { %9799 = vmatprep.mubr.msk.f32.mxu1 %vm10183_vm1, %v12520_v48  ;;  %9869 = vmatpush3.msra.mxu1 %v8515_v2 }
 0x217   : > { %9870 = vmatprep.subr.mxu1 %v12520_v48 }
 0x218   : > { %9871 = vmatpush3.msra.mxu1 %v8514_v27 }
 0x219   : > { %9800 = vmatmul.mubr.msk.f32.gmra.mxu1 %vm1837_vm2, %v5062_v55  ;;  %9872 = vmatprep.subr.mxu1 %v12520_v48 }
 0x21a   : > { %9802 = vmatprep.mubr.msk.f32.mxu1 %vm10183_vm1, %v12520_v48  ;;  %9873 = vmatpush3.msra.mxu1 %v8513_v34 }
 0x21b   : > { %9902 = vmatprep.subr.mxu1 %v12520_v48 }
 0x21d   : > { %9803 = vmatmul.mubr.msk.f32.gmra.mxu1 %vm1837_vm2, %v5064_v29 }
 0x21e   : > { %9805 = vmatprep.mubr.msk.f32.mxu1 %vm10183_vm1, %v12520_v48 }
 0x221   : > { %9806 = vmatmul.mubr.msk.f32.gmra.mxu1 %vm1837_vm2, %v5066_v41 }
 0x222   : > { %9808 = vmatprep.mubr.msk.f32.mxu1 %vm10183_vm1, %v12520_v48 }
 0x225   : > { %9809 = vmatmul.mubr.msk.f32.gmra.mxu1 %vm1837_vm2, %v5068_v10 }
 0x226   : > { %9811 = vmatprep.mubr.msk.f32.mxu1 %vm10183_vm1, %v12520_v48 }
 0x229   : > { %9812 = vmatmul.mubr.msk.f32.gmra.mxu1 %vm1837_vm2, %v5070_v36 }
 0x22a   : > { %9814 = vmatprep.mubr.msk.f32.mxu1 %vm10183_vm1, %v12520_v48 }
 0x22d   : > { %9815 = vmatmul.mubr.msk.f32.gmra.mxu1 %vm1837_vm2, %v5072_v35 }
 0x22e   : > { %9817 = vmatprep.mubr.msk.f32.mxu1 %vm10183_vm1, %v12520_v48 }
 0x231   : > { %9818 = vmatmul.mubr.msk.f32.gmra.mxu1 %vm1837_vm2, %v5074_v20 }
 0x232   : > { %9820 = vmatprep.mubr.msk.f32.mxu1 %vm10183_vm1, %v12520_v48 }
 0x235   : > { %9821 = vmatmul.mubr.msk.f32.gmra.mxu1 %vm1837_vm2, %v5076_v53 }
 0x236   : > { %9823 = vmatprep.mubr.msk.f32.mxu1 %vm10183_vm1, %v12520_v48 }
 0x239   : > { %9824 = vmatmul.mubr.msk.f32.gmra.mxu1 %vm1837_vm2, %v5078_v28 }
 0x23a   : > { %9874 = vmatprep.mubr.msk.f32.mxu1 %vm10183_vm1, %v12520_v48 }
 0x23e   : > { %v4481_v38 = vpop.f32.mrf.mxu1  ;;  %v4634_v16 = vpop.f32.mrf.mxu0 }
 0x23f   : > { %v11733_v5 = vadd.f32 %v4634_v16, %v4481_v38 }
 0x240   : > { %v9632_v24 = vpop.f32.mrf.mxu1  ;;  %v9675_v15 = vpop.f32.mrf.mxu0 }
 0x246   : > { %v4486_v3 = vpop.f32.mrf.mxu1  ;;  %v4639_v46 = vpop.f32.mrf.mxu0 }
 0x247   : > { %v11735_v0 = vadd.f32 %v4639_v46, %v4486_v3 }
 0x248   : > { %v9635_v13 = vpop.f32.mrf.mxu1  ;;  %v9678_v63 = vpop.f32.mrf.mxu0 }
 0x24e   : > { %v4491_v12 = vpop.f32.mrf.mxu1  ;;  %v4644_v49 = vpop.f32.mrf.mxu0 }
 0x24f   : > { %v11737_v4 = vadd.f32 %v4644_v49, %v4491_v12 }
 0x250   : > { %v9638_v44 = vpop.f32.mrf.mxu1  ;;  %v9681_v32 = vpop.f32.mrf.mxu0 }
 0x256   : > { %v4496_v7 = vpop.f32.mrf.mxu1  ;;  %v4649_v58 = vpop.f32.mrf.mxu0 }
 0x257   : > { %v11739_v25 = vadd.f32 %v4649_v58, %v4496_v7 }
 0x258   : > { %v9641_v11 = vpop.f32.mrf.mxu1  ;;  %v9684_v21 = vpop.f32.mrf.mxu0 }
 0x28b   : > { %v4501_v62 = vpop.f32.mrf.mxu1  ;;  %v4654_v43 = vpop.f32.mrf.mxu0 }
 0x28c   : > { %v11781_v59 = vadd.f32 %v4654_v43, %v4501_v62 }
 0x28d   : > { %v9644_v17 = vpop.f32.mrf.mxu1  ;;  %v9687_v26 = vpop.f32.mrf.mxu0 }
 0x294   : > { %v4506_v47 = vpop.f32.mrf.mxu1  ;;  %v4659_v30 = vpop.f32.mrf.mxu0 }
 0x295   : > { %v11783_v23 = vadd.f32 %v4659_v30, %v4506_v47 }
 0x296   : > { %v9647_v22 = vpop.f32.mrf.mxu1  ;;  %v9690_v33 = vpop.f32.mrf.mxu0 }
 0x29b   : > { %v4511_v40 = vpop.f32.mrf.mxu1  ;;  %v4664_v6 = vpop.f32.mrf.mxu0 }
 0x29c   : > { %v11785_v52 = vadd.f32 %v4664_v6, %v4511_v40 }
 0x29d   : > { %v9650_v50 = vpop.f32.mrf.mxu1  ;;  %v9693_v54 = vpop.f32.mrf.mxu0 }
 0x29e   : > { %v11814_v54 = vld [vmem:[%s12478_s5 + $0x1] ss:$0 sm:$0xff] }
 0x2a1   : > { %v4516_v51 = vpop.f32.mrf.mxu1  ;;  %v4669_v8 = vpop.f32.mrf.mxu0 }
 0x2a2   : > { %v11787_v42 = vadd.f32 %v4669_v8, %v4516_v51 }
 0x2a3   : > { %v9653_v31 = vpop.f32.mrf.mxu1  ;;  %v9696_v19 = vpop.f32.mrf.mxu0 }
 0x2a5   : > { %v4800_v60 = vpop.f32.mrf.mxu1  ;;  %v4992_v55 = vpop.f32.mrf.mxu0 }
 0x2a6   : > { %v4854_v47 = vadd.f32 %v4800_v60, %v11676_v9 }
 0x2a7   : > { %v9709_v29 = vpop.f32.mrf.mxu1  ;;  %v9752_v41 = vpop.f32.mrf.mxu0 }
 0x2a8   : > { %v5046_v6 = vadd.f32 %v4992_v55, %v4854_v47 }
 0x2a9   : > { %v4805_v10 = vpop.f32.mrf.mxu1  ;;  %v4997_v36 = vpop.f32.mrf.mxu0 }
 0x2aa   : > { %v4855_v50 = vadd.f32 %v4805_v10, %v11690_v61 }
 0x2ab   : > { %v9712_v35 = vpop.f32.mrf.mxu1  ;;  %v9755_v20 = vpop.f32.mrf.mxu0 }
 0x2ac   : > { %v5047_v19 = vadd.f32 %v4997_v36, %v4855_v50 }
 0x2ad   : > { %v4810_v53 = vpop.f32.mrf.mxu1  ;;  %v5002_v28 = vpop.f32.mrf.mxu0 }
 0x2ae   : > { %v4856_v9 = vadd.f32 %v4810_v53, %v11701_v56 }
 0x2af   : > { %v9715_v38 = vpop.f32.mrf.mxu1  ;;  %v9758_v16 = vpop.f32.mrf.mxu0 }
 0x2b0   : > { %v5048_v55 = vadd.f32 %v5002_v28, %v4856_v9 }
 0x2b1   : > { %v4815_v24 = vpop.f32.mrf.mxu1  ;;  %v5007_v15 = vpop.f32.mrf.mxu0 }
 0x2b2   : > { %v4857_v61 = vadd.f32 %v4815_v24, %v11733_v5 }
 0x2b3   : > { %v9718_v3 = vpop.f32.mrf.mxu1  ;;  %v9761_v46 = vpop.f32.mrf.mxu0 }
 0x2b4   : > { %v5049_v36 = vadd.f32 %v5007_v15, %v4857_v61 }
 0x2b5   : > { %v4820_v13 = vpop.f32.mrf.mxu1  ;;  %v5012_v63 = vpop.f32.mrf.mxu0 }
 0x2b6   : > { %v4858_v56 = vadd.f32 %v4820_v13, %v11735_v0 }
 0x2b7   : > { %v9721_v12 = vpop.f32.mrf.mxu1  ;;  %v9764_v49 = vpop.f32.mrf.mxu0 }
 0x2b8   : > { %v5050_v5 = vadd.f32 %v5012_v63, %v4858_v56 }
 0x2b9   : > { %v4825_v44 = vpop.f32.mrf.mxu1  ;;  %v11789_v32 = vpop.f32.mrf.mxu0 }
 0x2ba   : > { %v4859_v24 = vadd.f32 %v4825_v44, %v11737_v4 }
 0x2bb   : > { %v9724_v7 = vpop.f32.mrf.mxu1  ;;  %v9767_v58 = vpop.f32.mrf.mxu0 }
 0x2bd   : > { %v4830_v11 = vpop.f32.mrf.mxu1  ;;  %v11791_v21 = vpop.f32.mrf.mxu0 }
 0x2bf   : > { %v9727_v39 = vpop.f32.mrf.mxu1  ;;  %v9770_v45 = vpop.f32.mrf.mxu0 }
 0x2c1   : > { %v11793_v18 = vpop.f32.mrf.mxu1  ;;  %v11795_v14 = vpop.f32.mrf.mxu0 }
 0x2c3   : > { %v9730_v57 = vpop.f32.mrf.mxu1  ;;  %v9773_v37 = vpop.f32.mrf.mxu0 }
 0x2c4   : > { %v5051_v37 = vadd.f32 %v11789_v32, %v4859_v24 }
 0x2c5   : > { %v11797_v1 = vpop.f32.mrf.mxu1  ;;  %v11799_v2 = vpop.f32.mrf.mxu0 }
 0x2c7   : > { %v9733_v27 = vpop.f32.mrf.mxu1  ;;  %v9776_v34 = vpop.f32.mrf.mxu0 }
 0x2c8   : > { %v4860_v27 = vadd.f32 %v4830_v11, %v11739_v25 }
 0x2c9   : > { %v11801_v62 = vpop.f32.mrf.mxu1  ;;  %v11803_v43 = vpop.f32.mrf.mxu0 }
 0x2cb   : > { %v9736_v17 = vpop.f32.mrf.mxu1  ;;  %v9779_v26 = vpop.f32.mrf.mxu0 }
 0x2cd   : > { %v11806_v30 = vpop.f32.mrf.mxu1  ;;  %v11808_v22 = vpop.f32.mrf.mxu0 }
 0x2cf   : > { %v9739_v33 = vpop.f32.mrf.mxu1  ;;  %v9782_v40 = vpop.f32.mrf.mxu0 }
 0x2d0   : > { %v5052_v33 = vadd.f32 %v11791_v21, %v4860_v27  ;;  %v4861_v40 = vadd.f32 %v11793_v18, %v11781_v59  ;;  %v4862_v21 = vadd.f32 %v11797_v1, %v11783_v23  ;;  %v5350_v27 = vld [vmem:[%s12522_s22 + $0x8] sm:$0xff] }
 0x2d1   : > { %v5184_v51 = vpop.f32.mrf.mxu1 }
 0x2d2   : > { %v5238_v8 = vadd.f32 %v5184_v51, %v5046_v6 }
 0x2d3   : > { %v9795_v31 = vpop.f32.mrf.mxu1 }
 0x2d4   : > { %v5255_v60 = vadd.f32 %v11814_v54, %v5238_v8 }
 0x2d5   : > { %v5189_v29 = vpop.f32.mrf.mxu1 }
 0x2d6   : > { %v5266_v41 = vmax.f32 %v5255_v60, 0.0  ;;  %v5239_v35 = vadd.f32 %v5189_v29, %v5047_v19  ;;  %v5053_v19 = vadd.f32 %v11795_v14, %v4861_v40  ;;  %v8530_v40 = vld [vmem:[%s12522_s22 + $0xa8] sm:$0xff] }
 0x2d7   : > { %v9798_v20 = vpop.f32.mrf.mxu1 }
 0x2d8   : > { %5277 = vst.msk [vmem:[#allocation3] sm:$0xff] %vm1837_vm2, %v5266_v41  ;;  %v5256_v10 = vadd.f32 %v11814_v54, %v5239_v35  ;;  %v5054_v20 = vadd.f32 %v11799_v2, %v4862_v21  ;;  %v4864_v2 = vadd.f32 %v11806_v30, %v11787_v42  ;;  %v5353_v42 = vld [vmem:[%s12522_s22 + $0x20] sm:$0xff] }
 0x2d9   : > { %v5194_v38 = vpop.f32.mrf.mxu1 }
 0x2da   : > { %v5267_v16 = vmax.f32 %v5256_v10, 0.0  ;;  %v5240_v3 = vadd.f32 %v5194_v38, %v5048_v55  ;;  %v4863_v55 = vadd.f32 %v11801_v62, %v11785_v52 }
 0x2db   : > { %v9801_v46 = vpop.f32.mrf.mxu1 }
 0x2dc   : > { %5278 = vst.msk [vmem:[#allocation3 + $0x8] sm:$0xff] %vm1837_vm2, %v5267_v16  ;;  %v5257_v53 = vadd.f32 %v11814_v54, %v5240_v3  ;;  %v5055_v46 = vadd.f32 %v11803_v43, %v4863_v55  ;;  %v8523_v55 = vld [vmem:[%s12522_s22 + $0x88] sm:$0xff] }
 0x2dd   : > { %v5199_v12 = vpop.f32.mrf.mxu1 }
 0x2de   : > { %v5268_v49 = vmax.f32 %v5257_v53, 0.0  ;;  %v5241_v28 = vadd.f32 %v5199_v12, %v5049_v36 }
 0x2df   : > { %v9804_v7 = vpop.f32.mrf.mxu1 }
 0x2e0   : > { %5279 = vst.msk [vmem:[#allocation3 + $0x10] sm:$0xff] %vm1837_vm2, %v5268_v49  ;;  %v5258_v58 = vadd.f32 %v11814_v54, %v5241_v28  ;;  %v5056_v28 = vadd.f32 %v11808_v22, %v4864_v2  ;;  %v5352_v22 = vld [vmem:[%s12522_s22 + $0x18] sm:$0xff]  ;;  %v5897_v2 = vld [vmem:[%s12477_s4 + $0x20] sm:$0xff] }
 0x2e1   : > { %v5204_v39 = vpop.f32.mrf.mxu1 }
 0x2e2   : > { %v5269_v45 = vmax.f32 %v5258_v58, 0.0  ;;  %v5242_v15 = vadd.f32 %v5204_v39, %v5050_v5 }
 0x2e3   : > { %v5288_v57 = vld [vmem:[#allocation3] ss:$2 sm:$0xff]  ;;  %v5300_v0 = vld [vmem:[#allocation3 + $0x1] ss:$2 sm:$0xff]  ;;  %v9807_v13 = vpop.f32.mrf.mxu1 }
 0x2e4   : > { %5280 = vst.msk [vmem:[#allocation3 + $0x18] sm:$0xff] %vm1837_vm2, %v5269_v45  ;;  %v5259_v63 = vadd.f32 %v11814_v54, %v5242_v15  ;;  %v5311_v4 = vmax.f32 %v5288_v57, %v5300_v0  ;;  %v5351_v0 = vld [vmem:[%s12522_s22 + $0x10] sm:$0xff] }
 0x2e5   : > { %v5209_v34 = vpop.f32.mrf.mxu1 }
 0x2e6   : > { %v5270_v44 = vmax.f32 %v5259_v63, 0.0  ;;  %v5243_v17 = vadd.f32 %v5209_v34, %v5051_v37 }
 0x2e7   : > { %v5318_v26 = vld [vmem:[#allocation3 + $0x2] ss:$2 sm:$0xff]  ;;  %v9810_v47 = vpop.f32.mrf.mxu1 }
 0x2e8   : > { %v5329_v6 = vmax.f32 %v5311_v4, %v5318_v26  ;;  %5281 = vst.msk [vmem:[#allocation3 + $0x20] sm:$0xff] %vm1837_vm2, %v5270_v44  ;;  %v5260_v25 = vadd.f32 %v11814_v54, %v5243_v17  ;;  %v5349_v44 = vld [vmem:[%s12522_s22] sm:$0xff]  ;;  %v8532_v17 = vld [vmem:[%s12522_s22 + $0xb8] sm:$0xff] }
 0x2e9   : > { %v5214_v32 = vpop.f32.mrf.mxu1 }
 0x2ea   : > { %5335 = vst.msk [vmem:[#allocation7] sm:$0xff] %vm1837_vm2, %v5329_v6  ;;  %v5271_v11 = vmax.f32 %v5260_v25, 0.0  ;;  %v5244_v50 = vadd.f32 %v5214_v32, %v5052_v33  ;;  %v8531_v33 = vld [vmem:[%s12522_s22 + $0xb0] sm:$0xff] }
 0x2eb   : > { %v5290_v51 = vld [vmem:[#allocation3 + $0x10] ss:$2 sm:$0xff]  ;;  %v5302_v8 = vld [vmem:[#allocation3 + $0x11] ss:$2 sm:$0xff]  ;;  %v9813_v31 = vpop.f32.mrf.mxu1 }
 0x2ec   : > { %5282 = vst.msk [vmem:[#allocation3 + $0x28] sm:$0xff] %vm1837_vm2, %v5271_v11  ;;  %v5261_v59 = vadd.f32 %v11814_v54, %v5244_v50  ;;  %v5312_v9 = vmax.f32 %v5290_v51, %v5302_v8  ;;  %v8529_v51 = vld [vmem:[%s12522_s22 + $0xa0] sm:$0xff] }
 0x2ed   : > { %v5219_v18 = vpop.f32.mrf.mxu1 }
 0x2ee   : > { %v5272_v60 = vmax.f32 %v5261_v59, 0.0  ;;  %v5245_v29 = vadd.f32 %v5219_v18, %v5053_v19 }
 0x2ef   : > { %v5320_v41 = vld [vmem:[#allocation3 + $0x12] ss:$2 sm:$0xff]  ;;  %v9816_v35 = vpop.f32.mrf.mxu1 }
 0x2f0   : > { %v5330_v61 = vmax.f32 %v5312_v9, %v5320_v41  ;;  %5283 = vst.msk [vmem:[#allocation3 + $0x30] sm:$0xff] %vm1837_vm2, %v5272_v60  ;;  %v5262_v23 = vadd.f32 %v11814_v54, %v5245_v29  ;;  %v8525_v9 = vld [vmem:[%s12522_s22 + $0x98] sm:$0xff]  ;;  %v8524_v41 = vld [vmem:[%s12522_s22 + $0x90] sm:$0xff] }
 0x2f1   : > { %v5224_v14 = vpop.f32.mrf.mxu1 }
 0x2f2   : > { %5336 = vst.msk [vmem:[#allocation7 + $0x8] sm:$0xff] %vm1837_vm2, %v5330_v61  ;;  %v5273_v1 = vmax.f32 %v5262_v23, 0.0  ;;  %v5246_v10 = vadd.f32 %v5224_v14, %v5054_v20  ;;  %v8522_v61 = vld [vmem:[%s12522_s22 + $0x80] sm:$0xff] }
 0x2f3   : > { %v5292_v38 = vld [vmem:[#allocation3 + $0x20] ss:$2 sm:$0xff]  ;;  %v5304_v16 = vld [vmem:[#allocation3 + $0x21] ss:$2 sm:$0xff]  ;;  %v9819_v3 = vpop.f32.mrf.mxu1 }
 0x2f4   : > { %5284 = vst.msk [vmem:[#allocation3 + $0x38] sm:$0xff] %vm1837_vm2, %v5273_v1  ;;  %v5263_v52 = vadd.f32 %v11814_v54, %v5246_v10  ;;  %v5313_v36 = vmax.f32 %v5292_v38, %v5304_v16  ;;  %v8521_v1 = vld [vmem:[%s12522_s22 + $0x78] sm:$0xff] }
 0x2f5   : > { %v5229_v62 = vpop.f32.mrf.mxu1 }
 0x2f6   : > { %v5274_v56 = vmax.f32 %v5263_v52, 0.0  ;;  %v5247_v53 = vadd.f32 %v5229_v62, %v5055_v46  ;;  %v8543_v46 = vld [vmem:[%s12477_s4 + $0x48] sm:$0xff]  ;;  %v8542_v52 = vld [vmem:[%s12477_s4 + $0x40] sm:$0xff]  ;;  %v5896_v62 = vld [vmem:[%s12477_s4 + $0x18] sm:$0xff] }
 0x2f7   : > { %v5322_v12 = vld [vmem:[#allocation3 + $0x22] ss:$2 sm:$0xff]  ;;  %v9822_v49 = vpop.f32.mrf.mxu1 }
 0x2f8   : > { %v5331_v7 = vmax.f32 %v5313_v36, %v5322_v12  ;;  %5285 = vst.msk [vmem:[#allocation3 + $0x40] sm:$0xff] %vm1837_vm2, %v5274_v56  ;;  %v5264_v43 = vadd.f32 %v11814_v54, %v5247_v53  ;;  %v8541_v36 = vld [vmem:[%s12477_s4 + $0x38] sm:$0xff]  ;;  %v5895_v56 = vld [vmem:[%s12477_s4 + $0x10] sm:$0xff]  ;;  %v5894_v12 = vld [vmem:[%s12477_s4 + $0x8] sm:$0xff] }
 0x2f9   : > { %v5234_v30 = vpop.f32.mrf.mxu1  ;;  %v5355_v5 = vld [vmem:[#allocation7 + $0x1] ss:$2 sm:$0xff]  ;;  %v5344_v60 = vld [vmem:[#allocation7] ss:$2 sm:$0xff] }
 0x2fa   : > { %5337 = vst.msk [vmem:[#allocation7 + $0x10] sm:$0xff] %vm1837_vm2, %v5331_v7  ;;  %v5275_v24 = vmax.f32 %v5264_v43, 0.0  ;;  %v5248_v58 = vadd.f32 %v5234_v30, %v5056_v28  ;;  %9837 = vmatmul.mubr.msk.f32.vlgmr.msra.gmra.mxu0 %vm1837_vm2, %v5355_v5  ;;  %v8540_v53 = vld [vmem:[%s12477_s4 + $0x30] sm:$0xff]  ;;  %v8539_v49 = vld [vmem:[%s12477_s4 + $0x28] sm:$0xff]  ;;  %v5893_v28 = vld [vmem:[%s12477_s4] sm:$0xff] }
 0x2fb   : > { %v5294_v39 = vld [vmem:[#allocation3 + $0x30] ss:$2 sm:$0xff]  ;;  %v5306_v45 = vld [vmem:[#allocation3 + $0x31] ss:$2 sm:$0xff]  ;;  %v9825_v15 = vpop.f32.mrf.mxu1  ;;  %9839 = vmatprep.mubr.msk.f32.mxu0 %vm10183_vm1, %v12520_v48  ;;  %9846 = vmatpush3.msra.mxu0 %v5353_v42 }
 0x2fc   : > { %5286 = vst.msk [vmem:[#allocation3 + $0x48] sm:$0xff] %vm1837_vm2, %v5275_v24  ;;  %v5265_v57 = vadd.f32 %v11814_v54, %v5248_v58  ;;  %9847 = vmatprep.subr.mxu0 %v12520_v48  ;;  %v5314_v13 = vmax.f32 %v5294_v39, %v5306_v45  ;;  %v8533_v54 = vld [vmem:[%s12522_s22 + $0xc0] sm:$0xff] }
 0x2fd   : > { %9848 = vmatpush3.msra.mxu0 %v5352_v22 }
 0x2fe   : > { %v5276_v37 = vmax.f32 %v5265_v57, 0.0  ;;  %9849 = vmatprep.subr.mxu0 %v12520_v48 }
 0x2ff   : > { %v5324_v63 = vld [vmem:[#allocation3 + $0x32] ss:$2 sm:$0xff]  ;;  %9850 = vmatpush3.msra.mxu0 %v5351_v0 }
 0x300   : > { %v5332_v34 = vmax.f32 %v5314_v13, %v5324_v63  ;;  %5287 = vst.msk [vmem:[#allocation3 + $0x50] sm:$0x1f] %vm4309_vm4, %v5276_v37  ;;  %9851 = vmatprep.subr.mxu0 %v12520_v48 }
 0x301   : > { %v5545_v4 = vld [vmem:[#allocation7 + $0x2] ss:$2 sm:$0xff]  ;;  %9852 = vmatpush3.msra.mxu0 %v5350_v27  ;;  %v5649_v10 = vld [vmem:[#allocation7 + $0x3] ss:$2 sm:$0xff] }
 0x302   : > { %5338 = vst.msk [vmem:[#allocation7 + $0x18] sm:$0xff] %vm1837_vm2, %v5332_v34  ;;  %9875 = vmatmul.mubr.msk.f32.vlgmr.msra.gmra.mxu1 %vm1837_vm2, %v5545_v4  ;;  %9853 = vmatprep.subr.mxu0 %v12520_v48  ;;  %v5753_v20 = vld [vmem:[#allocation7 + $0x4] ss:$2 sm:$0xff] }
 0x303   : > { %9877 = vmatprep.mubr.msk.f32.mxu1 %vm10183_vm1, %v12520_v48  ;;  %9903 = vmatpush3.msra.mxu1 %v8533_v54  ;;  %v5296_v26 = vld [vmem:[#allocation3 + $0x40] ss:$2 sm:$0xff]  ;;  %v5308_v47 = vld [vmem:[#allocation3 + $0x41] ss:$2 sm:$0xff] }
 0x304   : > { %9904 = vmatprep.subr.mxu1 %v12520_v48  ;;  %9854 = vmatpush3.msra.mxu0 %v5349_v44  ;;  %v5315_v6 = vmax.f32 %v5296_v26, %v5308_v47 }
 0x305   : > { %9905 = vmatpush3.msra.mxu1 %v8532_v17  ;;  %9883 = vmatprep.subr.mxu0 %v12520_v48 }
 0x306   : > { %9906 = vmatprep.subr.mxu1 %v12520_v48 }
 0x307   : > { %v5298_v25 = vld [vmem:[#allocation3 + $0x50] ss:$2 sm:$0x3]  ;;  %v5310_v32 = vld [vmem:[#allocation3 + $0x51] ss:$2 sm:$0x3]  ;;  %9907 = vmatpush3.msra.mxu1 %v8531_v33 }
 0x308   : > { %v5316_v11 = vmax.f32 %v5298_v25, %v5310_v32  ;;  %v5326_v50 = vld [vmem:[#allocation3 + $0x42] ss:$2 sm:$0xff]  ;;  %9908 = vmatprep.subr.mxu1 %v12520_v48  ;;  %v5328_v8 = vld [vmem:[#allocation3 + $0x52] ss:$2 sm:$0x3] }
 0x309   : > { %v5333_v31 = vmax.f32 %v5315_v6, %v5326_v50  ;;  %v5357_v19 = vld [vmem:[#allocation7 + $0x11] ss:$2 sm:$0xff]  ;;  %9909 = vmatpush3.msra.mxu1 %v8530_v40  ;;  %v5346_v35 = vld [vmem:[#allocation7 + $0x10] ss:$2 sm:$0xff] }
 0x30a   : > { %v5334_v21 = vmax.f32 %v5316_v11, %v5328_v8  ;;  %9840 = vmatmul.mubr.msk.f32.gmra.mxu0 %vm1837_vm2, %v5357_v19  ;;  %9910 = vmatprep.subr.mxu1 %v12520_v48  ;;  %v8537_v32 = vld [vmem:[%s12478_s5 + $0x2] ss:$0 sm:$0xff] }
 0x30b   : > { %5339 = vst.msk [vmem:[#allocation7 + $0x20] sm:$0xff] %vm1837_vm2, %v5333_v31  ;;  %9842 = vmatprep.mubr.msk.f32.mxu0 %vm10183_vm1, %v12520_v48  ;;  %9911 = vmatpush3.msra.mxu1 %v8529_v51 }
 0x30c   : > { %5341 = vst.msk [vmem:[#allocation7 + $0x28] sm:$0x3] %vm5340_vm5, %v5334_v21  ;;  %9934 = vmatprep.subr.mxu1 %v12520_v48 }
 0x312   : > { %v5359_v59 = vld [vmem:[#allocation7 + $0x21] ss:$2 sm:$0x7]  ;;  %v5547_v18 = vld [vmem:[#allocation7 + $0x12] ss:$2 sm:$0xff] }
 0x313   : > { %9843 = vmatmul.mubr.msk.f32.gmra.mxu0 %vm1837_vm2, %v5359_v59  ;;  %9878 = vmatmul.mubr.msk.f32.gmra.mxu1 %vm1837_vm2, %v5547_v18  ;;  %v5549_v29 = vld [vmem:[#allocation7 + $0x22] ss:$2 sm:$0x7]  ;;  %v5651_v16 = vld [vmem:[#allocation7 + $0x13] ss:$2 sm:$0xff] }
 0x314   : > { %9855 = vmatprep.mubr.msk.f32.mxu0 %vm10183_vm1, %v12520_v48  ;;  %9880 = vmatprep.mubr.msk.f32.mxu1 %vm10183_vm1, %v12520_v48  ;;  %v5348_v23 = vld [vmem:[#allocation7 + $0x20] ss:$2 sm:$0x7]  ;;  %v5653_v3 = vld [vmem:[#allocation7 + $0x23] ss:$2 sm:$0x7] }
 0x315   : > { %v5755_v14 = vld [vmem:[#allocation7 + $0x14] ss:$2 sm:$0xff]  ;;  %v5757_v38 = vld [vmem:[#allocation7 + $0x24] ss:$2 sm:$0x7] }
 0x317   : > { %9856 = vmatmul.mubr.msk.f32.vlgmr.msra.gmra.mxu0 %vm1837_vm2, %v5344_v60  ;;  %9881 = vmatmul.mubr.msk.f32.gmra.mxu1 %vm1837_vm2, %v5549_v29 }
 0x318   : > { %9884 = vmatpush3.msra.mxu0 %v8525_v9  ;;  %9858 = vmatprep.mubr.msk.f32.mxu0 %vm10183_vm1, %v12520_v48 }
 0x319   : > { %9885 = vmatprep.subr.mxu0 %v12520_v48  ;;  %9912 = vmatprep.mubr.msk.f32.mxu1 %vm10183_vm1, %v12520_v48 }
 0x31a   : > { %9886 = vmatpush3.msra.mxu0 %v8524_v41 }
 0x31b   : > { %9859 = vmatmul.mubr.msk.f32.gmra.mxu0 %vm1837_vm2, %v5346_v35  ;;  %9913 = vmatmul.mubr.msk.f32.vlgmr.msra.gmra.mxu1 %vm1837_vm2, %v5753_v20 }
 0x31c   : > { %9887 = vmatprep.subr.mxu0 %v12520_v48  ;;  %9861 = vmatprep.mubr.msk.f32.mxu0 %vm10183_vm1, %v12520_v48 }
 0x31d   : > { %9888 = vmatpush3.msra.mxu0 %v8523_v55  ;;  %9915 = vmatprep.mubr.msk.f32.mxu1 %vm10183_vm1, %v12520_v48 }
 0x31e   : > { %9889 = vmatprep.subr.mxu0 %v12520_v48  ;;  %9935 = vmatpush3.msra.mxu1 %v5897_v2 }
 0x31f   : > { %9862 = vmatmul.mubr.msk.f32.gmra.mxu0 %vm1837_vm2, %v5348_v23  ;;  %9916 = vmatmul.mubr.msk.f32.gmra.mxu1 %vm1837_vm2, %v5755_v14 }
 0x320   : > { %9890 = vmatpush3.msra.mxu0 %v8522_v61  ;;  %9893 = vmatprep.mubr.msk.f32.mxu0 %vm10183_vm1, %v12520_v48 }
 0x321   : > { %9891 = vmatprep.subr.mxu0 %v12520_v48  ;;  %9918 = vmatprep.mubr.msk.f32.mxu1 %vm10183_vm1, %v12520_v48 }
 0x322   : > { %9892 = vmatpush3.msra.mxu0 %v8521_v1  ;;  %9936 = vmatprep.subr.mxu1 %v12520_v48 }
 0x323   : > { %9894 = vmatmul.mubr.msk.f32.vlgmr.msra.gmra.mxu0 %vm1837_vm2, %v5649_v10  ;;  %9919 = vmatmul.mubr.msk.f32.gmra.mxu1 %vm1837_vm2, %v5757_v38 }
 0x324   : > { %9896 = vmatprep.mubr.msk.f32.mxu0 %vm10183_vm1, %v12520_v48  ;;  %9921 = vmatprep.subr.mxu0 %v12520_v48 }
 0x325   : > { %9944 = vmatprep.mubr.msk.f32.mxu1 %vm10183_vm1, %v12520_v48  ;;  %9922 = vmatpush3.msra.mxu0 %v8543_v46 }
 0x326   : > { %9923 = vmatprep.subr.mxu0 %v12520_v48  ;;  %9937 = vmatpush3.msra.mxu1 %v5896_v62 }
 0x327   : > { %9897 = vmatmul.mubr.msk.f32.gmra.mxu0 %vm1837_vm2, %v5651_v16  ;;  %9938 = vmatprep.subr.mxu1 %v12520_v48 }
 0x328   : > { %9899 = vmatprep.mubr.msk.f32.mxu0 %vm10183_vm1, %v12520_v48  ;;  %9924 = vmatpush3.msra.mxu0 %v8542_v52 }
 0x329   : > { %9925 = vmatprep.subr.mxu0 %v12520_v48  ;;  %9939 = vmatpush3.msra.mxu1 %v5895_v56 }
 0x32a   : > { %9926 = vmatpush3.msra.mxu0 %v8541_v36  ;;  %9940 = vmatprep.subr.mxu1 %v12520_v48 }
 0x32b   : > { %9900 = vmatmul.mubr.msk.f32.gmra.mxu0 %vm1837_vm2, %v5653_v3  ;;  %9927 = vmatprep.subr.mxu0 %v12520_v48 }
 0x32c   : > { %9931 = vmatprep.mubr.msk.f32.mxu0 %vm10183_vm1, %v12520_v48  ;;  %9928 = vmatpush3.msra.mxu0 %v8540_v53  ;;  %v8550_v53 = vld [vmem:[%s12477_s4 + $0x70] sm:$0xff] }
 0x32d   : > { %9941 = vmatpush3.msra.mxu1 %v5894_v12  ;;  %9929 = vmatprep.subr.mxu0 %v12520_v48  ;;  %v8556_v12 = vld [vmem:[%s12477_s4 + $0x98] sm:$0xff] }
 0x32e   : > { %9942 = vmatprep.subr.mxu1 %v12520_v48  ;;  %9930 = vmatpush3.msra.mxu0 %v8539_v49 }
 0x32f   : > { %9943 = vmatpush3.msra.mxu1 %v5893_v28  ;;  %9947 = vmatprep.subr.mxu0 %v12520_v48 }
 0x330   : > { %9960 = vmatprep.subr.mxu1 %v12520_v48 }
 0x3ba   : > { %v5441_v7 = vpop.f32.mrf.mxu0 }
 0x3bc   : > { %v9838_v43 = vpop.f32.mrf.mxu0 }
 0x3bd   : > { %v8555_v43 = vld [vmem:[%s12477_s4 + $0x90] sm:$0xff] }
 0x3c2   : > { %v5631_v42 = vpop.f32.mrf.mxu1 }
 0x3c4   : > { %v9876_v30 = vpop.f32.mrf.mxu1 }
 0x3c5   : > { %v8554_v30 = vld [vmem:[%s12477_s4 + $0x88] sm:$0xff] }
 0x3ca   : > { %v5446_v5 = vpop.f32.mrf.mxu0 }
 0x3cc   : > { %v9841_v24 = vpop.f32.mrf.mxu0 }
 0x3cd   : > { %v8553_v24 = vld [vmem:[%s12477_s4 + $0x80] sm:$0xff] }
 0x3d3   : > { %v5451_v58 = vpop.f32.mrf.mxu0  ;;  %v5636_v22 = vpop.f32.mrf.mxu1 }
 0x3d5   : > { %v9844_v39 = vpop.f32.mrf.mxu0  ;;  %v9879_v45 = vpop.f32.mrf.mxu1 }
 0x3d6   : > { %v8562_v39 = vld [vmem:[%s12477_s4 + $0xc0] sm:$0xff] }
 0x3d7   : > { %v5530_v15 = vpop.f32.mrf.mxu0  ;;  %v5641_v57 = vpop.f32.mrf.mxu1 }
 0x3d8   : > { %v5531_v54 = vadd.f32 %v5530_v15, %v5441_v7  ;;  %v8549_v7 = vld [vmem:[%s12477_s4 + $0x68] sm:$0xff] }
 0x3d9   : > { %v9857_v0 = vpop.f32.mrf.mxu0  ;;  %v9882_v13 = vpop.f32.mrf.mxu1 }
 0x3da   : > { %v5645_v33 = vadd.f32 %v5631_v42, %v5531_v54  ;;  %v8548_v42 = vld [vmem:[%s12477_s4 + $0x60] sm:$0xff]  ;;  %v8560_v0 = vld [vmem:[%s12477_s4 + $0xb0] sm:$0xff]  ;;  %v8559_v13 = vld [vmem:[%s12477_s4 + $0xa8] sm:$0xff] }
 0x3db   : > { %v5535_v37 = vpop.f32.mrf.mxu0  ;;  %v5839_v27 = vpop.f32.mrf.mxu1  ;;  %v6324_v54 = vld [vmem:[%s12479_s6 + $0x38] sm:$0xff] }
 0x3dc   : > { %v5536_v47 = vadd.f32 %v5535_v37, %v5446_v5  ;;  %v8547_v5 = vld [vmem:[%s12477_s4 + $0x58] sm:$0xff]  ;;  %v8558_v37 = vld [vmem:[%s12477_s4 + $0xa0] sm:$0xff] }
 0x3dd   : > { %v9860_v63 = vpop.f32.mrf.mxu0  ;;  %v9914_v34 = vpop.f32.mrf.mxu1 }
 0x3de   : > { %v5646_v31 = vadd.f32 %v5636_v22, %v5536_v47  ;;  %v8552_v22 = vld [vmem:[%s12477_s4 + $0x78] sm:$0xff]  ;;  %v6326_v63 = vld [vmem:[%s12479_s6 + $0x48] sm:$0xff]  ;;  %v6325_v34 = vld [vmem:[%s12479_s6 + $0x40] sm:$0xff] }
 0x3df   : > { %v5540_v4 = vpop.f32.mrf.mxu0  ;;  %v5844_v44 = vpop.f32.mrf.mxu1  ;;  %v6319_v47 = vld [vmem:[%s12479_s6 + $0x10] sm:$0xff] }
 0x3e0   : > { %v5541_v51 = vadd.f32 %v5540_v4, %v5451_v58  ;;  %v8546_v58 = vld [vmem:[%s12477_s4 + $0x50] sm:$0xff] }
 0x3e1   : > { %v9863_v17 = vpop.f32.mrf.mxu0  ;;  %v9917_v26 = vpop.f32.mrf.mxu1  ;;  %v6323_v4 = vld [vmem:[%s12479_s6 + $0x30] sm:$0xff] }
 0x3e2   : > { %v5647_v29 = vadd.f32 %v5641_v57, %v5541_v51  ;;  %v8561_v57 = vld [vmem:[%s12477_s4 + $0xb8] sm:$0xff]  ;;  %v6321_v17 = vld [vmem:[%s12479_s6 + $0x20] sm:$0xff] }
 0x3e3   : > { %v5735_v40 = vpop.f32.mrf.mxu0  ;;  %v5849_v6 = vpop.f32.mrf.mxu1  ;;  %v6320_v26 = vld [vmem:[%s12479_s6 + $0x18] sm:$0xff] }
 0x3e4   : > { %v5749_v25 = vadd.f32 %v5735_v40, %v5645_v33  ;;  %v6318_v33 = vld [vmem:[%s12479_s6 + $0x8] sm:$0xff]  ;;  %v6317_v40 = vld [vmem:[%s12479_s6] sm:$0xff] }
 0x3e5   : > { %v9895_v11 = vpop.f32.mrf.mxu0  ;;  %v9920_v50 = vpop.f32.mrf.mxu1 }
 0x3e6   : > { %v5853_v8 = vadd.f32 %v5839_v27, %v5749_v25 }
 0x3e7   : > { %v5740_v19 = vpop.f32.mrf.mxu0 }
 0x3e8   : > { %v5862_v21 = vadd.f32 %v8537_v32, %v5853_v8  ;;  %v5750_v59 = vadd.f32 %v5740_v19, %v5646_v31 }
 0x3e9   : > { %v9898_v18 = vpop.f32.mrf.mxu0 }
 0x3ea   : > { %v5865_v9 = vmax.f32 %v5862_v21, 0.0  ;;  %v5854_v60 = vadd.f32 %v5844_v44, %v5750_v59  ;;  %v6322_v44 = vld [vmem:[%s12479_s6 + $0x28] sm:$0xff]  ;;  %v8564_v18 = vld [vmem:[%s12478_s5 + $0x3] ss:$0 sm:$0xff] }
 0x3eb   : > { %v5745_v41 = vpop.f32.mrf.mxu0 }
 0x3ec   : > { %5868 = vst.msk [vmem:[#allocation4] sm:$0xff] %vm1837_vm2, %v5865_v9  ;;  %v5863_v35 = vadd.f32 %v8537_v32, %v5854_v60  ;;  %v5751_v20 = vadd.f32 %v5745_v41, %v5647_v29 }
 0x3ed   : > { %v9901_v55 = vpop.f32.mrf.mxu0 }
 0x3ee   : > { %v5866_v61 = vmax.f32 %v5863_v35, 0.0  ;;  %v5855_v23 = vadd.f32 %v5849_v6, %v5751_v20 }
 0x3f0   : > { %5869 = vst.msk [vmem:[#allocation4 + $0x8] sm:$0xff] %vm1837_vm2, %v5866_v61  ;;  %v5864_v14 = vadd.f32 %v8537_v32, %v5855_v23 }
 0x3f2   : > { %v5867_v1 = vmax.f32 %v5864_v14, 0.0 }
 0x3f4   : > { %5871 = vst.msk [vmem:[#allocation4 + $0x10] sm:$0x7] %vm5870_vm6, %v5867_v1 }
 0x3f7   : > { %v5872_v10 = vld [vmem:[#allocation4] ss:$2 sm:$0xff]  ;;  %v5876_v38 = vld [vmem:[#allocation4 + $0x1] ss:$2 sm:$0xff] }
 0x3f8   : > { %v5879_v16 = vmax.f32 %v5872_v10, %v5876_v38  ;;  %v10184_v10 = vmov 1966171168  }
 0x3f9   : > { %v6405_v38 = vunpack.c.l.s4 %v10184_v10 }
 0x3fb   : > { %v5874_v3 = vld [vmem:[#allocation4 + $0x10] ss:$2 sm:$0x1]  ;;  %v5878_v46 = vld [vmem:[#allocation4 + $0x11] ss:$2 sm:$0x1] }
 0x3fc   : > { %v5880_v2 = vmax.f32 %v5874_v3, %v5878_v46  ;;  %v5882_v52 = vld [vmem:[#allocation4 + $0x2] ss:$2 sm:$0xff]  ;;  %v5884_v62 = vld [vmem:[#allocation4 + $0x12] ss:$2 sm:$0x1]  ;;  %v6406_v3 = vunpack.c.0.s8 %v6405_v38 }
 0x3fd   : > { %v5885_v36 = vmax.f32 %v5879_v16, %v5882_v52  ;;  %v6407_v16 = vlaneseq }
 0x3fe   : > { %v5886_v56 = vmax.f32 %v5880_v2, %v5884_v62 }
 0x3ff   : > { %5887 = vst.msk [vmem:[#allocation8] sm:$0xff] %vm1837_vm2, %v5885_v36  ;;  %v6408_v46 = vshrl.u32 %v6407_v16, 7  ;;  %vm6423_vm8 = vcmp.lt.s32.totalorder %v6407_v16, 256 }
 0x400   : > { %5889 = vst.msk [vmem:[#allocation8 + $0x8] sm:$0x1] %vm5888_vm7, %v5886_v56 }
 0x401   : > { %v6409_v52 = vsub.s32 %v6406_v3, %v6408_v46  ;;  %v8604_v3 = vld [vmem:[%s12481_s8 + $0xb0] sm:$0xff]  ;;  %v8603_v46 = vld [vmem:[%s12481_s8 + $0xa8] sm:$0xff] }
 0x406   : > { %v5899_v49 = vld [vmem:[#allocation8 + $0x1] ss:$2 sm:$0x7]  ;;  %v5892_v28 = vld [vmem:[#allocation8] ss:$2 sm:$0x7] }
 0x407   : > { %9932 = vmatmul.mubr.msk.f32.vlgmr.msra.gmra.mxu0 %vm1837_vm2, %v5899_v49  ;;  %9945 = vmatmul.mubr.msk.f32.vlgmr.msra.gmra.mxu1 %vm1837_vm2, %v5892_v28  ;;  %v6053_v45 = vld [vmem:[#allocation8 + $0x2] ss:$2 sm:$0x7]  ;;  %v6135_v15 = vld [vmem:[#allocation8 + $0x3] ss:$2 sm:$0x7] }
 0x408   : > { %9948 = vmatpush3.msra.mxu0 %v8550_v53  ;;  %9961 = vmatpush3.msra.mxu1 %v8556_v12  ;;  %v6217_v27 = vld [vmem:[#allocation8 + $0x4] ss:$2 sm:$0x7]  ;;  %v6315_v53 = vld [vmem:[%s12480_s7] sm:$0x3] }
 0x409   : > { %9949 = vmatprep.subr.mxu0 %v12520_v48  ;;  %9962 = vmatprep.subr.mxu1 %v12520_v48 }
 0x40a   : > { %9950 = vmatpush3.msra.mxu0 %v8549_v7  ;;  %9963 = vmatpush3.msra.mxu1 %v8555_v43  ;;  %v6495_v7 = vld [vmem:[%s12481_s8 + $0x18] sm:$0xff]  ;;  %v6494_v43 = vld [vmem:[%s12481_s8 + $0x10] sm:$0xff] }
 0x40b   : > { %9951 = vmatprep.subr.mxu0 %v12520_v48  ;;  %9964 = vmatprep.subr.mxu1 %v12520_v48 }
 0x40c   : > { %9952 = vmatpush3.msra.mxu0 %v8548_v42  ;;  %9965 = vmatpush3.msra.mxu1 %v8554_v30  ;;  %v6493_v42 = vld [vmem:[%s12481_s8 + $0x8] sm:$0xff] }
 0x40d   : > { %9953 = vmatprep.subr.mxu0 %v12520_v48  ;;  %9966 = vmatprep.subr.mxu1 %v12520_v48 }
 0x40e   : > { %9954 = vmatpush3.msra.mxu0 %v8547_v5  ;;  %9967 = vmatpush3.msra.mxu1 %v8553_v24 }
 0x40f   : > { %9955 = vmatprep.subr.mxu0 %v12520_v48  ;;  %9968 = vmatprep.subr.mxu1 %v12520_v48 }
 0x410   : > { %9956 = vmatpush3.msra.mxu0 %v8546_v58  ;;  %9957 = vmatprep.mubr.msk.f32.mxu0 %vm10183_vm1, %v12520_v48  ;;  %v6492_v58 = vld [vmem:[%s12481_s8] sm:$0xff] }
 0x411   : > { %9969 = vmatpush3.msra.mxu1 %v8552_v22  ;;  %9970 = vmatprep.mubr.msk.f32.mxu1 %vm10183_vm1, %v12520_v48 }
 0x412   : > { %9958 = vmatmul.mubr.msk.f32.vlgmr.msra.gmra.mxu0 %vm1837_vm2, %v6053_v45  ;;  %9971 = vmatmul.mubr.msk.f32.vlgmr.msra.gmra.mxu1 %vm1837_vm2, %v6135_v15 }
 0x413   : > { %9973 = vmatprep.subr.mxu0 %v12520_v48  ;;  %9983 = vmatprep.mubr.msk.f32.mxu0 %vm10183_vm1, %v12520_v48 }
 0x414   : > { %9974 = vmatpush3.msra.mxu0 %v8562_v39  ;;  %6394 = vmatprep.mubr.f32.mxu1 %v12520_v48 }
 0x415   : > { %9975 = vmatprep.subr.mxu0 %v12520_v48  ;;  %6352 = vmatprep.subr.mxu1 %v6326_v63  ;;  %v8576_v63 = vld [vmem:[%s12481_s8 + $0x30] sm:$0xff] }
 0x416   : > { %9976 = vmatpush3.msra.mxu0 %v8561_v57  ;;  %6353 = vmatpush1.msra.mxu1 %v6325_v34  ;;  %v8575_v34 = vld [vmem:[%s12481_s8 + $0x28] sm:$0xff] }
 0x417   : > { %9977 = vmatprep.subr.mxu0 %v12520_v48  ;;  %6354 = vmatprep.subr.mxu1 %v6324_v54  ;;  %v8574_v54 = vld [vmem:[%s12481_s8 + $0x20] sm:$0xff] }
 0x418   : > { %9978 = vmatpush3.msra.mxu0 %v8560_v0  ;;  %6355 = vmatpush1.msra.mxu1 %v6323_v4  ;;  %v8584_v4 = vld [vmem:[%s12481_s8 + $0x58] sm:$0xff] }
 0x419   : > { %9979 = vmatprep.subr.mxu0 %v12520_v48  ;;  %6356 = vmatprep.subr.mxu1 %v6322_v44  ;;  %v8572_v44 = vld [vmem:[%s12482_s9] ss:$0 sm:$0xff] }
 0x41a   : > { %9980 = vmatpush3.msra.mxu0 %v8559_v13  ;;  %6357 = vmatpush1.msra.mxu1 %v6321_v17 }
 0x41b   : > { %9981 = vmatprep.subr.mxu0 %v12520_v48  ;;  %6358 = vmatprep.subr.mxu1 %v6320_v26 }
 0x41c   : > { %9982 = vmatpush3.msra.mxu0 %v8558_v37  ;;  %6359 = vmatpush1.msra.mxu1 %v6319_v47  ;;  %v8577_v37 = vld [vmem:[%s12481_s8 + $0x38] sm:$0xff] }
 0x41d   : > { %9984 = vmatmul.mubr.msk.f32.vlgmr.msra.gmra.mxu0 %vm1837_vm2, %v6217_v27  ;;  %9986 = vmatprep.subr.mxu0 %v12520_v48 }
 0x41e   : > { %9994 = vmatprep.mubr.msk.f32.mxu0 %vm10183_vm1, %v12520_v48  ;;  %6360 = vmatprep.subr.mxu1 %v6318_v33 }
 0x41f   : > { %6361 = vmatpush1.msra.mxu1 %v6317_v40  ;;  %9987 = vmatpush3.msra.mxu0 %v6495_v7  ;;  %v8583_v40 = vld [vmem:[%s12481_s8 + $0x50] sm:$0xff]  ;;  %v7012_v7 = vld [vmem:[%s12483_s10] sm:$0xff] }
 0x420   : > { %10008 = vmatprep.subr.mxu1 %v12520_v48  ;;  %9988 = vmatprep.subr.mxu0 %v12520_v48 }
 0x421   : > { %9989 = vmatpush3.msra.mxu0 %v6494_v43  ;;  %v8607_v43 = vld [vmem:[%s12482_s9 + $0x5] ss:$0 sm:$0xff] }
 0x422   : > { %9990 = vmatprep.subr.mxu0 %v12520_v48 }
 0x423   : > { %9991 = vmatpush3.msra.mxu0 %v6493_v42 }
 0x424   : > { %9992 = vmatprep.subr.mxu0 %v12520_v48 }
 0x425   : > { %9993 = vmatpush3.msra.mxu0 %v6492_v58  ;;  %v7103_v58 = vld [vmem:[%s12486_s13 + $0x8] sm:$0xff] }
 0x426   : > { %9997 = vmatprep.subr.mxu0 %v12520_v48 }
 0x4c7   : > { %v5975_v6 = vpop.f32.mrf.mxu0  ;;  %v6048_v25 = vpop.f32.mrf.mxu1 }
 0x4c8   : > { %v6049_v19 = vadd.f32 %v6048_v25, %v5975_v6  ;;  %v8582_v6 = vld [vmem:[%s12481_s8 + $0x48] sm:$0xff]  ;;  %v8581_v25 = vld [vmem:[%s12481_s8 + $0x40] sm:$0xff] }
 0x4c9   : > { %v9933_v32 = vpop.f32.mrf.mxu0  ;;  %v9946_v11 = vpop.f32.mrf.mxu1 }
 0x4ca   : > { %v8591_v32 = vld [vmem:[%s12481_s8 + $0x78] sm:$0xff]  ;;  %v8579_v11 = vld [vmem:[%s12482_s9 + $0x1] ss:$0 sm:$0xff] }
 0x4d2   : > { %v6129_v50 = vpop.f32.mrf.mxu0  ;;  %v6211_v51 = vpop.f32.mrf.mxu1 }
 0x4d3   : > { %v6133_v21 = vadd.f32 %v6129_v50, %v6049_v19  ;;  %v8590_v19 = vld [vmem:[%s12481_s8 + $0x70] sm:$0xff] }
 0x4d4   : > { %v9959_v8 = vpop.f32.mrf.mxu0  ;;  %v9972_v31 = vpop.f32.mrf.mxu1 }
 0x4d5   : > { %v6215_v59 = vadd.f32 %v6211_v51, %v6133_v21  ;;  %v8589_v21 = vld [vmem:[%s12481_s8 + $0x68] sm:$0xff] }
 0x4dd   : > { %v6293_v9 = vpop.f32.mrf.mxu0 }
 0x4de   : > { %v6297_v60 = vadd.f32 %v6293_v9, %v6215_v59  ;;  %v8588_v59 = vld [vmem:[%s12481_s8 + $0x60] sm:$0xff] }
 0x4df   : > { %v9985_v29 = vpop.f32.mrf.mxu0  ;;  %v8586_v9 = vld [vmem:[%s12482_s9 + $0x2] ss:$0 sm:$0xff] }
 0x4e0   : > { %v6304_v41 = vadd.f32 %v8564_v18, %v6297_v60  ;;  %v8598_v18 = vld [vmem:[%s12481_s8 + $0x98] sm:$0xff] }
 0x4e2   : > { %v6305_v35 = vmax.f32 %v6304_v41, 0.0 }
 0x4e4   : > { %6306 = vst.msk [vmem:[#allocation5] sm:$0x7] %vm5870_vm6, %v6305_v35 }
 0x4eb   : > { %v6307_v20 = vld [vmem:[#allocation5] ss:$2 sm:$0x1]  ;;  %v6309_v55 = vld [vmem:[#allocation5 + $0x1] ss:$2 sm:$0x1] }
 0x4ec   : > { %v6310_v61 = vmax.f32 %v6307_v20, %v6309_v55  ;;  %v6312_v23 = vld [vmem:[#allocation5 + $0x2] ss:$2 sm:$0x1]  ;;  %v8596_v55 = vld [vmem:[%s12481_s8 + $0x88] sm:$0xff] }
 0x4ed   : > { %v8597_v20 = vld [vmem:[%s12481_s8 + $0x90] sm:$0xff] }
 0x4ee   : > { %v6313_v14 = vmax.f32 %v6310_v61, %v6312_v23  ;;  %v8595_v61 = vld [vmem:[%s12481_s8 + $0x80] sm:$0xff]  ;;  %v8605_v23 = vld [vmem:[%s12481_s8 + $0xb8] sm:$0xff] }
 0x4f0   : > { %6314 = vst.msk [vmem:[#allocation9] sm:$0x1] %vm5888_vm7, %v6313_v14  ;;  %v8593_v14 = vld [vmem:[%s12482_s9 + $0x3] ss:$0 sm:$0xff] }
 0x4f7   : > { %v6316_v1 = vld [vmem:[#allocation9] sm:$0x1] }
 0x4f8   : > { %8565 = vmatmul.mubr.msk.f32.vlgmr.msra.gmra.mxu1 %vm1837_vm2, %v6316_v1 }
 0x4f9   : > { %10016 = vmatprep.mubr.msk.f32.mxu1 %vm10183_vm1, %v12520_v48  ;;  %10009 = vmatpush3.msra.mxu1 %v8584_v4  ;;  %v7259_v4 = vld [vmem:[%s12488_s15] sm:$0xff] }
 0x4fa   : > { %10010 = vmatprep.subr.mxu1 %v12520_v48 }
 0x4fb   : > { %10011 = vmatpush3.msra.mxu1 %v8583_v40 }
 0x4fc   : > { %10012 = vmatprep.subr.mxu1 %v12520_v48 }
 0x4fd   : > { %10013 = vmatpush3.msra.mxu1 %v8582_v6 }
 0x4fe   : > { %10014 = vmatprep.subr.mxu1 %v12520_v48 }
 0x4ff   : > { %10015 = vmatpush3.msra.mxu1 %v8581_v25 }
 0x500   : > { %10030 = vmatprep.subr.mxu1 %v12520_v48 }
 0x5b8   : > { %v6396_v2 = vpop.f32.mrf.mxu1 }
 0x5ba   : > { %v6398_v62 = vpop.f32.mrf.mxu1 }
 0x5bb   : > { %v6403_v36 = vcombine.low %v6396_v2, %v6398_v62  ;;  %v8602_v2 = vld [vmem:[%s12481_s8 + $0xa0] sm:$0xff] }
 0x5bc   : > { %v8600_v62 = vld [vmem:[%s12482_s9 + $0x4] ss:$0 sm:$0xff] }
 0x5bd   : > { %v6410_v56 = vrot.slane %v6403_v36, %v6409_v52 }
 0x5bf   : > { %v6417_v12 = vrot.slane %v6410_v56, %v6409_v52  ;;  %v7015_v52 = vld [vmem:[%s12483_s10 + $0x18] sm:$0xff] }
 0x5c1   : > { %v6419_v49 = vadd.f32 %v6417_v12, %v6315_v53 }
 0x5c3   : > { %v6420_v28 = vmax.f32 %v6419_v49, 0.0  ;;  %v7014_v49 = vld [vmem:[%s12483_s10 + $0x10] sm:$0xff] }
 0x5c5   : > { %6425 = vst.msk [vmem:[#allocation10] sm:$0x3] %vm6423_vm8, %v6420_v28  ;;  %v7013_v28 = vld [vmem:[%s12483_s10 + $0x8] sm:$0xff] }
 0x5cc   : > { %v8568_v30 = vld [vmem:[#allocation10] ss:$0 sm:$0xff]  ;;  %v6459_v5 = vld [vmem:[#allocation10 + $0x1] sm:$0x1] }
 0x5cd   : > { %6455 = vrot.lane.b32.xlu1 %v8568_v30, %s10185_s24  ;;  %6435 = vrot.lane.b32.xlu0 %v8568_v30, %s10186_s25  ;;  %6460 = vst.msk [vmem:[#allocation11 + $0x4] sm:$0x1] %vm6427_vm9, %v6459_v5  ;;  %v6426_v24 = vld [vmem:[#allocation10] sm:$0x1]  ;;  %v8569_v22 = vld [vmem:[#allocation10 + $0x1] ss:$0 sm:$0xff] }
 0x5ce   : > { %6428 = vst.msk [vmem:[#allocation11] sm:$0x1] %vm6427_vm9, %v6426_v24 }
 0x5d1   : > { %6467 = vrot.lane.b32.xlu1 %v8569_v22, %s10186_s25  ;;  %6445 = vrot.lane.b32.xlu0 %v8568_v30, %s10187_s28 }
 0x5d5   : > { %6487 = vrot.lane.b32.xlu1 %v8569_v22, %s10185_s24  ;;  %6477 = vrot.lane.b32.xlu0 %v8569_v22, %s10187_s28  ;;  %v7102_v22 = vld [vmem:[%s12486_s13] sm:$0xff]  ;;  %s600_s24 = scalar_lea.vmem %s12492_s19, %s7935_s20 }
 0x63f   : > { %v6456_v39 = vpop.permute.xlu1 %6455  ;;  %v6436_v45 = vpop.permute.xlu0 %6435 }
 0x640   : > { %6458 = vst.msk [vmem:[#allocation11 + $0x3] sm:$0x1] %vm6427_vm9, %v6456_v39  ;;  %6438 = vst.msk [vmem:[#allocation11 + $0x1] sm:$0x1] %vm6427_vm9, %v6436_v45  ;;  %v8609_v39 = vld [vmem:[%s12484_s11] ss:$0 sm:$0xff] }
 0x643   : > { %v6468_v15 = vpop.permute.xlu1 %6467  ;;  %v6446_v57 = vpop.permute.xlu0 %6445 }
 0x644   : > { %6470 = vst.msk [vmem:[#allocation11 + $0x5] sm:$0x1] %vm6427_vm9, %v6468_v15  ;;  %6448 = vst.msk [vmem:[#allocation11 + $0x2] sm:$0x1] %vm6427_vm9, %v6446_v57 }
 0x647   : > { %v6488_v0 = vpop.permute.xlu1 %6487  ;;  %v6478_v13 = vpop.permute.xlu0 %6477 }
 0x648   : > { %6490 = vst.msk [vmem:[#allocation11 + $0x7] sm:$0x1] %vm6427_vm9, %v6488_v0  ;;  %6480 = vst.msk [vmem:[#allocation11 + $0x6] sm:$0x1] %vm6427_vm9, %v6478_v13  ;;  %v7101_v0 = vld [vmem:[%s12485_s12 + $0x8] sm:$0xff] }
 0x64f   : > { %v6491_v27 = vld [vmem:[#allocation11] sm:$0xff] }
 0x650   : > { %9995 = vmatmul.mubr.msk.f32.vlgmr.msra.gmra.mxu0 %vm674_vm0, %v6491_v27 }
 0x651   : > { %9998 = vmatpush3.msra.mxu0 %v8577_v37  ;;  %10005 = vmatprep.mubr.msk.f32.mxu0 %vm10183_vm1, %v12520_v48  ;;  %v7100_v37 = vld [vmem:[%s12485_s12] sm:$0xff] }
 0x652   : > { %9999 = vmatprep.subr.mxu0 %v12520_v48 }
 0x653   : > { %10000 = vmatpush3.msra.mxu0 %v8576_v63  ;;  %v7262_v63 = vld [vmem:[%s12488_s15 + $0x18] sm:$0xff] }
 0x654   : > { %10001 = vmatprep.subr.mxu0 %v12520_v48 }
 0x655   : > { %10002 = vmatpush3.msra.mxu0 %v8575_v34  ;;  %v7261_v34 = vld [vmem:[%s12488_s15 + $0x10] sm:$0xff] }
 0x656   : > { %10003 = vmatprep.subr.mxu0 %v12520_v48 }
 0x657   : > { %10004 = vmatpush3.msra.mxu0 %v8574_v54  ;;  %v7260_v54 = vld [vmem:[%s12488_s15 + $0x8] sm:$0xff] }
 0x658   : > { %10019 = vmatprep.subr.mxu0 %v12520_v48 }
 0x710   : > { %v6572_v17 = vpop.f32.mrf.mxu0 }
 0x711   : > { %v6573_v26 = vadd.f32 %v8572_v44, %v6572_v17  ;;  %v8619_v44 = vld [vmem:[%s12488_s15 + $0x38] sm:$0xff] }
 0x712   : > { %v9996_v47 = vpop.f32.mrf.mxu0 }
 0x713   : > { %v6576_v33 = vmax.f32 %v6573_v26, 0.0 }
 0x715   : > { %10006 = vmatmul.mubr.msk.f32.vlgmr.msra.gmra.mxu0 %vm674_vm0, %v6576_v33  ;;  %v8613_v33 = vld [vmem:[%s12487_s14] ss:$0 sm:$0xff] }
 0x716   : > { %10027 = vmatprep.mubr.msk.f32.mxu0 %vm10183_vm1, %v12520_v48  ;;  %10020 = vmatpush3.msra.mxu0 %v8591_v32 }
 0x717   : > { %10021 = vmatprep.subr.mxu0 %v12520_v48 }
 0x718   : > { %10022 = vmatpush3.msra.mxu0 %v8590_v19 }
 0x719   : > { %10023 = vmatprep.subr.mxu0 %v12520_v48 }
 0x71a   : > { %10024 = vmatpush3.msra.mxu0 %v8589_v21 }
 0x71b   : > { %10025 = vmatprep.subr.mxu0 %v12520_v48 }
 0x71c   : > { %10026 = vmatpush3.msra.mxu0 %v8588_v59 }
 0x71d   : > { %10041 = vmatprep.subr.mxu0 %v12520_v48 }
 0x7d5   : > { %v6659_v50 = vpop.f32.mrf.mxu0 }
 0x7d6   : > { %v6660_v51 = vadd.f32 %v8579_v11, %v6659_v50  ;;  %v8618_v11 = vld [vmem:[%s12488_s15 + $0x30] sm:$0xff]  ;;  %v8617_v50 = vld [vmem:[%s12488_s15 + $0x28] sm:$0xff] }
 0x7d7   : > { %v10007_v8 = vpop.f32.mrf.mxu0 }
 0x7d8   : > { %v6663_v31 = vmax.f32 %v6660_v51, 0.0  ;;  %v8616_v51 = vld [vmem:[%s12488_s15 + $0x20] sm:$0xff]  ;;  %v8626_v8 = vld [vmem:[%s12488_s15 + $0x58] sm:$0xff] }
 0x7da   : > { %10017 = vmatmul.mubr.msk.f32.vlgmr.msra.gmra.mxu1 %vm674_vm0, %v6663_v31  ;;  %v8614_v31 = vld [vmem:[%s12489_s16] ss:$0 sm:$0xff] }
 0x7db   : > { %10038 = vmatprep.mubr.msk.f32.mxu1 %vm10183_vm1, %v12520_v48  ;;  %10031 = vmatpush3.msra.mxu1 %v8598_v18 }
 0x7dc   : > { %10032 = vmatprep.subr.mxu1 %v12520_v48 }
 0x7dd   : > { %10033 = vmatpush3.msra.mxu1 %v8597_v20 }
 0x7de   : > { %10034 = vmatprep.subr.mxu1 %v12520_v48 }
 0x7df   : > { %10035 = vmatpush3.msra.mxu1 %v8596_v55 }
 0x7e0   : > { %10036 = vmatprep.subr.mxu1 %v12520_v48 }
 0x7e1   : > { %10037 = vmatpush3.msra.mxu1 %v8595_v61 }
 0x7e2   : > { %10052 = vmatprep.subr.mxu1 %v12520_v48 }
 0x89a   : > { %v6746_v60 = vpop.f32.mrf.mxu1 }
 0x89b   : > { %v6747_v29 = vadd.f32 %v8586_v9, %v6746_v60  ;;  %v8625_v9 = vld [vmem:[%s12488_s15 + $0x50] sm:$0xff]  ;;  %v8624_v60 = vld [vmem:[%s12488_s15 + $0x48] sm:$0xff] }
 0x89c   : > { %v10018_v41 = vpop.f32.mrf.mxu1 }
 0x89d   : > { %v6750_v35 = vmax.f32 %v6747_v29, 0.0  ;;  %v8623_v29 = vld [vmem:[%s12488_s15 + $0x40] sm:$0xff]  ;;  %v8633_v41 = vld [vmem:[%s12488_s15 + $0x78] sm:$0xff] }
 0x89f   : > { %10028 = vmatmul.mubr.msk.f32.vlgmr.msra.gmra.mxu0 %vm674_vm0, %v6750_v35  ;;  %v8621_v35 = vld [vmem:[%s12489_s16 + $0x1] ss:$0 sm:$0xff] }
 0x8a0   : > { %10049 = vmatprep.mubr.msk.f32.mxu0 %vm10183_vm1, %v12520_v48  ;;  %10042 = vmatpush3.msra.mxu0 %v8605_v23 }
 0x8a1   : > { %10043 = vmatprep.subr.mxu0 %v12520_v48 }
 0x8a2   : > { %10044 = vmatpush3.msra.mxu0 %v8604_v3 }
 0x8a3   : > { %10045 = vmatprep.subr.mxu0 %v12520_v48 }
 0x8a4   : > { %10046 = vmatpush3.msra.mxu0 %v8603_v46 }
 0x8a5   : > { %10047 = vmatprep.subr.mxu0 %v12520_v48 }
 0x8a6   : > { %10048 = vmatpush3.msra.mxu0 %v8602_v2 }
 0x8a7   : > { %10077 = vmatprep.subr.mxu0 %v12520_v48 }
 0x95f   : > { %v6833_v1 = vpop.f32.mrf.mxu0 }
 0x960   : > { %v6834_v10 = vadd.f32 %v8593_v14, %v6833_v1  ;;  %v8632_v14 = vld [vmem:[%s12488_s15 + $0x70] sm:$0xff]  ;;  %v8631_v1 = vld [vmem:[%s12488_s15 + $0x68] sm:$0xff] }
 0x961   : > { %v10029_v38 = vpop.f32.mrf.mxu0 }
 0x962   : > { %v6837_v16 = vmax.f32 %v6834_v10, 0.0  ;;  %v8630_v10 = vld [vmem:[%s12488_s15 + $0x60] sm:$0xff]  ;;  %v8640_v38 = vld [vmem:[%s12488_s15 + $0x98] sm:$0xff] }
 0x964   : > { %10039 = vmatmul.mubr.msk.f32.vlgmr.msra.gmra.mxu1 %vm674_vm0, %v6837_v16  ;;  %v8628_v16 = vld [vmem:[%s12489_s16 + $0x2] ss:$0 sm:$0xff] }
 0x965   : > { %10060 = vmatprep.mubr.msk.f32.mxu1 %vm10183_vm1, %v12520_v48  ;;  %10053 = vmatpush3.msra.mxu1 %v7015_v52 }
 0x966   : > { %10054 = vmatprep.subr.mxu1 %v12520_v48 }
 0x967   : > { %10055 = vmatpush3.msra.mxu1 %v7014_v49 }
 0x968   : > { %10056 = vmatprep.subr.mxu1 %v12520_v48 }
 0x969   : > { %10057 = vmatpush3.msra.mxu1 %v7013_v28 }
 0x96a   : > { %10058 = vmatprep.subr.mxu1 %v12520_v48 }
 0x96b   : > { %10059 = vmatpush3.msra.mxu1 %v7012_v7 }
 0x96c   : > { %10063 = vmatprep.subr.mxu1 %v12520_v48 }
 0xa24   : > { %v6920_v36 = vpop.f32.mrf.mxu1 }
 0xa25   : > { %v6921_v56 = vadd.f32 %v8600_v62, %v6920_v36  ;;  %v8639_v62 = vld [vmem:[%s12488_s15 + $0x90] sm:$0xff]  ;;  %v8638_v36 = vld [vmem:[%s12488_s15 + $0x88] sm:$0xff] }
 0xa26   : > { %v10040_v53 = vpop.f32.mrf.mxu1 }
 0xa27   : > { %v6924_v12 = vmax.f32 %v6921_v56, 0.0  ;;  %v8637_v56 = vld [vmem:[%s12488_s15 + $0x80] sm:$0xff]  ;;  %v8647_v53 = vld [vmem:[%s12488_s15 + $0xb8] sm:$0xff] }
 0xa29   : > { %10050 = vmatmul.mubr.msk.f32.vlgmr.msra.gmra.mxu0 %vm674_vm0, %v6924_v12  ;;  %v8635_v12 = vld [vmem:[%s12489_s16 + $0x3] ss:$0 sm:$0xff] }
 0xa2a   : > { %10085 = vmatprep.mubr.msk.f32.mxu0 %vm10183_vm1, %v12520_v48  ;;  %10078 = vmatpush3.msra.mxu0 %v7262_v63 }
 0xa2b   : > { %10079 = vmatprep.subr.mxu0 %v12520_v48 }
 0xa2c   : > { %10080 = vmatpush3.msra.mxu0 %v7261_v34 }
 0xa2d   : > { %10081 = vmatprep.subr.mxu0 %v12520_v48 }
 0xa2e   : > { %10082 = vmatpush3.msra.mxu0 %v7260_v54 }
 0xa2f   : > { %10083 = vmatprep.subr.mxu0 %v12520_v48 }
 0xa30   : > { %10084 = vmatpush3.msra.mxu0 %v7259_v4  ;;  %v8651_v4 = vld [vmem:[%s12491_s18] ss:$0 sm:$0xff] }
 0xa31   : > { %10099 = vmatprep.subr.mxu0 %v12520_v48 }
 0xae9   : > { %v7007_v42 = vpop.f32.mrf.mxu0 }
 0xaea   : > { %v7008_v30 = vadd.f32 %v8607_v43, %v7007_v42  ;;  %v8646_v42 = vld [vmem:[%s12488_s15 + $0xb0] sm:$0xff] }
 0xaeb   : > { %v10051_v5 = vpop.f32.mrf.mxu0 }
 0xaec   : > { %v7011_v24 = vmax.f32 %v7008_v30, 0.0  ;;  %v8645_v30 = vld [vmem:[%s12488_s15 + $0xa8] sm:$0xff]  ;;  %v8644_v5 = vld [vmem:[%s12488_s15 + $0xa0] sm:$0xff] }
 0xaee   : > { %10061 = vmatmul.mubr.msk.f32.vlgmr.msra.gmra.mxu1 %vm674_vm0, %v7011_v24  ;;  %v7782_v24 = vld [vmem:[%s12490_s17 + $0x18] sm:$0xff] }
 0xaef   : > { %10067 = vmatprep.mubr.msk.f32.mxu1 %vm10183_vm1, %v12520_v48  ;;  %10064 = vmatpush3.msra.mxu1 %v7103_v58  ;;  %v8642_v58 = vld [vmem:[%s12489_s16 + $0x4] ss:$0 sm:$0xff] }
 0xaf0   : > { %10065 = vmatprep.subr.mxu1 %v12520_v48 }
 0xaf1   : > { %10066 = vmatpush3.msra.mxu1 %v7102_v22 }
 0xaf2   : > { %10070 = vmatprep.subr.mxu1 %v12520_v48 }
 0xbae   : > { %v7092_v45 = vpop.f32.mrf.mxu1 }
 0xbaf   : > { %v7093_v15 = vadd.f32 %v8609_v39, %v7092_v45 }
 0xbb0   : > { %v10062_v57 = vpop.f32.mrf.mxu1 }
 0xbb1   : > { %7097 = vst.msk [vmem:[#allocation12] sm:$0xff] %vm7096_vm10, %v7093_v15  ;;  %v7781_v57 = vld [vmem:[%s12490_s17 + $0x10] sm:$0xff] }
 0xbb8   : > { %v7099_v13 = vld [vmem:[#allocation12 + $0x4] sm:$0xf]  ;;  %v7098_v27 = vld [vmem:[#allocation12] sm:$0xf] }
 0xbb9   : > { %10068 = vmatmul.mubr.msk.f32.vlgmr.msra.gmra.mxu1 %vm7096_vm10, %v7099_v13  ;;  %v7779_v13 = vld [vmem:[%s12490_s17] sm:$0xff] }
 0xbba   : > { %10071 = vmatpush3.msra.mxu1 %v7101_v0  ;;  %10074 = vmatprep.mubr.msk.f32.mxu1 %vm10183_vm1, %v12520_v48  ;;  %v7780_v0 = vld [vmem:[%s12490_s17 + $0x8] sm:$0xff] }
 0xbbb   : > { %10072 = vmatprep.subr.mxu1 %v12520_v48 }
 0xbbc   : > { %10073 = vmatpush3.msra.mxu1 %v7100_v37  ;;  %v8649_v37 = vld [vmem:[%s12489_s16 + $0x5] ss:$0 sm:$0xff] }
 0xbbd   : > { %10075 = vmatmul.mubr.msk.f32.vlgmr.msra.gmra.mxu1 %vm7096_vm10, %v7098_v27  ;;  %10088 = vmatprep.subr.mxu1 %v12520_v48 }
 0xbbe   : > { %10096 = vmatprep.mubr.msk.f32.mxu1 %vm10183_vm1, %v12520_v48  ;;  %10089 = vmatpush3.msra.mxu1 %v8619_v44 }
 0xbbf   : > { %10090 = vmatprep.subr.mxu1 %v12520_v48 }
 0xbc0   : > { %10091 = vmatpush3.msra.mxu1 %v8618_v11 }
 0xbc1   : > { %10092 = vmatprep.subr.mxu1 %v12520_v48 }
 0xbc2   : > { %10093 = vmatpush3.msra.mxu1 %v8617_v50 }
 0xbc3   : > { %10094 = vmatprep.subr.mxu1 %v12520_v48 }
 0xbc4   : > { %10095 = vmatpush3.msra.mxu1 %v8616_v51 }
 0xbc5   : > { %10110 = vmatprep.subr.mxu1 %v12520_v48 }
 0xc79   : > { %v7173_v17 = vpop.f32.mrf.mxu1 }
 0xc7b   : > { %v10069_v26 = vpop.f32.mrf.mxu1 }
 0xc7d   : > { %v7246_v47 = vpop.f32.mrf.mxu1 }
 0xc7e   : > { %v7247_v40 = vadd.f32 %v7246_v47, %v7173_v17 }
 0xc7f   : > { %v10076_v6 = vpop.f32.mrf.mxu1 }
 0xc80   : > { %v7257_v25 = vadd.f32 %v8613_v33, %v7247_v40 }
 0xc82   : > { %v7258_v32 = vmax.f32 %v7257_v25, 0.0 }
 0xc84   : > { %10086 = vmatmul.mubr.msk.f32.vlgmr.msra.gmra.mxu0 %vm674_vm0, %v7258_v32 }
 0xc85   : > { %10107 = vmatprep.mubr.msk.f32.mxu0 %vm10183_vm1, %v12520_v48  ;;  %10100 = vmatpush3.msra.mxu0 %v8626_v8 }
 0xc86   : > { %10101 = vmatprep.subr.mxu0 %v12520_v48 }
 0xc87   : > { %10102 = vmatpush3.msra.mxu0 %v8625_v9 }
 0xc88   : > { %10103 = vmatprep.subr.mxu0 %v12520_v48 }
 0xc89   : > { %10104 = vmatpush3.msra.mxu0 %v8624_v60 }
 0xc8a   : > { %10105 = vmatprep.subr.mxu0 %v12520_v48 }
 0xc8b   : > { %10106 = vmatpush3.msra.mxu0 %v8623_v29 }
 0xc8c   : > { %10121 = vmatprep.subr.mxu0 %v12520_v48 }
 0xd44   : > { %v7339_v19 = vpop.f32.mrf.mxu0 }
 0xd45   : > { %v7340_v21 = vadd.f32 %v8614_v31, %v7339_v19 }
 0xd46   : > { %v10087_v59 = vpop.f32.mrf.mxu0 }
 0xd47   : > { %v7343_v18 = vmax.f32 %v7340_v21, 0.0 }
 0xd49   : > { %10097 = vmatmul.mubr.msk.f32.vlgmr.msra.gmra.mxu1 %vm674_vm0, %v7343_v18 }
 0xd4a   : > { %10118 = vmatprep.mubr.msk.f32.mxu1 %vm10183_vm1, %v12520_v48  ;;  %10111 = vmatpush3.msra.mxu1 %v8633_v41 }
 0xd4b   : > { %10112 = vmatprep.subr.mxu1 %v12520_v48 }
 0xd4c   : > { %10113 = vmatpush3.msra.mxu1 %v8632_v14 }
 0xd4d   : > { %10114 = vmatprep.subr.mxu1 %v12520_v48 }
 0xd4e   : > { %10115 = vmatpush3.msra.mxu1 %v8631_v1 }
 0xd4f   : > { %10116 = vmatprep.subr.mxu1 %v12520_v48 }
 0xd50   : > { %10117 = vmatpush3.msra.mxu1 %v8630_v10 }
 0xd51   : > { %10132 = vmatprep.subr.mxu1 %v12520_v48 }
 0xe09   : > { %v7426_v20 = vpop.f32.mrf.mxu1 }
 0xe0a   : > { %v7427_v55 = vadd.f32 %v8621_v35, %v7426_v20 }
 0xe0b   : > { %v10098_v61 = vpop.f32.mrf.mxu1 }
 0xe0c   : > { %v7430_v23 = vmax.f32 %v7427_v55, 0.0 }
 0xe0e   : > { %10108 = vmatmul.mubr.msk.f32.vlgmr.msra.gmra.mxu0 %vm674_vm0, %v7430_v23 }
 0xe0f   : > { %10129 = vmatprep.mubr.msk.f32.mxu0 %vm10183_vm1, %v12520_v48  ;;  %10122 = vmatpush3.msra.mxu0 %v8640_v38 }
 0xe10   : > { %10123 = vmatprep.subr.mxu0 %v12520_v48 }
 0xe11   : > { %10124 = vmatpush3.msra.mxu0 %v8639_v62 }
 0xe12   : > { %10125 = vmatprep.subr.mxu0 %v12520_v48 }
 0xe13   : > { %10126 = vmatpush3.msra.mxu0 %v8638_v36 }
 0xe14   : > { %10127 = vmatprep.subr.mxu0 %v12520_v48 }
 0xe15   : > { %10128 = vmatpush3.msra.mxu0 %v8637_v56 }
 0xe16   : > { %10143 = vmatprep.subr.mxu0 %v12520_v48 }
 0xece   : > { %v7513_v3 = vpop.f32.mrf.mxu0 }
 0xecf   : > { %v7514_v46 = vadd.f32 %v8628_v16, %v7513_v3 }
 0xed0   : > { %v10109_v2 = vpop.f32.mrf.mxu0 }
 0xed1   : > { %v7517_v52 = vmax.f32 %v7514_v46, 0.0 }
 0xed3   : > { %10119 = vmatmul.mubr.msk.f32.vlgmr.msra.gmra.mxu1 %vm674_vm0, %v7517_v52 }
 0xed4   : > { %10140 = vmatprep.mubr.msk.f32.mxu1 %vm10183_vm1, %v12520_v48  ;;  %10133 = vmatpush3.msra.mxu1 %v8647_v53 }
 0xed5   : > { %10134 = vmatprep.subr.mxu1 %v12520_v48 }
 0xed6   : > { %10135 = vmatpush3.msra.mxu1 %v8646_v42 }
 0xed7   : > { %10136 = vmatprep.subr.mxu1 %v12520_v48 }
 0xed8   : > { %10137 = vmatpush3.msra.mxu1 %v8645_v30 }
 0xed9   : > { %10138 = vmatprep.subr.mxu1 %v12520_v48 }
 0xeda   : > { %10139 = vmatpush3.msra.mxu1 %v8644_v5 }
 0xf93   : > { %v7600_v49 = vpop.f32.mrf.mxu1 }
 0xf94   : > { %v7601_v28 = vadd.f32 %v8635_v12, %v7600_v49 }
 0xf95   : > { %v10120_v7 = vpop.f32.mrf.mxu1 }
 0xf96   : > { %v7604_v43 = vmax.f32 %v7601_v28, 0.0 }
 0xf98   : > { %10130 = vmatmul.mubr.msk.f32.vlgmr.msra.gmra.mxu0 %vm674_vm0, %v7604_v43 }
 0xf99   : > { %10151 = vmatprep.mubr.msk.f32.mxu0 %vm10183_vm1, %v12520_v48  ;;  %10144 = vmatpush3.msra.mxu0 %v7782_v24 }
 0xf9a   : > { %10145 = vmatprep.subr.mxu0 %v12520_v48 }
 0xf9b   : > { %10146 = vmatpush3.msra.mxu0 %v7781_v57 }
 0xf9c   : > { %10147 = vmatprep.subr.mxu0 %v12520_v48 }
 0xf9d   : > { %10148 = vmatpush3.msra.mxu0 %v7780_v0 }
 0xf9e   : > { %10149 = vmatprep.subr.mxu0 %v12520_v48 }
 0xf9f   : > { %10150 = vmatpush3.msra.mxu0 %v7779_v13 }
0x1058   : > { %v7687_v22 = vpop.f32.mrf.mxu0 }
0x1059   : > { %v7688_v39 = vadd.f32 %v8642_v58, %v7687_v22 }
0x105a   : > { %v10131_v45 = vpop.f32.mrf.mxu0 }
0x105b   : > { %v7691_v15 = vmax.f32 %v7688_v39, 0.0 }
0x105d   : > { %10141 = vmatmul.mubr.msk.f32.vlgmr.msra.gmra.mxu1 %vm674_vm0, %v7691_v15 }
0x111d   : > { %v7774_v27 = vpop.f32.mrf.mxu1 }
0x111e   : > { %v7775_v63 = vadd.f32 %v8649_v37, %v7774_v27 }
0x111f   : > { %v10142_v34 = vpop.f32.mrf.mxu1 }
0x1120   : > { %v7778_v54 = vmax.f32 %v7775_v63, 0.0 }
0x1122   : > { %10152 = vmatmul.mubr.msk.f32.vlgmr.msra.gmra.mxu0 %vm674_vm0, %v7778_v54 }
0x11e2   : > { %v7859_v44 = vpop.f32.mrf.mxu0 }
0x11e3   : > { %v7860_v17 = vadd.f32 %v8651_v4, %v7859_v44 }
0x11e4   : > { %v10153_v48 = vpop.f32.mrf.mxu0 }
0x11e5   : > { %v7864_v26 = vsel %vm7863_vm11, %v7860_v17, -inf }
0x11e6   : > { %7865 = vmax.xlane.f32.xlu0 %v7864_v26 }
0x126f   : > { %v7866_v47 = vpop.xlane.xlu0 %7865 }
0x1270   : > { %v7867_v33 = vsub.f32 %v7860_v17, %v7866_v47 }
0x1272   : > { %v7868_v40 = vmul.f32 1.442695, %v7867_v33 }
0x1274   : > { %10169 = vpow2.f32 %v7868_v40 }
0x1281   : > { %v10170_v6 = vpop.eup %10169 }
0x1282   : > { %v7870_v25 = vsel %vm7863_vm11, %v10170_v6, 0.0 }
0x1283   : > { %7871 = vadd.xlane.f32.xlu1 %v7870_v25 }
0x130c   : > { %v7872_v32 = vpop.xlane.xlu1 %7871 }
0x130d   : > { %10171 = vrcp.f32 %v7872_v32 }
0x131a   : > { %v10172_v11 = vpop.eup %10171 }
0x131b   : > { %v7874_v50 = vmul.f32 %v10172_v11, %v10170_v6 }
0x131d   : > { %7875 = vst.msk [vmem:[%s600_s24] sm:$0xf] %vm7863_vm11, %v7874_v50 }
0x131e PF: > { %s29_s0 = sadd.s32 1, %s10180_s0  }
0x131f   : > { %p26_p4 = scmp.ge.s32.totalorder %s29_s0, 4  }
0x1321   :  { %28 = sbr.rel (!%p26_p4) target bundleno = 5 (0x5), region = 545 }

</bundles_post_ra>
